<compile_context>
chip_gen: v7x
topology: tpu7x:2x2x1
jax: 0.10.0
libtpu: 0.0.40
codegen_flags: <defaults>
</compile_context>

<pallas_src>
import functools
import math

import jax
import jax.numpy as jnp
from jax import lax
from jax.experimental import pallas as pl
from jax.experimental.pallas import tpu as pltpu


def _softplus(x):
    return jnp.where(x > 20.0, x, jnp.log1p(jnp.exp(jnp.minimum(x, 20.0))))


# -----------------------------------------------------------------------------
# Kernel: one (batch, sequence-chunk) tile per grid step.
# -----------------------------------------------------------------------------
def _mamba_layer_kernel(
    # inputs
    x_ref,        # (1, cL, dim)                  io dtype
    ln_w_ref,     # (1, dim)                      f32
    ln_b_ref,     # (1, dim)                      f32
    w_x_ref,      # (dim, d_inner)                bf16  in_proj (x half)^T
    w_z_ref,      # (dim, d_inner)                bf16  in_proj (z half)^T
    conv_w_ref,   # (d_conv, d_inner)             f32   depthwise conv taps
    conv_b_ref,   # (1, d_inner)                  f32
    w_xp_ref,     # (d_inner, dt_rank+2*d_state)  bf16  fused x_proj^T [dt|B|C]
    w_dt_ref,     # (dt_rank, d_inner)            bf16  dt_proj^T
    dt_b_ref,     # (1, d_inner)                  f32   dt_proj bias
    a_t_ref,      # (d_state, d_inner)            f32   A^T = (-exp(A_log))^T
    d_vec_ref,    # (1, d_inner)                  f32   D
    w_out_ref,    # (d_inner, dim)                bf16  out_proj^T
    # output
    o_ref,        # (1, cL, dim)                  io dtype
    # scratch (persists across grid steps -> carries state across seq chunks)
    h_ref,        # (d_state, d_inner)  f32   SSM state (carried)
    tail_ref,     # (8, d_inner)        f32   last 8 pre-conv rows of prev chunk
    dlt_ref,      # (cL, d_inner)       f32   delta
    u_ref,        # (cL, d_inner)       f32   conv + SiLU output
    z_ref,        # (cL, d_inner)       f32   gate branch
    y_ref,        # (cL, d_inner)       f32   scan output
    b_ref,        # (cL, d_state)       f32
    c_ref,        # (cL, d_state)       f32
    *, d_blk, unroll,
):
    _, cL, _dim = x_ref.shape
    d_conv, d_inner = conv_w_ref.shape
    d_state = a_t_ref.shape[0]
    dt_rank = w_dt_ref.shape[0]
    cdt = w_x_ref.dtype                      # matmul compute dtype (bf16)
    tail = d_conv - 1
    n_dblk = d_inner // d_blk
    n_t = cL // unroll

    chunk = pl.program_id(1)

    # ---- reset per-sequence carried state at the first chunk ------------------
    @pl.when(chunk == 0)
    def _():
        h_ref[...] = jnp.zeros_like(h_ref)
        tail_ref[...] = jnp.zeros_like(tail_ref)

    # ---- LayerNorm over channels (f32) ----------------------------------------
    x = x_ref[0].astype(jnp.float32)                      # (cL, dim)
    mean = jnp.mean(x, axis=-1, keepdims=True)
    xc = x - mean
    var = jnp.mean(xc * xc, axis=-1, keepdims=True)
    xn = xc * lax.rsqrt(var + 1e-5) * ln_w_ref[...] + ln_b_ref[...]
    xn_c = xn.astype(cdt)

    # ---- in_proj with split weights (lane-dense outputs, bf16 MXU) ------------
    x_b = jnp.dot(xn_c, w_x_ref[...], preferred_element_type=jnp.float32)
    z_ref[...] = jnp.dot(xn_c, w_z_ref[...], preferred_element_type=jnp.float32)

    # ---- causal depthwise Conv1d (register shifts, small carried tail) --------
    conv_w = conv_w_ref[...]                              # (d_conv, d_inner)
    prev8 = tail_ref[...]                                 # prev chunk last 8 rows
    tail_ref[...] = x_b[cL - 8:, :]                       # carry for next chunk
    # first 8 output rows from a 16-row window [prev8 ; x_b[0:8]]
    win = jnp.concatenate([prev8, x_b[0:8, :]], axis=0)   # (16, d_inner)
    head = win[8 - tail:16 - tail, :] * conv_w[0:1, :]
    for k in range(1, d_conv):
        head = head + win[8 - tail + k:16 - tail + k, :] * conv_w[k:k + 1, :]
    if cL > 8:
        nb = cL - 8
        body_acc = x_b[8 - tail:8 - tail + nb, :] * conv_w[0:1, :]
        for k in range(1, d_conv):
            s = 8 - tail + k
            body_acc = body_acc + x_b[s:s + nb, :] * conv_w[k:k + 1, :]
        acc = jnp.concatenate([head, body_acc], axis=0)
    else:
        acc = head
    u = acc + conv_b_ref[...]
    u = u * jax.nn.sigmoid(u)                             # SiLU (f32)
    u_ref[...] = u
    u_c = u.astype(cdt)

    # ---- fused x_proj (dt | B | C) + dt_proj + softplus -----------------------
    x_dbl = jnp.dot(u_c, w_xp_ref[...], preferred_element_type=jnp.float32)
    dt_in = x_dbl[:, 0:dt_rank]
    b_ref[...] = x_dbl[:, dt_rank:dt_rank + d_state]
    c_ref[...] = x_dbl[:, dt_rank + d_state:dt_rank + 2 * d_state]
    dlt_ref[...] = _softplus(
        jnp.dot(dt_in.astype(cdt), w_dt_ref[...], preferred_element_type=jnp.float32)
        + dt_b_ref[...])

    # ---- selective scan, blocked along d_inner ---------------------------------
    for blk in range(n_dblk):
        c0 = blk * d_blk
        a_blk = a_t_ref[:, c0:c0 + d_blk]                 # (d_state, d_blk)

        def body(i, h, c0=c0, a_blk=a_blk):
            t0 = pl.multiple_of(i * unroll, unroll)
            d_rows = dlt_ref[pl.ds(t0, unroll), pl.ds(c0, d_blk)]   # (U, d_blk)
            u_rows = u_ref[pl.ds(t0, unroll), pl.ds(c0, d_blk)]     # (U, d_blk)
            bt = b_ref[pl.ds(t0, unroll), :].T                      # (d_state, U)
            ct = c_ref[pl.ds(t0, unroll), :].T                      # (d_state, U)
            # hoist EUP / broadcast work off the sequential h chain
            da = [jnp.exp(d_rows[j:j + 1, :] * a_blk) for j in range(unroll)]
            bu = [bt[:, j:j + 1] * (d_rows[j:j + 1, :] * u_rows[j:j + 1, :])
                  for j in range(unroll)]
            ys = []
            for j in range(unroll):
                h = da[j] * h + bu[j]
                ys.append(jnp.sum(h * ct[:, j:j + 1], axis=0, keepdims=True))
            y_ref[pl.ds(t0, unroll), pl.ds(c0, d_blk)] = jnp.concatenate(ys, axis=0)
            return h

        h_blk = lax.fori_loop(0, n_t, body, h_ref[:, c0:c0 + d_blk])
        h_ref[:, c0:c0 + d_blk] = h_blk                   # carry to next chunk

    # ---- skip connection, SiLU(z) gate, out_proj ------------------------------
    u_all = u_ref[...]
    z = z_ref[...]
    y = y_ref[...] + d_vec_ref[...] * u_all
    y = y * (z * jax.nn.sigmoid(z))
    o_ref[0] = jnp.dot(y.astype(cdt), w_out_ref[...],
                       preferred_element_type=jnp.float32).astype(o_ref.dtype)


# -----------------------------------------------------------------------------
# Wrapper helpers
# -----------------------------------------------------------------------------
def _vmem_budget_bytes():
    cap = None
    try:
        info = pltpu.get_tpu_info()
        for name in ("vmem_capacity_bytes", "vmem_size_bytes", "vmem_bytes"):
            v = getattr(info, name, None)
            if v:
                cap = int(v)
                break
    except Exception:
        cap = None
    if cap is None:
        return 48 * 1024 * 1024        # safe on every generation (v7x has 64 MiB)
    return max(32 * 1024 * 1024, int(cap * 0.85))


def _estimate_vmem_bytes(chunk, dim, d_inner, d_state, weight_bytes, io_bytes):
    xo = 2 * 2 * chunk * dim * io_bytes                 # x & o chunks, double-buffered
    scr = 4 * (d_state * d_inner + 8 * d_inner)         # h + conv tail
    scr += 4 * 4 * chunk * d_inner                      # delta, u, z, y
    scr += 4 * 2 * chunk * max(d_state, 128)            # B, C (lane padded)
    return int(1.15 * (xo + weight_bytes + scr)) + (2 << 20)


def _choose_chunk(L, budget, dim, d_inner, d_state, weight_bytes, io_bytes, max_chunk):
    cands = [c for c in range(8, min(L, max_chunk) + 1, 8) if L % c == 0]
    if not cands:
        return min(L, max_chunk)
    best = cands[0]
    for c in cands:
        if _estimate_vmem_bytes(c, dim, d_inner, d_state, weight_bytes, io_bytes) <= budget:
            best = c
    return best


def _weight_spec(a, single_buffer):
    nd = a.ndim
    idx = lambda b, c: (0,) * nd
    if single_buffer and hasattr(pl, "Buffered"):
        try:
            # constant index_map -> single-buffer the resident weight
            return pl.BlockSpec(a.shape, idx, pipeline_mode=pl.Buffered(1))
        except TypeError:
            pass
    return pl.BlockSpec(a.shape, idx)


def mamba_layer(x, params, *, chunk_l=None, d_blk=None, io_dtype=jnp.float32,
                max_chunk=512):
    B, L, dim = x.shape
    x = x.astype(io_dtype)
    d_conv, d_inner = params["conv_w"].shape
    d_state = params["a_t"].shape[0]
    dt_rank = params["w_dt_t"].shape[0]
    assert d_conv - 1 <= 8

    # fused x_proj weight: (d_inner, dt_rank + 2*d_state) = [dt | B | C]
    w_xp_t = jnp.concatenate(
        [params["w_dtin_t"], params["w_b_t"], params["w_c_t"]], axis=1)

    weights = (
        params["ln_w"], params["ln_b"], params["w_x_t"], params["w_z_t"],
        params["conv_w"], params["conv_b"], w_xp_t, params["w_dt_t"],
        params["dt_b"], params["a_t"], params["d_vec"], params["w_out_t"],
    )
    weight_bytes = sum(int(w.size) * jnp.dtype(w.dtype).itemsize for w in weights)
    io_bytes = jnp.dtype(io_dtype).itemsize

    budget = _vmem_budget_bytes()
    assert L >= 8 and L % 8 == 0, "sequence length must be a multiple of 8"
    if chunk_l is None:
        chunk_l = _choose_chunk(L, budget, dim, d_inner, d_state,
                                weight_bytes, io_bytes, max_chunk)
    assert chunk_l >= 8 and chunk_l % 8 == 0 and L % chunk_l == 0
    n_chunks = L // chunk_l

    if d_blk is None:
        if d_inner % 256 == 0:
            d_blk = 256
        elif d_inner % 128 == 0:
            d_blk = 128
        else:
            d_blk = d_inner
    assert d_inner % d_blk == 0
    unroll = math.gcd(chunk_l, 8)

    kernel = functools.partial(_mamba_layer_kernel, d_blk=d_blk, unroll=unroll)

    matmul_flops = 2 * B * L * (2 * dim * d_inner
                                + d_inner * (dt_rank + 2 * d_state)
                                + dt_rank * d_inner
                                + d_inner * dim)
    scan_flops = 6 * B * L * d_state * d_inner + 2 * B * L * d_conv * d_inner
    transcendentals = B * L * (d_state * d_inner + 4 * d_inner)
    bytes_accessed = 2 * B * L * dim * io_bytes + weight_bytes

    scratch_shapes = [
        pltpu.VMEM((d_state, d_inner), jnp.float32),   # h (carried)
        pltpu.VMEM((8, d_inner), jnp.float32),         # conv tail (carried)
        pltpu.VMEM((chunk_l, d_inner), jnp.float32),   # delta
        pltpu.VMEM((chunk_l, d_inner), jnp.float32),   # u
        pltpu.VMEM((chunk_l, d_inner), jnp.float32),   # z
        pltpu.VMEM((chunk_l, d_inner), jnp.float32),   # y
        pltpu.VMEM((chunk_l, d_state), jnp.float32),   # B
        pltpu.VMEM((chunk_l, d_state), jnp.float32),   # C
    ]

    def run(single_buffer_weights):
        f = pl.pallas_call(
            kernel,
            out_shape=jax.ShapeDtypeStruct((B, L, dim), io_dtype),
            grid=(B, n_chunks),
            in_specs=[pl.BlockSpec((1, chunk_l, dim), lambda b, c: (b, c, 0))]
                     + [_weight_spec(w, single_buffer_weights) for w in weights],
            out_specs=pl.BlockSpec((1, chunk_l, dim), lambda b, c: (b, c, 0)),
            scratch_shapes=scratch_shapes,
            compiler_params=pltpu.CompilerParams(
                dimension_semantics=("parallel", "arbitrary"),
                vmem_limit_bytes=int(budget)),
            cost_estimate=pl.CostEstimate(
                flops=int(matmul_flops + scan_flops),
                transcendentals=int(transcendentals),
                bytes_accessed=int(bytes_accessed)),
        )
        return jax.block_until_ready(f(x, *weights))

    try:
        return run(True)
    except Exception:
        # installed JAX may not accept Buffered(1) on top-level pallas_call specs
        return run(False)


# -----------------------------------------------------------------------------
# Pure-JAX reference (mirrors the kernel's bf16-matmul / f32-elementwise policy)
# -----------------------------------------------------------------------------
def mamba_layer_ref(x, params):
    B, L, dim = x.shape
    d_conv, d_inner = params["conv_w"].shape
    cdt = params["w_x_t"].dtype
    f32 = jnp.float32

    x = x.astype(f32)
    mean = jnp.mean(x, axis=-1, keepdims=True)
    xc = x - mean
    var = jnp.mean(xc * xc, axis=-1, keepdims=True)
    xn = xc * lax.rsqrt(var + 1e-5) * params["ln_w"][0] + params["ln_b"][0]
    xn_c = xn.astype(cdt)

    x_b = jnp.dot(xn_c, params["w_x_t"], preferred_element_type=f32)
    z = jnp.dot(xn_c, params["w_z_t"], preferred_element_type=f32)

    pad = jnp.concatenate([jnp.zeros((B, d_conv - 1, d_inner), f32), x_b], axis=1)
    acc = pad[:, 0:L, :] * params["conv_w"][0]
    for k in range(1, d_conv):
        acc = acc + pad[:, k:k + L, :] * params["conv_w"][k]
    u = acc + params["conv_b"][0]
    u = u * jax.nn.sigmoid(u)
    u_c = u.astype(cdt)

    dt_in = jnp.dot(u_c, params["w_dtin_t"], preferred_element_type=f32)
    b_mat = jnp.dot(u_c, params["w_b_t"], preferred_element_type=f32)
    c_mat = jnp.dot(u_c, params["w_c_t"], preferred_element_type=f32)
    delta = _softplus(jnp.dot(dt_in.astype(cdt), params["w_dt_t"],
                              preferred_element_type=f32) + params["dt_b"][0])

    a = params["a_t"].T                                   # (d_inner, d_state)
    d_vec = params["d_vec"][0]

    def step(h, inp):
        d_t, du_t, b_t, c_t = inp
        da = jnp.exp(d_t[..., None] * a)                  # (B, d_inner, d_state)
        h = da * h + b_t[:, None, :] * du_t[..., None]
        y_t = jnp.sum(h * c_t[:, None, :], axis=-1)
        return h, y_t

    h0 = jnp.zeros((B, d_inner, a.shape[1]), f32)
    _, y = lax.scan(step, h0,
                    (delta.swapaxes(0, 1), (delta * u).swapaxes(0, 1),
                     b_mat.swapaxes(0, 1), c_mat.swapaxes(0, 1)))
    y = y.swapaxes(0, 1) + d_vec * u
    y = y * (z * jax.nn.sigmoid(z))
    return jnp.dot(y.astype(cdt), params["w_out_t"], preferred_element_type=f32)


# -----------------------------------------------------------------------------
# Deterministic parameter construction (shapes follow Mamba.__init__ defaults)
# -----------------------------------------------------------------------------
def make_params(dim, d_state=16, d_conv=4, expand=2, mm_dtype=jnp.bfloat16):
    d_inner = expand * dim
    dt_rank = math.ceil(dim / 16)
    f32 = jnp.float32
    ks = jax.random.split(jax.random.PRNGKey(0), 8)

    w_x = jax.random.normal(ks[0], (dim, d_inner), f32) / math.sqrt(dim)
    w_z = jax.random.normal(ks[1], (dim, d_inner), f32) / math.sqrt(dim)
    conv_w = jax.random.normal(ks[2], (d_conv, d_inner), f32) * 0.3
    conv_b = jax.random.normal(ks[3], (1, d_inner), f32) * 0.1
    w_dtin = jax.random.normal(ks[4], (d_inner, dt_rank), f32) / math.sqrt(d_inner)
    w_b = jax.random.normal(ks[5], (d_inner, d_state), f32) / math.sqrt(d_inner)
    w_c = jax.random.normal(ks[6], (d_inner, d_state), f32) / math.sqrt(d_inner)
    w_dt = jax.random.normal(ks[7], (dt_rank, d_inner), f32) / math.sqrt(max(dt_rank, 1))
    dt_b = jax.random.normal(ks[0], (1, d_inner), f32) * 0.1 - 2.0
    w_out = jax.random.normal(ks[1], (d_inner, dim), f32) / math.sqrt(d_inner)

    # A = -exp(A_log), A_log[d, n] = log(n + 1) (mamba default init), stored as A^T
    a_t = -jnp.tile(jnp.arange(1, d_state + 1, dtype=f32)[:, None], (1, d_inner))

    return {
        "ln_w": jnp.ones((1, dim), f32),
        "ln_b": jnp.zeros((1, dim), f32),
        "w_x_t": w_x.astype(mm_dtype),
        "w_z_t": w_z.astype(mm_dtype),
        "conv_w": conv_w,
        "conv_b": conv_b,
        "w_dtin_t": w_dtin.astype(mm_dtype),
        "w_b_t": w_b.astype(mm_dtype),
        "w_c_t": w_c.astype(mm_dtype),
        "w_dt_t": w_dt.astype(mm_dtype),
        "dt_b": dt_b,
        "a_t": a_t,                               # (d_state, d_inner)
        "d_vec": jnp.ones((1, d_inner), f32),
        "w_out_t": w_out.astype(mm_dtype),
    }


if __name__ == "__main__":
    B, L, dim = 2, 32, 16
    params = make_params(dim)                     # d_inner=32, d_state=16, dt_rank=1
    x = jax.random.normal(jax.random.PRNGKey(0), (B, L, dim), jnp.float32)

    ref = jax.block_until_ready(mamba_layer_ref(x, params))

    # chunk_l=16 exercises the carried conv-tail/SSM-state + the >8-row conv
    # path; chunk_l=8 exercises the head-only conv path with 4 chunks; None
    # exercises the auto chunk/VMEM-budget selection.
    for cl in (16, 8, None):
        out = mamba_layer(x, params, chunk_l=cl)
        assert out.shape == (B, L, dim)
        err = float(jnp.max(jnp.abs(out - ref)))
        assert jnp.allclose(out, ref, atol=5e-3, rtol=5e-3), (cl, err)

    print("KERNEL_OK")
</pallas_src>

<mosaic_0001>
module attributes {stable_mosaic.version = 11 : i64} {
  func.func @_mamba_layer_kernel(%arg0: i32, %arg1: i32, %arg2: memref<1x16x16xf32, #tpu.memory_space<vmem>>, %arg3: memref<1x16xf32, #tpu.memory_space<vmem>>, %arg4: memref<1x16xf32, #tpu.memory_space<vmem>>, %arg5: memref<16x32xbf16, #tpu.memory_space<vmem>>, %arg6: memref<16x32xbf16, #tpu.memory_space<vmem>>, %arg7: memref<4x32xf32, #tpu.memory_space<vmem>>, %arg8: memref<1x32xf32, #tpu.memory_space<vmem>>, %arg9: memref<32x33xbf16, #tpu.memory_space<vmem>>, %arg10: memref<1x32xbf16, #tpu.memory_space<vmem>>, %arg11: memref<1x32xf32, #tpu.memory_space<vmem>>, %arg12: memref<16x32xf32, #tpu.memory_space<vmem>>, %arg13: memref<1x32xf32, #tpu.memory_space<vmem>>, %arg14: memref<32x16xbf16, #tpu.memory_space<vmem>>, %arg15: memref<1x16x16xf32, #tpu.memory_space<vmem>>, %arg16: memref<16x32xf32, #tpu.memory_space<vmem>>, %arg17: memref<8x32xf32, #tpu.memory_space<vmem>>, %arg18: memref<16x32xf32, #tpu.memory_space<vmem>>, %arg19: memref<16x32xf32, #tpu.memory_space<vmem>>, %arg20: memref<16x32xf32, #tpu.memory_space<vmem>>, %arg21: memref<16x32xf32, #tpu.memory_space<vmem>>, %arg22: memref<16x16xf32, #tpu.memory_space<vmem>>, %arg23: memref<16x16xf32, #tpu.memory_space<vmem>>) attributes {dimension_semantics = [#tpu.dimension_semantics<parallel>, #tpu.dimension_semantics<arbitrary>], iteration_bounds = array<i64: 2, 2>, scalar_prefetch = 0 : i64, scratch_operands = 8 : i64, tpu.core_type = #tpu.core_type<tc>, window_params = [{transform_indices = @transform_0, window_bounds = array<i64: 1, 16, 16>}, {pipeline_mode = #tpu.pipeline_mode<synchronous>, transform_indices = @transform_1, window_bounds = array<i64: 1, 16>}, {pipeline_mode = #tpu.pipeline_mode<synchronous>, transform_indices = @transform_2, window_bounds = array<i64: 1, 16>}, {pipeline_mode = #tpu.pipeline_mode<synchronous>, transform_indices = @transform_3, window_bounds = array<i64: 16, 32>}, {pipeline_mode = #tpu.pipeline_mode<synchronous>, transform_indices = @transform_4, window_bounds = array<i64: 16, 32>}, {pipeline_mode = #tpu.pipeline_mode<synchronous>, transform_indices = @transform_5, window_bounds = array<i64: 4, 32>}, {pipeline_mode = #tpu.pipeline_mode<synchronous>, transform_indices = @transform_6, window_bounds = array<i64: 1, 32>}, {pipeline_mode = #tpu.pipeline_mode<synchronous>, transform_indices = @transform_7, window_bounds = array<i64: 32, 33>}, {pipeline_mode = #tpu.pipeline_mode<synchronous>, transform_indices = @transform_8, window_bounds = array<i64: 1, 32>}, {pipeline_mode = #tpu.pipeline_mode<synchronous>, transform_indices = @transform_9, window_bounds = array<i64: 1, 32>}, {pipeline_mode = #tpu.pipeline_mode<synchronous>, transform_indices = @transform_10, window_bounds = array<i64: 16, 32>}, {pipeline_mode = #tpu.pipeline_mode<synchronous>, transform_indices = @transform_11, window_bounds = array<i64: 1, 32>}, {pipeline_mode = #tpu.pipeline_mode<synchronous>, transform_indices = @transform_12, window_bounds = array<i64: 32, 16>}, {transform_indices = @transform_13, window_bounds = array<i64: 1, 16, 16>}]} {
    %c0_i32 = arith.constant 0 : i32
    %0 = arith.cmpi eq, %arg1, %c0_i32 : i32
    %1 = arith.extui %0 : i1 to i32
    %c0_i32_0 = arith.constant 0 : i32
    %2 = arith.cmpi ne, %1, %c0_i32_0 : i32
    scf.if %2 {
      %cst_69 = arith.constant 0.000000e+00 : f32
      %135 = vector.broadcast %cst_69 : f32 to vector<16x32xf32>
      %c0_70 = arith.constant 0 : index
      %c0_71 = arith.constant 0 : index
      %136 = vector.load %arg16[%c0_70, %c0_71] : memref<16x32xf32, #tpu.memory_space<vmem>>, vector<16x32xf32>
      tpu.vector_store %arg16[%c0_70, %c0_71], %135 {strides = array<i32>} : memref<16x32xf32, #tpu.memory_space<vmem>>, vector<16x32xf32>,
      %cst_72 = arith.constant 0.000000e+00 : f32
      %137 = vector.broadcast %cst_72 : f32 to vector<8x32xf32>
      %c0_73 = arith.constant 0 : index
      %c0_74 = arith.constant 0 : index
      %138 = vector.load %arg17[%c0_73, %c0_74] : memref<8x32xf32, #tpu.memory_space<vmem>>, vector<8x32xf32>
      tpu.vector_store %arg17[%c0_73, %c0_74], %137 {strides = array<i32>} : memref<8x32xf32, #tpu.memory_space<vmem>>, vector<8x32xf32>,
    } else {
    }
    %c0 = arith.constant 0 : index
    %c0_1 = arith.constant 0 : index
    %c0_2 = arith.constant 0 : index
    %3 = vector.load %arg2[%c0, %c0_1, %c0_2] : memref<1x16x16xf32, #tpu.memory_space<vmem>>, vector<1x16x16xf32>
    %4 = vector.shape_cast %3 : vector<1x16x16xf32> to vector<16x16xf32>
    %cst = arith.constant dense<0.000000e+00> : vector<16xf32>
    %5 = vector.multi_reduction <add>, %4, %cst [1] : vector<16x16xf32> to vector<16xf32>
    %6 = vector.shape_cast %5 : vector<16xf32> to vector<16x1xf32>
    %cst_3 = arith.constant 1.600000e+01 : f32
    %7 = vector.broadcast %cst_3 : f32 to vector<16x1xf32>
    %8 = arith.divf %6, %7 : vector<16x1xf32>
    %9 = vector.broadcast %8 : vector<16x1xf32> to vector<16x16xf32>
    %10 = arith.subf %4, %9 : vector<16x16xf32>
    %11 = arith.mulf %10, %10 : vector<16x16xf32>
    %cst_4 = arith.constant dense<0.000000e+00> : vector<16xf32>
    %12 = vector.multi_reduction <add>, %11, %cst_4 [1] : vector<16x16xf32> to vector<16xf32>
    %13 = vector.shape_cast %12 : vector<16xf32> to vector<16x1xf32>
    %cst_5 = arith.constant 1.600000e+01 : f32
    %14 = vector.broadcast %cst_5 : f32 to vector<16x1xf32>
    %15 = arith.divf %13, %14 : vector<16x1xf32>
    %cst_6 = arith.constant 9.99999974E-6 : f32
    %16 = vector.broadcast %cst_6 : f32 to vector<16x1xf32>
    %17 = arith.addf %15, %16 : vector<16x1xf32>
    %18 = math.rsqrt %17 : vector<16x1xf32>
    %19 = vector.broadcast %18 : vector<16x1xf32> to vector<16x16xf32>
    %20 = arith.mulf %10, %19 : vector<16x16xf32>
    %c0_7 = arith.constant 0 : index
    %c0_8 = arith.constant 0 : index
    %21 = vector.load %arg3[%c0_7, %c0_8] : memref<1x16xf32, #tpu.memory_space<vmem>>, vector<1x16xf32>
    %22 = vector.broadcast %21 : vector<1x16xf32> to vector<16x16xf32>
    %23 = arith.mulf %20, %22 : vector<16x16xf32>
    %c0_9 = arith.constant 0 : index
    %c0_10 = arith.constant 0 : index
    %24 = vector.load %arg4[%c0_9, %c0_10] : memref<1x16xf32, #tpu.memory_space<vmem>>, vector<1x16xf32>
    %25 = vector.broadcast %24 : vector<1x16xf32> to vector<16x16xf32>
    %26 = arith.addf %23, %25 : vector<16x16xf32>
    %27 = arith.truncf %26 : vector<16x16xf32> to vector<16x16xbf16>
    %c0_11 = arith.constant 0 : index
    %c0_12 = arith.constant 0 : index
    %28 = vector.load %arg5[%c0_11, %c0_12] : memref<16x32xbf16, #tpu.memory_space<vmem>>, vector<16x32xbf16>
    %cst_13 = arith.constant dense<0.000000e+00> : vector<16x32xf32>
    %29 = tpu.matmul %27, %28, %cst_13 {dimension_numbers = #tpu.dot_dimension_numbers<[1], [0], [0], [1], [0, 0, 1, 1], [], []>} : vector<16x16xbf16>, vector<16x32xbf16>, vector<16x32xf32> -> vector<16x32xf32>
    %c0_14 = arith.constant 0 : index
    %c0_15 = arith.constant 0 : index
    %30 = vector.load %arg6[%c0_14, %c0_15] : memref<16x32xbf16, #tpu.memory_space<vmem>>, vector<16x32xbf16>
    %cst_16 = arith.constant dense<0.000000e+00> : vector<16x32xf32>
    %31 = tpu.matmul %27, %30, %cst_16 {dimension_numbers = #tpu.dot_dimension_numbers<[1], [0], [0], [1], [0, 0, 1, 1], [], []>} : vector<16x16xbf16>, vector<16x32xbf16>, vector<16x32xf32> -> vector<16x32xf32>
    %c0_17 = arith.constant 0 : index
    %c0_18 = arith.constant 0 : index
    %32 = vector.load %arg20[%c0_17, %c0_18] : memref<16x32xf32, #tpu.memory_space<vmem>>, vector<16x32xf32>
    tpu.vector_store %arg20[%c0_17, %c0_18], %31 {strides = array<i32>} : memref<16x32xf32, #tpu.memory_space<vmem>>, vector<16x32xf32>,
    %c0_19 = arith.constant 0 : index
    %c0_20 = arith.constant 0 : index
    %33 = vector.load %arg7[%c0_19, %c0_20] : memref<4x32xf32, #tpu.memory_space<vmem>>, vector<4x32xf32>
    %c0_21 = arith.constant 0 : index
    %c0_22 = arith.constant 0 : index
    %34 = vector.load %arg17[%c0_21, %c0_22] : memref<8x32xf32, #tpu.memory_space<vmem>>, vector<8x32xf32>
    %35 = vector.extract_strided_slice %29 {offsets = [8, 0], sizes = [8, 32], strides = [1, 1]} : vector<16x32xf32> to vector<8x32xf32>
    %c0_23 = arith.constant 0 : index
    %c0_24 = arith.constant 0 : index
    %36 = vector.load %arg17[%c0_23, %c0_24] : memref<8x32xf32, #tpu.memory_space<vmem>>, vector<8x32xf32>
    tpu.vector_store %arg17[%c0_23, %c0_24], %35 {strides = array<i32>} : memref<8x32xf32, #tpu.memory_space<vmem>>, vector<8x32xf32>,
    %37 = vector.extract_strided_slice %29 {offsets = [0, 0], sizes = [8, 32], strides = [1, 1]} : vector<16x32xf32> to vector<8x32xf32>
    %38 = tpu.concatenate %34, %37 in 0 : vector<8x32xf32>, vector<8x32xf32> -> vector<16x32xf32>
    %39 = vector.extract_strided_slice %38 {offsets = [5, 0], sizes = [8, 32], strides = [1, 1]} : vector<16x32xf32> to vector<8x32xf32>
    %40 = vector.extract_strided_slice %33 {offsets = [0, 0], sizes = [1, 32], strides = [1, 1]} : vector<4x32xf32> to vector<1x32xf32>
    %41 = vector.broadcast %40 : vector<1x32xf32> to vector<8x32xf32>
    %42 = arith.mulf %39, %41 : vector<8x32xf32>
    %43 = vector.extract_strided_slice %38 {offsets = [6, 0], sizes = [8, 32], strides = [1, 1]} : vector<16x32xf32> to vector<8x32xf32>
    %44 = vector.extract_strided_slice %33 {offsets = [1, 0], sizes = [1, 32], strides = [1, 1]} : vector<4x32xf32> to vector<1x32xf32>
    %45 = vector.broadcast %44 : vector<1x32xf32> to vector<8x32xf32>
    %46 = arith.mulf %43, %45 : vector<8x32xf32>
    %47 = arith.addf %42, %46 : vector<8x32xf32>
    %48 = vector.extract_strided_slice %38 {offsets = [7, 0], sizes = [8, 32], strides = [1, 1]} : vector<16x32xf32> to vector<8x32xf32>
    %49 = vector.extract_strided_slice %33 {offsets = [2, 0], sizes = [1, 32], strides = [1, 1]} : vector<4x32xf32> to vector<1x32xf32>
    %50 = vector.broadcast %49 : vector<1x32xf32> to vector<8x32xf32>
    %51 = arith.mulf %48, %50 : vector<8x32xf32>
    %52 = arith.addf %47, %51 : vector<8x32xf32>
    %53 = vector.extract_strided_slice %38 {offsets = [8, 0], sizes = [8, 32], strides = [1, 1]} : vector<16x32xf32> to vector<8x32xf32>
    %54 = vector.extract_strided_slice %33 {offsets = [3, 0], sizes = [1, 32], strides = [1, 1]} : vector<4x32xf32> to vector<1x32xf32>
    %55 = vector.broadcast %54 : vector<1x32xf32> to vector<8x32xf32>
    %56 = arith.mulf %53, %55 : vector<8x32xf32>
    %57 = arith.addf %52, %56 : vector<8x32xf32>
    %58 = vector.extract_strided_slice %29 {offsets = [5, 0], sizes = [8, 32], strides = [1, 1]} : vector<16x32xf32> to vector<8x32xf32>
    %59 = vector.extract_strided_slice %33 {offsets = [0, 0], sizes = [1, 32], strides = [1, 1]} : vector<4x32xf32> to vector<1x32xf32>
    %60 = vector.broadcast %59 : vector<1x32xf32> to vector<8x32xf32>
    %61 = arith.mulf %58, %60 : vector<8x32xf32>
    %62 = vector.extract_strided_slice %29 {offsets = [6, 0], sizes = [8, 32], strides = [1, 1]} : vector<16x32xf32> to vector<8x32xf32>
    %63 = vector.extract_strided_slice %33 {offsets = [1, 0], sizes = [1, 32], strides = [1, 1]} : vector<4x32xf32> to vector<1x32xf32>
    %64 = vector.broadcast %63 : vector<1x32xf32> to vector<8x32xf32>
    %65 = arith.mulf %62, %64 : vector<8x32xf32>
    %66 = arith.addf %61, %65 : vector<8x32xf32>
    %67 = vector.extract_strided_slice %29 {offsets = [7, 0], sizes = [8, 32], strides = [1, 1]} : vector<16x32xf32> to vector<8x32xf32>
    %68 = vector.extract_strided_slice %33 {offsets = [2, 0], sizes = [1, 32], strides = [1, 1]} : vector<4x32xf32> to vector<1x32xf32>
    %69 = vector.broadcast %68 : vector<1x32xf32> to vector<8x32xf32>
    %70 = arith.mulf %67, %69 : vector<8x32xf32>
    %71 = arith.addf %66, %70 : vector<8x32xf32>
    %72 = vector.extract_strided_slice %29 {offsets = [8, 0], sizes = [8, 32], strides = [1, 1]} : vector<16x32xf32> to vector<8x32xf32>
    %73 = vector.extract_strided_slice %33 {offsets = [3, 0], sizes = [1, 32], strides = [1, 1]} : vector<4x32xf32> to vector<1x32xf32>
    %74 = vector.broadcast %73 : vector<1x32xf32> to vector<8x32xf32>
    %75 = arith.mulf %72, %74 : vector<8x32xf32>
    %76 = arith.addf %71, %75 : vector<8x32xf32>
    %77 = tpu.concatenate %57, %76 in 0 : vector<8x32xf32>, vector<8x32xf32> -> vector<16x32xf32>
    %c0_25 = arith.constant 0 : index
    %c0_26 = arith.constant 0 : index
    %78 = vector.load %arg8[%c0_25, %c0_26] : memref<1x32xf32, #tpu.memory_space<vmem>>, vector<1x32xf32>
    %79 = vector.broadcast %78 : vector<1x32xf32> to vector<16x32xf32>
    %80 = arith.addf %77, %79 : vector<16x32xf32>
    %81 = arith.negf %80 : vector<16x32xf32>
    %82 = math.exp %81 : vector<16x32xf32>
    %cst_27 = arith.constant 1.000000e+00 : f32
    %83 = vector.broadcast %cst_27 : f32 to vector<16x32xf32>
    %84 = arith.addf %83, %82 : vector<16x32xf32>
    %85 = arith.divf %83, %84 : vector<16x32xf32>
    %86 = arith.mulf %80, %85 : vector<16x32xf32>
    %c0_28 = arith.constant 0 : index
    %c0_29 = arith.constant 0 : index
    %87 = vector.load %arg19[%c0_28, %c0_29] : memref<16x32xf32, #tpu.memory_space<vmem>>, vector<16x32xf32>
    tpu.vector_store %arg19[%c0_28, %c0_29], %86 {strides = array<i32>} : memref<16x32xf32, #tpu.memory_space<vmem>>, vector<16x32xf32>,
    %88 = arith.truncf %86 : vector<16x32xf32> to vector<16x32xbf16>
    %c0_30 = arith.constant 0 : index
    %c0_31 = arith.constant 0 : index
    %89 = vector.load %arg9[%c0_30, %c0_31] : memref<32x33xbf16, #tpu.memory_space<vmem>>, vector<32x33xbf16>
    %cst_32 = arith.constant dense<0.000000e+00> : vector<16x33xf32>
    %90 = tpu.matmul %88, %89, %cst_32 {dimension_numbers = #tpu.dot_dimension_numbers<[1], [0], [0], [1], [0, 0, 1, 1], [], []>} : vector<16x32xbf16>, vector<32x33xbf16>, vector<16x33xf32> -> vector<16x33xf32>
    %91 = vector.extract_strided_slice %90 {offsets = [0, 0], sizes = [16, 1], strides = [1, 1]} : vector<16x33xf32> to vector<16x1xf32>
    %92 = vector.extract_strided_slice %90 {offsets = [0, 1], sizes = [16, 16], strides = [1, 1]} : vector<16x33xf32> to vector<16x16xf32>
    %c0_33 = arith.constant 0 : index
    %c0_34 = arith.constant 0 : index
    %93 = vector.load %arg22[%c0_33, %c0_34] : memref<16x16xf32, #tpu.memory_space<vmem>>, vector<16x16xf32>
    tpu.vector_store %arg22[%c0_33, %c0_34], %92 {strides = array<i32>} : memref<16x16xf32, #tpu.memory_space<vmem>>, vector<16x16xf32>,
    %94 = vector.extract_strided_slice %90 {offsets = [0, 17], sizes = [16, 16], strides = [1, 1]} : vector<16x33xf32> to vector<16x16xf32>
    %c0_35 = arith.constant 0 : index
    %c0_36 = arith.constant 0 : index
    %95 = vector.load %arg23[%c0_35, %c0_36] : memref<16x16xf32, #tpu.memory_space<vmem>>, vector<16x16xf32>
    tpu.vector_store %arg23[%c0_35, %c0_36], %94 {strides = array<i32>} : memref<16x16xf32, #tpu.memory_space<vmem>>, vector<16x16xf32>,
    %96 = arith.truncf %91 : vector<16x1xf32> to vector<16x1xbf16>
    %c0_37 = arith.constant 0 : index
    %c0_38 = arith.constant 0 : index
    %97 = vector.load %arg10[%c0_37, %c0_38] : memref<1x32xbf16, #tpu.memory_space<vmem>>, vector<1x32xbf16>
    %cst_39 = arith.constant dense<0.000000e+00> : vector<16x32xf32>
    %98 = tpu.matmul %96, %97, %cst_39 {dimension_numbers = #tpu.dot_dimension_numbers<[1], [0], [0], [1], [0, 0, 1, 1], [], []>} : vector<16x1xbf16>, vector<1x32xbf16>, vector<16x32xf32> -> vector<16x32xf32>
    %c0_40 = arith.constant 0 : index
    %c0_41 = arith.constant 0 : index
    %99 = vector.load %arg11[%c0_40, %c0_41] : memref<1x32xf32, #tpu.memory_space<vmem>>, vector<1x32xf32>
    %100 = vector.broadcast %99 : vector<1x32xf32> to vector<16x32xf32>
    %101 = arith.addf %98, %100 : vector<16x32xf32>
    %cst_42 = arith.constant 2.000000e+01 : f32
    %102 = vector.broadcast %cst_42 : f32 to vector<16x32xf32>
    %103 = arith.cmpf ogt, %101, %102 : vector<16x32xf32>
    %cst_43 = arith.constant 2.000000e+01 : f32
    %104 = vector.broadcast %cst_43 : f32 to vector<16x32xf32>
    %105 = arith.minimumf %101, %104 : vector<16x32xf32>
    %106 = math.exp %105 : vector<16x32xf32>
    %107 = math.log1p %106 : vector<16x32xf32>
    %108 = arith.select %103, %101, %107 : vector<16x32xi1>, vector<16x32xf32>
    %c0_44 = arith.constant 0 : index
    %c0_45 = arith.constant 0 : index
    %109 = vector.load %arg18[%c0_44, %c0_45] : memref<16x32xf32, #tpu.memory_space<vmem>>, vector<16x32xf32>
    tpu.vector_store %arg18[%c0_44, %c0_45], %108 {strides = array<i32>} : memref<16x32xf32, #tpu.memory_space<vmem>>, vector<16x32xf32>,
    %c0_46 = arith.constant 0 : index
    %c0_47 = arith.constant 0 : index
    %110 = vector.load %arg12[%c0_46, %c0_47] : memref<16x32xf32, #tpu.memory_space<vmem>>, vector<16x32xf32>
    %c0_48 = arith.constant 0 : index
    %c0_49 = arith.constant 0 : index
    %111 = vector.load %arg16[%c0_48, %c0_49] : memref<16x32xf32, #tpu.memory_space<vmem>>, vector<16x32xf32>
    %c0_i32_50 = arith.constant 0 : i32
    %c2_i32 = arith.constant 2 : i32
    %112 = arith.addi %c0_i32_50, %c2_i32 : i32
    %c1_i32 = arith.constant 1 : i32
    %113 = scf.for %arg24 = %c0_i32_50 to %112 step %c1_i32 iter_args(%arg25 = %111) -> (vector<16x32xf32>)  : i32 {
      %c8_i32 = arith.constant 8 : i32
      %135 = arith.muli %arg24, %c8_i32 : i32
      %136 = tpu.assume_multiple %135, 8 : i32
      %137 = arith.index_cast %136 : i32 to index
      %c0_69 = arith.constant 0 : index
      %138 = vector.load %arg18[%137, %c0_69] : memref<16x32xf32, #tpu.memory_space<vmem>>, vector<8x32xf32>
      %139 = arith.index_cast %136 : i32 to index
      %c0_70 = arith.constant 0 : index
      %140 = vector.load %arg19[%139, %c0_70] : memref<16x32xf32, #tpu.memory_space<vmem>>, vector<8x32xf32>
      %141 = arith.index_cast %136 : i32 to index
      %c0_71 = arith.constant 0 : index
      %142 = vector.load %arg22[%141, %c0_71] : memref<16x16xf32, #tpu.memory_space<vmem>>, vector<8x16xf32>
      %143 = tpu.transpose %142, [1, 0] : vector<8x16xf32> -> vector<16x8xf32>
      %144 = arith.index_cast %136 : i32 to index
      %c0_72 = arith.constant 0 : index
      %145 = vector.load %arg23[%144, %c0_72] : memref<16x16xf32, #tpu.memory_space<vmem>>, vector<8x16xf32>
      %146 = tpu.transpose %145, [1, 0] : vector<8x16xf32> -> vector<16x8xf32>
      %147 = vector.extract_strided_slice %138 {offsets = [0, 0], sizes = [1, 32], strides = [1, 1]} : vector<8x32xf32> to vector<1x32xf32>
      %148 = vector.broadcast %147 : vector<1x32xf32> to vector<16x32xf32>
      %149 = arith.mulf %148, %110 : vector<16x32xf32>
      %150 = math.exp %149 : vector<16x32xf32>
      %151 = vector.extract_strided_slice %138 {offsets = [1, 0], sizes = [1, 32], strides = [1, 1]} : vector<8x32xf32> to vector<1x32xf32>
      %152 = vector.broadcast %151 : vector<1x32xf32> to vector<16x32xf32>
      %153 = arith.mulf %152, %110 : vector<16x32xf32>
      %154 = math.exp %153 : vector<16x32xf32>
      %155 = vector.extract_strided_slice %138 {offsets = [2, 0], sizes = [1, 32], strides = [1, 1]} : vector<8x32xf32> to vector<1x32xf32>
      %156 = vector.broadcast %155 : vector<1x32xf32> to vector<16x32xf32>
      %157 = arith.mulf %156, %110 : vector<16x32xf32>
      %158 = math.exp %157 : vector<16x32xf32>
      %159 = vector.extract_strided_slice %138 {offsets = [3, 0], sizes = [1, 32], strides = [1, 1]} : vector<8x32xf32> to vector<1x32xf32>
      %160 = vector.broadcast %159 : vector<1x32xf32> to vector<16x32xf32>
      %161 = arith.mulf %160, %110 : vector<16x32xf32>
      %162 = math.exp %161 : vector<16x32xf32>
      %163 = vector.extract_strided_slice %138 {offsets = [4, 0], sizes = [1, 32], strides = [1, 1]} : vector<8x32xf32> to vector<1x32xf32>
      %164 = vector.broadcast %163 : vector<1x32xf32> to vector<16x32xf32>
      %165 = arith.mulf %164, %110 : vector<16x32xf32>
      %166 = math.exp %165 : vector<16x32xf32>
      %167 = vector.extract_strided_slice %138 {offsets = [5, 0], sizes = [1, 32], strides = [1, 1]} : vector<8x32xf32> to vector<1x32xf32>
      %168 = vector.broadcast %167 : vector<1x32xf32> to vector<16x32xf32>
      %169 = arith.mulf %168, %110 : vector<16x32xf32>
      %170 = math.exp %169 : vector<16x32xf32>
      %171 = vector.extract_strided_slice %138 {offsets = [6, 0], sizes = [1, 32], strides = [1, 1]} : vector<8x32xf32> to vector<1x32xf32>
      %172 = vector.broadcast %171 : vector<1x32xf32> to vector<16x32xf32>
      %173 = arith.mulf %172, %110 : vector<16x32xf32>
      %174 = math.exp %173 : vector<16x32xf32>
      %175 = vector.extract_strided_slice %138 {offsets = [7, 0], sizes = [1, 32], strides = [1, 1]} : vector<8x32xf32> to vector<1x32xf32>
      %176 = vector.broadcast %175 : vector<1x32xf32> to vector<16x32xf32>
      %177 = arith.mulf %176, %110 : vector<16x32xf32>
      %178 = math.exp %177 : vector<16x32xf32>
      %179 = vector.extract_strided_slice %143 {offsets = [0, 0], sizes = [16, 1], strides = [1, 1]} : vector<16x8xf32> to vector<16x1xf32>
      %180 = vector.extract_strided_slice %138 {offsets = [0, 0], sizes = [1, 32], strides = [1, 1]} : vector<8x32xf32> to vector<1x32xf32>
      %181 = vector.extract_strided_slice %140 {offsets = [0, 0], sizes = [1, 32], strides = [1, 1]} : vector<8x32xf32> to vector<1x32xf32>
      %182 = arith.mulf %180, %181 : vector<1x32xf32>
      %183 = vector.broadcast %179 : vector<16x1xf32> to vector<16x32xf32>
      %184 = vector.broadcast %182 : vector<1x32xf32> to vector<16x32xf32>
      %185 = arith.mulf %183, %184 : vector<16x32xf32>
      %186 = vector.extract_strided_slice %143 {offsets = [0, 1], sizes = [16, 1], strides = [1, 1]} : vector<16x8xf32> to vector<16x1xf32>
      %187 = vector.extract_strided_slice %138 {offsets = [1, 0], sizes = [1, 32], strides = [1, 1]} : vector<8x32xf32> to vector<1x32xf32>
      %188 = vector.extract_strided_slice %140 {offsets = [1, 0], sizes = [1, 32], strides = [1, 1]} : vector<8x32xf32> to vector<1x32xf32>
      %189 = arith.mulf %187, %188 : vector<1x32xf32>
      %190 = vector.broadcast %186 : vector<16x1xf32> to vector<16x32xf32>
      %191 = vector.broadcast %189 : vector<1x32xf32> to vector<16x32xf32>
      %192 = arith.mulf %190, %191 : vector<16x32xf32>
      %193 = vector.extract_strided_slice %143 {offsets = [0, 2], sizes = [16, 1], strides = [1, 1]} : vector<16x8xf32> to vector<16x1xf32>
      %194 = vector.extract_strided_slice %138 {offsets = [2, 0], sizes = [1, 32], strides = [1, 1]} : vector<8x32xf32> to vector<1x32xf32>
      %195 = vector.extract_strided_slice %140 {offsets = [2, 0], sizes = [1, 32], strides = [1, 1]} : vector<8x32xf32> to vector<1x32xf32>
      %196 = arith.mulf %194, %195 : vector<1x32xf32>
      %197 = vector.broadcast %193 : vector<16x1xf32> to vector<16x32xf32>
      %198 = vector.broadcast %196 : vector<1x32xf32> to vector<16x32xf32>
      %199 = arith.mulf %197, %198 : vector<16x32xf32>
      %200 = vector.extract_strided_slice %143 {offsets = [0, 3], sizes = [16, 1], strides = [1, 1]} : vector<16x8xf32> to vector<16x1xf32>
      %201 = vector.extract_strided_slice %138 {offsets = [3, 0], sizes = [1, 32], strides = [1, 1]} : vector<8x32xf32> to vector<1x32xf32>
      %202 = vector.extract_strided_slice %140 {offsets = [3, 0], sizes = [1, 32], strides = [1, 1]} : vector<8x32xf32> to vector<1x32xf32>
      %203 = arith.mulf %201, %202 : vector<1x32xf32>
      %204 = vector.broadcast %200 : vector<16x1xf32> to vector<16x32xf32>
      %205 = vector.broadcast %203 : vector<1x32xf32> to vector<16x32xf32>
      %206 = arith.mulf %204, %205 : vector<16x32xf32>
      %207 = vector.extract_strided_slice %143 {offsets = [0, 4], sizes = [16, 1], strides = [1, 1]} : vector<16x8xf32> to vector<16x1xf32>
      %208 = vector.extract_strided_slice %138 {offsets = [4, 0], sizes = [1, 32], strides = [1, 1]} : vector<8x32xf32> to vector<1x32xf32>
      %209 = vector.extract_strided_slice %140 {offsets = [4, 0], sizes = [1, 32], strides = [1, 1]} : vector<8x32xf32> to vector<1x32xf32>
      %210 = arith.mulf %208, %209 : vector<1x32xf32>
      %211 = vector.broadcast %207 : vector<16x1xf32> to vector<16x32xf32>
      %212 = vector.broadcast %210 : vector<1x32xf32> to vector<16x32xf32>
      %213 = arith.mulf %211, %212 : vector<16x32xf32>
      %214 = vector.extract_strided_slice %143 {offsets = [0, 5], sizes = [16, 1], strides = [1, 1]} : vector<16x8xf32> to vector<16x1xf32>
      %215 = vector.extract_strided_slice %138 {offsets = [5, 0], sizes = [1, 32], strides = [1, 1]} : vector<8x32xf32> to vector<1x32xf32>
      %216 = vector.extract_strided_slice %140 {offsets = [5, 0], sizes = [1, 32], strides = [1, 1]} : vector<8x32xf32> to vector<1x32xf32>
      %217 = arith.mulf %215, %216 : vector<1x32xf32>
      %218 = vector.broadcast %214 : vector<16x1xf32> to vector<16x32xf32>
      %219 = vector.broadcast %217 : vector<1x32xf32> to vector<16x32xf32>
      %220 = arith.mulf %218, %219 : vector<16x32xf32>
      %221 = vector.extract_strided_slice %143 {offsets = [0, 6], sizes = [16, 1], strides = [1, 1]} : vector<16x8xf32> to vector<16x1xf32>
      %222 = vector.extract_strided_slice %138 {offsets = [6, 0], sizes = [1, 32], strides = [1, 1]} : vector<8x32xf32> to vector<1x32xf32>
      %223 = vector.extract_strided_slice %140 {offsets = [6, 0], sizes = [1, 32], strides = [1, 1]} : vector<8x32xf32> to vector<1x32xf32>
      %224 = arith.mulf %222, %223 : vector<1x32xf32>
      %225 = vector.broadcast %221 : vector<16x1xf32> to vector<16x32xf32>
      %226 = vector.broadcast %224 : vector<1x32xf32> to vector<16x32xf32>
      %227 = arith.mulf %225, %226 : vector<16x32xf32>
      %228 = vector.extract_strided_slice %143 {offsets = [0, 7], sizes = [16, 1], strides = [1, 1]} : vector<16x8xf32> to vector<16x1xf32>
      %229 = vector.extract_strided_slice %138 {offsets = [7, 0], sizes = [1, 32], strides = [1, 1]} : vector<8x32xf32> to vector<1x32xf32>
      %230 = vector.extract_strided_slice %140 {offsets = [7, 0], sizes = [1, 32], strides = [1, 1]} : vector<8x32xf32> to vector<1x32xf32>
      %231 = arith.mulf %229, %230 : vector<1x32xf32>
      %232 = vector.broadcast %228 : vector<16x1xf32> to vector<16x32xf32>
      %233 = vector.broadcast %231 : vector<1x32xf32> to vector<16x32xf32>
      %234 = arith.mulf %232, %233 : vector<16x32xf32>
      %235 = arith.mulf %150, %arg25 : vector<16x32xf32>
      %236 = arith.addf %235, %185 : vector<16x32xf32>
      %237 = vector.extract_strided_slice %146 {offsets = [0, 0], sizes = [16, 1], strides = [1, 1]} : vector<16x8xf32> to vector<16x1xf32>
      %238 = vector.broadcast %237 : vector<16x1xf32> to vector<16x32xf32>
      %239 = arith.mulf %236, %238 : vector<16x32xf32>
      %cst_73 = arith.constant dense<0.000000e+00> : vector<32xf32>
      %240 = vector.multi_reduction <add>, %239, %cst_73 [0] : vector<16x32xf32> to vector<32xf32>
      %241 = vector.shape_cast %240 : vector<32xf32> to vector<1x32xf32>
      %242 = arith.mulf %154, %236 : vector<16x32xf32>
      %243 = arith.addf %242, %192 : vector<16x32xf32>
      %244 = vector.extract_strided_slice %146 {offsets = [0, 1], sizes = [16, 1], strides = [1, 1]} : vector<16x8xf32> to vector<16x1xf32>
      %245 = vector.broadcast %244 : vector<16x1xf32> to vector<16x32xf32>
      %246 = arith.mulf %243, %245 : vector<16x32xf32>
      %cst_74 = arith.constant dense<0.000000e+00> : vector<32xf32>
      %247 = vector.multi_reduction <add>, %246, %cst_74 [0] : vector<16x32xf32> to vector<32xf32>
      %248 = vector.shape_cast %247 : vector<32xf32> to vector<1x32xf32>
      %249 = arith.mulf %158, %243 : vector<16x32xf32>
      %250 = arith.addf %249, %199 : vector<16x32xf32>
      %251 = vector.extract_strided_slice %146 {offsets = [0, 2], sizes = [16, 1], strides = [1, 1]} : vector<16x8xf32> to vector<16x1xf32>
      %252 = vector.broadcast %251 : vector<16x1xf32> to vector<16x32xf32>
      %253 = arith.mulf %250, %252 : vector<16x32xf32>
      %cst_75 = arith.constant dense<0.000000e+00> : vector<32xf32>
      %254 = vector.multi_reduction <add>, %253, %cst_75 [0] : vector<16x32xf32> to vector<32xf32>
      %255 = vector.shape_cast %254 : vector<32xf32> to vector<1x32xf32>
      %256 = arith.mulf %162, %250 : vector<16x32xf32>
      %257 = arith.addf %256, %206 : vector<16x32xf32>
      %258 = vector.extract_strided_slice %146 {offsets = [0, 3], sizes = [16, 1], strides = [1, 1]} : vector<16x8xf32> to vector<16x1xf32>
      %259 = vector.broadcast %258 : vector<16x1xf32> to vector<16x32xf32>
      %260 = arith.mulf %257, %259 : vector<16x32xf32>
      %cst_76 = arith.constant dense<0.000000e+00> : vector<32xf32>
      %261 = vector.multi_reduction <add>, %260, %cst_76 [0] : vector<16x32xf32> to vector<32xf32>
      %262 = vector.shape_cast %261 : vector<32xf32> to vector<1x32xf32>
      %263 = arith.mulf %166, %257 : vector<16x32xf32>
      %264 = arith.addf %263, %213 : vector<16x32xf32>
      %265 = vector.extract_strided_slice %146 {offsets = [0, 4], sizes = [16, 1], strides = [1, 1]} : vector<16x8xf32> to vector<16x1xf32>
      %266 = vector.broadcast %265 : vector<16x1xf32> to vector<16x32xf32>
      %267 = arith.mulf %264, %266 : vector<16x32xf32>
      %cst_77 = arith.constant dense<0.000000e+00> : vector<32xf32>
      %268 = vector.multi_reduction <add>, %267, %cst_77 [0] : vector<16x32xf32> to vector<32xf32>
      %269 = vector.shape_cast %268 : vector<32xf32> to vector<1x32xf32>
      %270 = arith.mulf %170, %264 : vector<16x32xf32>
      %271 = arith.addf %270, %220 : vector<16x32xf32>
      %272 = vector.extract_strided_slice %146 {offsets = [0, 5], sizes = [16, 1], strides = [1, 1]} : vector<16x8xf32> to vector<16x1xf32>
      %273 = vector.broadcast %272 : vector<16x1xf32> to vector<16x32xf32>
      %274 = arith.mulf %271, %273 : vector<16x32xf32>
      %cst_78 = arith.constant dense<0.000000e+00> : vector<32xf32>
      %275 = vector.multi_reduction <add>, %274, %cst_78 [0] : vector<16x32xf32> to vector<32xf32>
      %276 = vector.shape_cast %275 : vector<32xf32> to vector<1x32xf32>
      %277 = arith.mulf %174, %271 : vector<16x32xf32>
      %278 = arith.addf %277, %227 : vector<16x32xf32>
      %279 = vector.extract_strided_slice %146 {offsets = [0, 6], sizes = [16, 1], strides = [1, 1]} : vector<16x8xf32> to vector<16x1xf32>
      %280 = vector.broadcast %279 : vector<16x1xf32> to vector<16x32xf32>
      %281 = arith.mulf %278, %280 : vector<16x32xf32>
      %cst_79 = arith.constant dense<0.000000e+00> : vector<32xf32>
      %282 = vector.multi_reduction <add>, %281, %cst_79 [0] : vector<16x32xf32> to vector<32xf32>
      %283 = vector.shape_cast %282 : vector<32xf32> to vector<1x32xf32>
      %284 = arith.mulf %178, %278 : vector<16x32xf32>
      %285 = arith.addf %284, %234 : vector<16x32xf32>
      %286 = vector.extract_strided_slice %146 {offsets = [0, 7], sizes = [16, 1], strides = [1, 1]} : vector<16x8xf32> to vector<16x1xf32>
      %287 = vector.broadcast %286 : vector<16x1xf32> to vector<16x32xf32>
      %288 = arith.mulf %285, %287 : vector<16x32xf32>
      %cst_80 = arith.constant dense<0.000000e+00> : vector<32xf32>
      %289 = vector.multi_reduction <add>, %288, %cst_80 [0] : vector<16x32xf32> to vector<32xf32>
      %290 = vector.shape_cast %289 : vector<32xf32> to vector<1x32xf32>
      %291 = tpu.concatenate %241, %248, %255, %262, %269, %276, %283, %290 in 0 : vector<1x32xf32>, vector<1x32xf32>, vector<1x32xf32>, vector<1x32xf32>, vector<1x32xf32>, vector<1x32xf32>, vector<1x32xf32>, vector<1x32xf32> -> vector<8x32xf32>
      %292 = arith.index_cast %136 : i32 to index
      %c0_81 = arith.constant 0 : index
      %293 = vector.load %arg21[%292, %c0_81] : memref<16x32xf32, #tpu.memory_space<vmem>>, vector<8x32xf32>
      tpu.vector_store %arg21[%292, %c0_81], %291 {strides = array<i32>} : memref<16x32xf32, #tpu.memory_space<vmem>>, vector<8x32xf32>,
      scf.yield %285 : vector<16x32xf32>
    }
    %c2_i32_51 = arith.constant 2 : i32
    %c0_52 = arith.constant 0 : index
    %c0_53 = arith.constant 0 : index
    %114 = vector.load %arg16[%c0_52, %c0_53] : memref<16x32xf32, #tpu.memory_space<vmem>>, vector<16x32xf32>
    tpu.vector_store %arg16[%c0_52, %c0_53], %113 {strides = array<i32>} : memref<16x32xf32, #tpu.memory_space<vmem>>, vector<16x32xf32>,
    %c0_54 = arith.constant 0 : index
    %c0_55 = arith.constant 0 : index
    %115 = vector.load %arg19[%c0_54, %c0_55] : memref<16x32xf32, #tpu.memory_space<vmem>>, vector<16x32xf32>
    %c0_56 = arith.constant 0 : index
    %c0_57 = arith.constant 0 : index
    %116 = vector.load %arg20[%c0_56, %c0_57] : memref<16x32xf32, #tpu.memory_space<vmem>>, vector<16x32xf32>
    %c0_58 = arith.constant 0 : index
    %c0_59 = arith.constant 0 : index
    %117 = vector.load %arg21[%c0_58, %c0_59] : memref<16x32xf32, #tpu.memory_space<vmem>>, vector<16x32xf32>
    %c0_60 = arith.constant 0 : index
    %c0_61 = arith.constant 0 : index
    %118 = vector.load %arg13[%c0_60, %c0_61] : memref<1x32xf32, #tpu.memory_space<vmem>>, vector<1x32xf32>
    %119 = vector.broadcast %118 : vector<1x32xf32> to vector<16x32xf32>
    %120 = arith.mulf %119, %115 : vector<16x32xf32>
    %121 = arith.addf %117, %120 : vector<16x32xf32>
    %122 = arith.negf %116 : vector<16x32xf32>
    %123 = math.exp %122 : vector<16x32xf32>
    %cst_62 = arith.constant 1.000000e+00 : f32
    %124 = vector.broadcast %cst_62 : f32 to vector<16x32xf32>
    %125 = arith.addf %124, %123 : vector<16x32xf32>
    %126 = arith.divf %124, %125 : vector<16x32xf32>
    %127 = arith.mulf %116, %126 : vector<16x32xf32>
    %128 = arith.mulf %121, %127 : vector<16x32xf32>
    %129 = arith.truncf %128 : vector<16x32xf32> to vector<16x32xbf16>
    %c0_63 = arith.constant 0 : index
    %c0_64 = arith.constant 0 : index
    %130 = vector.load %arg14[%c0_63, %c0_64] : memref<32x16xbf16, #tpu.memory_space<vmem>>, vector<32x16xbf16>
    %cst_65 = arith.constant dense<0.000000e+00> : vector<16x16xf32>
    %131 = tpu.matmul %129, %130, %cst_65 {dimension_numbers = #tpu.dot_dimension_numbers<[1], [0], [0], [1], [0, 0, 1, 1], [], []>} : vector<16x32xbf16>, vector<32x16xbf16>, vector<16x16xf32> -> vector<16x16xf32>
    %c0_66 = arith.constant 0 : index
    %c0_67 = arith.constant 0 : index
    %c0_68 = arith.constant 0 : index
    %132 = vector.load %arg15[%c0_66, %c0_67, %c0_68] : memref<1x16x16xf32, #tpu.memory_space<vmem>>, vector<1x16x16xf32>
    %133 = vector.shape_cast %132 : vector<1x16x16xf32> to vector<16x16xf32>
    %134 = vector.shape_cast %131 : vector<16x16xf32> to vector<1x16x16xf32>
    tpu.vector_store %arg15[%c0_66, %c0_67, %c0_68], %134 {strides = array<i32>} : memref<1x16x16xf32, #tpu.memory_space<vmem>>, vector<1x16x16xf32>,
    return
  }
  func.func @transform_0(%arg0: i32, %arg1: i32) -> (i32, i32, i32) {
    %c0_i32 = arith.constant 0 : i32
    %c0_i32_0 = arith.constant 0 : i32
    return %arg0, %arg1, %c0_i32 : i32, i32, i32
  }
  func.func @transform_1(%arg0: i32, %arg1: i32) -> (i32, i32) {
    %c0_i32 = arith.constant 0 : i32
    %c0_i32_0 = arith.constant 0 : i32
    %c0_i32_1 = arith.constant 0 : i32
    return %c0_i32, %c0_i32_0 : i32, i32
  }
  func.func @transform_2(%arg0: i32, %arg1: i32) -> (i32, i32) {
    %c0_i32 = arith.constant 0 : i32
    %c0_i32_0 = arith.constant 0 : i32
    %c0_i32_1 = arith.constant 0 : i32
    return %c0_i32, %c0_i32_0 : i32, i32
  }
  func.func @transform_3(%arg0: i32, %arg1: i32) -> (i32, i32) {
    %c0_i32 = arith.constant 0 : i32
    %c0_i32_0 = arith.constant 0 : i32
    %c0_i32_1 = arith.constant 0 : i32
    return %c0_i32, %c0_i32_0 : i32, i32
  }
  func.func @transform_4(%arg0: i32, %arg1: i32) -> (i32, i32) {
    %c0_i32 = arith.constant 0 : i32
    %c0_i32_0 = arith.constant 0 : i32
    %c0_i32_1 = arith.constant 0 : i32
    return %c0_i32, %c0_i32_0 : i32, i32
  }
  func.func @transform_5(%arg0: i32, %arg1: i32) -> (i32, i32) {
    %c0_i32 = arith.constant 0 : i32
    %c0_i32_0 = arith.constant 0 : i32
    %c0_i32_1 = arith.constant 0 : i32
    return %c0_i32, %c0_i32_0 : i32, i32
  }
  func.func @transform_6(%arg0: i32, %arg1: i32) -> (i32, i32) {
    %c0_i32 = arith.constant 0 : i32
    %c0_i32_0 = arith.constant 0 : i32
    %c0_i32_1 = arith.constant 0 : i32
    return %c0_i32, %c0_i32_0 : i32, i32
  }
  func.func @transform_7(%arg0: i32, %arg1: i32) -> (i32, i32) {
    %c0_i32 = arith.constant 0 : i32
    %c0_i32_0 = arith.constant 0 : i32
    %c0_i32_1 = arith.constant 0 : i32
    return %c0_i32, %c0_i32_0 : i32, i32
  }
  func.func @transform_8(%arg0: i32, %arg1: i32) -> (i32, i32) {
    %c0_i32 = arith.constant 0 : i32
    %c0_i32_0 = arith.constant 0 : i32
    %c0_i32_1 = arith.constant 0 : i32
    return %c0_i32, %c0_i32_0 : i32, i32
  }
  func.func @transform_9(%arg0: i32, %arg1: i32) -> (i32, i32) {
    %c0_i32 = arith.constant 0 : i32
    %c0_i32_0 = arith.constant 0 : i32
    %c0_i32_1 = arith.constant 0 : i32
    return %c0_i32, %c0_i32_0 : i32, i32
  }
  func.func @transform_10(%arg0: i32, %arg1: i32) -> (i32, i32) {
    %c0_i32 = arith.constant 0 : i32
    %c0_i32_0 = arith.constant 0 : i32
    %c0_i32_1 = arith.constant 0 : i32
    return %c0_i32, %c0_i32_0 : i32, i32
  }
  func.func @transform_11(%arg0: i32, %arg1: i32) -> (i32, i32) {
    %c0_i32 = arith.constant 0 : i32
    %c0_i32_0 = arith.constant 0 : i32
    %c0_i32_1 = arith.constant 0 : i32
    return %c0_i32, %c0_i32_0 : i32, i32
  }
  func.func @transform_12(%arg0: i32, %arg1: i32) -> (i32, i32) {
    %c0_i32 = arith.constant 0 : i32
    %c0_i32_0 = arith.constant 0 : i32
    %c0_i32_1 = arith.constant 0 : i32
    return %c0_i32, %c0_i32_0 : i32, i32
  }
  func.func @transform_13(%arg0: i32, %arg1: i32) -> (i32, i32, i32) {
    %c0_i32 = arith.constant 0 : i32
    %c0_i32_0 = arith.constant 0 : i32
    return %arg0, %arg1, %c0_i32 : i32, i32, i32
  }
}

module attributes {stable_mosaic.version = 11 : i64} {
  func.func @_mamba_layer_kernel(%arg0: i32, %arg1: i32, %arg2: memref<1x16x16xf32, #tpu.memory_space<vmem>>, %arg3: memref<1x16xf32, #tpu.memory_space<vmem>>, %arg4: memref<1x16xf32, #tpu.memory_space<vmem>>, %arg5: memref<16x32xbf16, #tpu.memory_space<vmem>>, %arg6: memref<16x32xbf16, #tpu.memory_space<vmem>>, %arg7: memref<4x32xf32, #tpu.memory_space<vmem>>, %arg8: memref<1x32xf32, #tpu.memory_space<vmem>>, %arg9: memref<32x33xbf16, #tpu.memory_space<vmem>>, %arg10: memref<1x32xbf16, #tpu.memory_space<vmem>>, %arg11: memref<1x32xf32, #tpu.memory_space<vmem>>, %arg12: memref<16x32xf32, #tpu.memory_space<vmem>>, %arg13: memref<1x32xf32, #tpu.memory_space<vmem>>, %arg14: memref<32x16xbf16, #tpu.memory_space<vmem>>, %arg15: memref<1x16x16xf32, #tpu.memory_space<vmem>>, %arg16: memref<16x32xf32, #tpu.memory_space<vmem>>, %arg17: memref<8x32xf32, #tpu.memory_space<vmem>>, %arg18: memref<16x32xf32, #tpu.memory_space<vmem>>, %arg19: memref<16x32xf32, #tpu.memory_space<vmem>>, %arg20: memref<16x32xf32, #tpu.memory_space<vmem>>, %arg21: memref<16x32xf32, #tpu.memory_space<vmem>>, %arg22: memref<16x16xf32, #tpu.memory_space<vmem>>, %arg23: memref<16x16xf32, #tpu.memory_space<vmem>>) attributes {dimension_semantics = [#tpu.dimension_semantics<parallel>, #tpu.dimension_semantics<arbitrary>], iteration_bounds = array<i64: 2, 2>, scalar_prefetch = 0 : i64, scratch_operands = 8 : i64, tpu.core_type = #tpu.core_type<tc>, window_params = [{transform_indices = @transform_0, window_bounds = array<i64: 1, 16, 16>}, {pipeline_mode = #tpu.pipeline_mode<synchronous>, transform_indices = @transform_1, window_bounds = array<i64: 1, 16>}, {pipeline_mode = #tpu.pipeline_mode<synchronous>, transform_indices = @transform_2, window_bounds = array<i64: 1, 16>}, {pipeline_mode = #tpu.pipeline_mode<synchronous>, transform_indices = @transform_3, window_bounds = array<i64: 16, 32>}, {pipeline_mode = #tpu.pipeline_mode<synchronous>, transform_indices = @transform_4, window_bounds = array<i64: 16, 32>}, {pipeline_mode = #tpu.pipeline_mode<synchronous>, transform_indices = @transform_5, window_bounds = array<i64: 4, 32>}, {pipeline_mode = #tpu.pipeline_mode<synchronous>, transform_indices = @transform_6, window_bounds = array<i64: 1, 32>}, {pipeline_mode = #tpu.pipeline_mode<synchronous>, transform_indices = @transform_7, window_bounds = array<i64: 32, 33>}, {pipeline_mode = #tpu.pipeline_mode<synchronous>, transform_indices = @transform_8, window_bounds = array<i64: 1, 32>}, {pipeline_mode = #tpu.pipeline_mode<synchronous>, transform_indices = @transform_9, window_bounds = array<i64: 1, 32>}, {pipeline_mode = #tpu.pipeline_mode<synchronous>, transform_indices = @transform_10, window_bounds = array<i64: 16, 32>}, {pipeline_mode = #tpu.pipeline_mode<synchronous>, transform_indices = @transform_11, window_bounds = array<i64: 1, 32>}, {pipeline_mode = #tpu.pipeline_mode<synchronous>, transform_indices = @transform_12, window_bounds = array<i64: 32, 16>}, {transform_indices = @transform_13, window_bounds = array<i64: 1, 16, 16>}]} {
    %c0_i32 = arith.constant 0 : i32
    %0 = arith.cmpi eq, %arg1, %c0_i32 : i32
    %1 = arith.extui %0 : i1 to i32
    %c0_i32_0 = arith.constant 0 : i32
    %2 = arith.cmpi ne, %1, %c0_i32_0 : i32
    scf.if %2 {
      %cst_69 = arith.constant 0.000000e+00 : f32
      %135 = vector.broadcast %cst_69 : f32 to vector<16x32xf32>
      %c0_70 = arith.constant 0 : index
      %c0_71 = arith.constant 0 : index
      %136 = vector.load %arg16[%c0_70, %c0_71] : memref<16x32xf32, #tpu.memory_space<vmem>>, vector<16x32xf32>
      tpu.vector_store %arg16[%c0_70, %c0_71], %135 {strides = array<i32>} : memref<16x32xf32, #tpu.memory_space<vmem>>, vector<16x32xf32>,
      %cst_72 = arith.constant 0.000000e+00 : f32
      %137 = vector.broadcast %cst_72 : f32 to vector<8x32xf32>
      %c0_73 = arith.constant 0 : index
      %c0_74 = arith.constant 0 : index
      %138 = vector.load %arg17[%c0_73, %c0_74] : memref<8x32xf32, #tpu.memory_space<vmem>>, vector<8x32xf32>
      tpu.vector_store %arg17[%c0_73, %c0_74], %137 {strides = array<i32>} : memref<8x32xf32, #tpu.memory_space<vmem>>, vector<8x32xf32>,
    } else {
    }
    %c0 = arith.constant 0 : index
    %c0_1 = arith.constant 0 : index
    %c0_2 = arith.constant 0 : index
    %3 = vector.load %arg2[%c0, %c0_1, %c0_2] : memref<1x16x16xf32, #tpu.memory_space<vmem>>, vector<1x16x16xf32>
    %4 = vector.shape_cast %3 : vector<1x16x16xf32> to vector<16x16xf32>
    %cst = arith.constant dense<0.000000e+00> : vector<16xf32>
    %5 = vector.multi_reduction <add>, %4, %cst [1] : vector<16x16xf32> to vector<16xf32>
    %6 = vector.shape_cast %5 : vector<16xf32> to vector<16x1xf32>
    %cst_3 = arith.constant 1.600000e+01 : f32
    %7 = vector.broadcast %cst_3 : f32 to vector<16x1xf32>
    %8 = arith.divf %6, %7 : vector<16x1xf32>
    %9 = vector.broadcast %8 : vector<16x1xf32> to vector<16x16xf32>
    %10 = arith.subf %4, %9 : vector<16x16xf32>
    %11 = arith.mulf %10, %10 : vector<16x16xf32>
    %cst_4 = arith.constant dense<0.000000e+00> : vector<16xf32>
    %12 = vector.multi_reduction <add>, %11, %cst_4 [1] : vector<16x16xf32> to vector<16xf32>
    %13 = vector.shape_cast %12 : vector<16xf32> to vector<16x1xf32>
    %cst_5 = arith.constant 1.600000e+01 : f32
    %14 = vector.broadcast %cst_5 : f32 to vector<16x1xf32>
    %15 = arith.divf %13, %14 : vector<16x1xf32>
    %cst_6 = arith.constant 9.99999974E-6 : f32
    %16 = vector.broadcast %cst_6 : f32 to vector<16x1xf32>
    %17 = arith.addf %15, %16 : vector<16x1xf32>
    %18 = math.rsqrt %17 : vector<16x1xf32>
    %19 = vector.broadcast %18 : vector<16x1xf32> to vector<16x16xf32>
    %20 = arith.mulf %10, %19 : vector<16x16xf32>
    %c0_7 = arith.constant 0 : index
    %c0_8 = arith.constant 0 : index
    %21 = vector.load %arg3[%c0_7, %c0_8] : memref<1x16xf32, #tpu.memory_space<vmem>>, vector<1x16xf32>
    %22 = vector.broadcast %21 : vector<1x16xf32> to vector<16x16xf32>
    %23 = arith.mulf %20, %22 : vector<16x16xf32>
    %c0_9 = arith.constant 0 : index
    %c0_10 = arith.constant 0 : index
    %24 = vector.load %arg4[%c0_9, %c0_10] : memref<1x16xf32, #tpu.memory_space<vmem>>, vector<1x16xf32>
    %25 = vector.broadcast %24 : vector<1x16xf32> to vector<16x16xf32>
    %26 = arith.addf %23, %25 : vector<16x16xf32>
    %27 = arith.truncf %26 : vector<16x16xf32> to vector<16x16xbf16>
    %c0_11 = arith.constant 0 : index
    %c0_12 = arith.constant 0 : index
    %28 = vector.load %arg5[%c0_11, %c0_12] : memref<16x32xbf16, #tpu.memory_space<vmem>>, vector<16x32xbf16>
    %cst_13 = arith.constant dense<0.000000e+00> : vector<16x32xf32>
    %29 = tpu.matmul %27, %28, %cst_13 {dimension_numbers = #tpu.dot_dimension_numbers<[1], [0], [0], [1], [0, 0, 1, 1], [], []>} : vector<16x16xbf16>, vector<16x32xbf16>, vector<16x32xf32> -> vector<16x32xf32>
    %c0_14 = arith.constant 0 : index
    %c0_15 = arith.constant 0 : index
    %30 = vector.load %arg6[%c0_14, %c0_15] : memref<16x32xbf16, #tpu.memory_space<vmem>>, vector<16x32xbf16>
    %cst_16 = arith.constant dense<0.000000e+00> : vector<16x32xf32>
    %31 = tpu.matmul %27, %30, %cst_16 {dimension_numbers = #tpu.dot_dimension_numbers<[1], [0], [0], [1], [0, 0, 1, 1], [], []>} : vector<16x16xbf16>, vector<16x32xbf16>, vector<16x32xf32> -> vector<16x32xf32>
    %c0_17 = arith.constant 0 : index
    %c0_18 = arith.constant 0 : index
    %32 = vector.load %arg20[%c0_17, %c0_18] : memref<16x32xf32, #tpu.memory_space<vmem>>, vector<16x32xf32>
    tpu.vector_store %arg20[%c0_17, %c0_18], %31 {strides = array<i32>} : memref<16x32xf32, #tpu.memory_space<vmem>>, vector<16x32xf32>,
    %c0_19 = arith.constant 0 : index
    %c0_20 = arith.constant 0 : index
    %33 = vector.load %arg7[%c0_19, %c0_20] : memref<4x32xf32, #tpu.memory_space<vmem>>, vector<4x32xf32>
    %c0_21 = arith.constant 0 : index
    %c0_22 = arith.constant 0 : index
    %34 = vector.load %arg17[%c0_21, %c0_22] : memref<8x32xf32, #tpu.memory_space<vmem>>, vector<8x32xf32>
    %35 = vector.extract_strided_slice %29 {offsets = [8, 0], sizes = [8, 32], strides = [1, 1]} : vector<16x32xf32> to vector<8x32xf32>
    %c0_23 = arith.constant 0 : index
    %c0_24 = arith.constant 0 : index
    %36 = vector.load %arg17[%c0_23, %c0_24] : memref<8x32xf32, #tpu.memory_space<vmem>>, vector<8x32xf32>
    tpu.vector_store %arg17[%c0_23, %c0_24], %35 {strides = array<i32>} : memref<8x32xf32, #tpu.memory_space<vmem>>, vector<8x32xf32>,
    %37 = vector.extract_strided_slice %29 {offsets = [0, 0], sizes = [8, 32], strides = [1, 1]} : vector<16x32xf32> to vector<8x32xf32>
    %38 = tpu.concatenate %34, %37 in 0 : vector<8x32xf32>, vector<8x32xf32> -> vector<16x32xf32>
    %39 = vector.extract_strided_slice %38 {offsets = [5, 0], sizes = [8, 32], strides = [1, 1]} : vector<16x32xf32> to vector<8x32xf32>
    %40 = vector.extract_strided_slice %33 {offsets = [0, 0], sizes = [1, 32], strides = [1, 1]} : vector<4x32xf32> to vector<1x32xf32>
    %41 = vector.broadcast %40 : vector<1x32xf32> to vector<8x32xf32>
    %42 = arith.mulf %39, %41 : vector<8x32xf32>
    %43 = vector.extract_strided_slice %38 {offsets = [6, 0], sizes = [8, 32], strides = [1, 1]} : vector<16x32xf32> to vector<8x32xf32>
    %44 = vector.extract_strided_slice %33 {offsets = [1, 0], sizes = [1, 32], strides = [1, 1]} : vector<4x32xf32> to vector<1x32xf32>
    %45 = vector.broadcast %44 : vector<1x32xf32> to vector<8x32xf32>
    %46 = arith.mulf %43, %45 : vector<8x32xf32>
    %47 = arith.addf %42, %46 : vector<8x32xf32>
    %48 = vector.extract_strided_slice %38 {offsets = [7, 0], sizes = [8, 32], strides = [1, 1]} : vector<16x32xf32> to vector<8x32xf32>
    %49 = vector.extract_strided_slice %33 {offsets = [2, 0], sizes = [1, 32], strides = [1, 1]} : vector<4x32xf32> to vector<1x32xf32>
    %50 = vector.broadcast %49 : vector<1x32xf32> to vector<8x32xf32>
    %51 = arith.mulf %48, %50 : vector<8x32xf32>
    %52 = arith.addf %47, %51 : vector<8x32xf32>
    %53 = vector.extract_strided_slice %38 {offsets = [8, 0], sizes = [8, 32], strides = [1, 1]} : vector<16x32xf32> to vector<8x32xf32>
    %54 = vector.extract_strided_slice %33 {offsets = [3, 0], sizes = [1, 32], strides = [1, 1]} : vector<4x32xf32> to vector<1x32xf32>
    %55 = vector.broadcast %54 : vector<1x32xf32> to vector<8x32xf32>
    %56 = arith.mulf %53, %55 : vector<8x32xf32>
    %57 = arith.addf %52, %56 : vector<8x32xf32>
    %58 = vector.extract_strided_slice %29 {offsets = [5, 0], sizes = [8, 32], strides = [1, 1]} : vector<16x32xf32> to vector<8x32xf32>
    %59 = vector.extract_strided_slice %33 {offsets = [0, 0], sizes = [1, 32], strides = [1, 1]} : vector<4x32xf32> to vector<1x32xf32>
    %60 = vector.broadcast %59 : vector<1x32xf32> to vector<8x32xf32>
    %61 = arith.mulf %58, %60 : vector<8x32xf32>
    %62 = vector.extract_strided_slice %29 {offsets = [6, 0], sizes = [8, 32], strides = [1, 1]} : vector<16x32xf32> to vector<8x32xf32>
    %63 = vector.extract_strided_slice %33 {offsets = [1, 0], sizes = [1, 32], strides = [1, 1]} : vector<4x32xf32> to vector<1x32xf32>
    %64 = vector.broadcast %63 : vector<1x32xf32> to vector<8x32xf32>
    %65 = arith.mulf %62, %64 : vector<8x32xf32>
    %66 = arith.addf %61, %65 : vector<8x32xf32>
    %67 = vector.extract_strided_slice %29 {offsets = [7, 0], sizes = [8, 32], strides = [1, 1]} : vector<16x32xf32> to vector<8x32xf32>
    %68 = vector.extract_strided_slice %33 {offsets = [2, 0], sizes = [1, 32], strides = [1, 1]} : vector<4x32xf32> to vector<1x32xf32>
    %69 = vector.broadcast %68 : vector<1x32xf32> to vector<8x32xf32>
    %70 = arith.mulf %67, %69 : vector<8x32xf32>
    %71 = arith.addf %66, %70 : vector<8x32xf32>
    %72 = vector.extract_strided_slice %29 {offsets = [8, 0], sizes = [8, 32], strides = [1, 1]} : vector<16x32xf32> to vector<8x32xf32>
    %73 = vector.extract_strided_slice %33 {offsets = [3, 0], sizes = [1, 32], strides = [1, 1]} : vector<4x32xf32> to vector<1x32xf32>
    %74 = vector.broadcast %73 : vector<1x32xf32> to vector<8x32xf32>
    %75 = arith.mulf %72, %74 : vector<8x32xf32>
    %76 = arith.addf %71, %75 : vector<8x32xf32>
    %77 = tpu.concatenate %57, %76 in 0 : vector<8x32xf32>, vector<8x32xf32> -> vector<16x32xf32>
    %c0_25 = arith.constant 0 : index
    %c0_26 = arith.constant 0 : index
    %78 = vector.load %arg8[%c0_25, %c0_26] : memref<1x32xf32, #tpu.memory_space<vmem>>, vector<1x32xf32>
    %79 = vector.broadcast %78 : vector<1x32xf32> to vector<16x32xf32>
    %80 = arith.addf %77, %79 : vector<16x32xf32>
    %81 = arith.negf %80 : vector<16x32xf32>
    %82 = math.exp %81 : vector<16x32xf32>
    %cst_27 = arith.constant 1.000000e+00 : f32
    %83 = vector.broadcast %cst_27 : f32 to vector<16x32xf32>
    %84 = arith.addf %83, %82 : vector<16x32xf32>
    %85 = arith.divf %83, %84 : vector<16x32xf32>
    %86 = arith.mulf %80, %85 : vector<16x32xf32>
    %c0_28 = arith.constant 0 : index
    %c0_29 = arith.constant 0 : index
    %87 = vector.load %arg19[%c0_28, %c0_29] : memref<16x32xf32, #tpu.memory_space<vmem>>, vector<16x32xf32>
    tpu.vector_store %arg19[%c0_28, %c0_29], %86 {strides = array<i32>} : memref<16x32xf32, #tpu.memory_space<vmem>>, vector<16x32xf32>,
    %88 = arith.truncf %86 : vector<16x32xf32> to vector<16x32xbf16>
    %c0_30 = arith.constant 0 : index
    %c0_31 = arith.constant 0 : index
    %89 = vector.load %arg9[%c0_30, %c0_31] : memref<32x33xbf16, #tpu.memory_space<vmem>>, vector<32x33xbf16>
    %cst_32 = arith.constant dense<0.000000e+00> : vector<16x33xf32>
    %90 = tpu.matmul %88, %89, %cst_32 {dimension_numbers = #tpu.dot_dimension_numbers<[1], [0], [0], [1], [0, 0, 1, 1], [], []>} : vector<16x32xbf16>, vector<32x33xbf16>, vector<16x33xf32> -> vector<16x33xf32>
    %91 = vector.extract_strided_slice %90 {offsets = [0, 0], sizes = [16, 1], strides = [1, 1]} : vector<16x33xf32> to vector<16x1xf32>
    %92 = vector.extract_strided_slice %90 {offsets = [0, 1], sizes = [16, 16], strides = [1, 1]} : vector<16x33xf32> to vector<16x16xf32>
    %c0_33 = arith.constant 0 : index
    %c0_34 = arith.constant 0 : index
    %93 = vector.load %arg22[%c0_33, %c0_34] : memref<16x16xf32, #tpu.memory_space<vmem>>, vector<16x16xf32>
    tpu.vector_store %arg22[%c0_33, %c0_34], %92 {strides = array<i32>} : memref<16x16xf32, #tpu.memory_space<vmem>>, vector<16x16xf32>,
    %94 = vector.extract_strided_slice %90 {offsets = [0, 17], sizes = [16, 16], strides = [1, 1]} : vector<16x33xf32> to vector<16x16xf32>
    %c0_35 = arith.constant 0 : index
    %c0_36 = arith.constant 0 : index
    %95 = vector.load %arg23[%c0_35, %c0_36] : memref<16x16xf32, #tpu.memory_space<vmem>>, vector<16x16xf32>
    tpu.vector_store %arg23[%c0_35, %c0_36], %94 {strides = array<i32>} : memref<16x16xf32, #tpu.memory_space<vmem>>, vector<16x16xf32>,
    %96 = arith.truncf %91 : vector<16x1xf32> to vector<16x1xbf16>
    %c0_37 = arith.constant 0 : index
    %c0_38 = arith.constant 0 : index
    %97 = vector.load %arg10[%c0_37, %c0_38] : memref<1x32xbf16, #tpu.memory_space<vmem>>, vector<1x32xbf16>
    %cst_39 = arith.constant dense<0.000000e+00> : vector<16x32xf32>
    %98 = tpu.matmul %96, %97, %cst_39 {dimension_numbers = #tpu.dot_dimension_numbers<[1], [0], [0], [1], [0, 0, 1, 1], [], []>} : vector<16x1xbf16>, vector<1x32xbf16>, vector<16x32xf32> -> vector<16x32xf32>
    %c0_40 = arith.constant 0 : index
    %c0_41 = arith.constant 0 : index
    %99 = vector.load %arg11[%c0_40, %c0_41] : memref<1x32xf32, #tpu.memory_space<vmem>>, vector<1x32xf32>
    %100 = vector.broadcast %99 : vector<1x32xf32> to vector<16x32xf32>
    %101 = arith.addf %98, %100 : vector<16x32xf32>
    %cst_42 = arith.constant 2.000000e+01 : f32
    %102 = vector.broadcast %cst_42 : f32 to vector<16x32xf32>
    %103 = arith.cmpf ogt, %101, %102 : vector<16x32xf32>
    %cst_43 = arith.constant 2.000000e+01 : f32
    %104 = vector.broadcast %cst_43 : f32 to vector<16x32xf32>
    %105 = arith.minimumf %101, %104 : vector<16x32xf32>
    %106 = math.exp %105 : vector<16x32xf32>
    %107 = math.log1p %106 : vector<16x32xf32>
    %108 = arith.select %103, %101, %107 : vector<16x32xi1>, vector<16x32xf32>
    %c0_44 = arith.constant 0 : index
    %c0_45 = arith.constant 0 : index
    %109 = vector.load %arg18[%c0_44, %c0_45] : memref<16x32xf32, #tpu.memory_space<vmem>>, vector<16x32xf32>
    tpu.vector_store %arg18[%c0_44, %c0_45], %108 {strides = array<i32>} : memref<16x32xf32, #tpu.memory_space<vmem>>, vector<16x32xf32>,
    %c0_46 = arith.constant 0 : index
    %c0_47 = arith.constant 0 : index
    %110 = vector.load %arg12[%c0_46, %c0_47] : memref<16x32xf32, #tpu.memory_space<vmem>>, vector<16x32xf32>
    %c0_48 = arith.constant 0 : index
    %c0_49 = arith.constant 0 : index
    %111 = vector.load %arg16[%c0_48, %c0_49] : memref<16x32xf32, #tpu.memory_space<vmem>>, vector<16x32xf32>
    %c0_i32_50 = arith.constant 0 : i32
    %c2_i32 = arith.constant 2 : i32
    %112 = arith.addi %c0_i32_50, %c2_i32 : i32
    %c1_i32 = arith.constant 1 : i32
    %113 = scf.for %arg24 = %c0_i32_50 to %112 step %c1_i32 iter_args(%arg25 = %111) -> (vector<16x32xf32>)  : i32 {
      %c8_i32 = arith.constant 8 : i32
      %135 = arith.muli %arg24, %c8_i32 : i32
      %136 = tpu.assume_multiple %135, 8 : i32
      %137 = arith.index_cast %136 : i32 to index
      %c0_69 = arith.constant 0 : index
      %138 = vector.load %arg18[%137, %c0_69] : memref<16x32xf32, #tpu.memory_space<vmem>>, vector<8x32xf32>
      %139 = arith.index_cast %136 : i32 to index
      %c0_70 = arith.constant 0 : index
      %140 = vector.load %arg19[%139, %c0_70] : memref<16x32xf32, #tpu.memory_space<vmem>>, vector<8x32xf32>
      %141 = arith.index_cast %136 : i32 to index
      %c0_71 = arith.constant 0 : index
      %142 = vector.load %arg22[%141, %c0_71] : memref<16x16xf32, #tpu.memory_space<vmem>>, vector<8x16xf32>
      %143 = tpu.transpose %142, [1, 0] : vector<8x16xf32> -> vector<16x8xf32>
      %144 = arith.index_cast %136 : i32 to index
      %c0_72 = arith.constant 0 : index
      %145 = vector.load %arg23[%144, %c0_72] : memref<16x16xf32, #tpu.memory_space<vmem>>, vector<8x16xf32>
      %146 = tpu.transpose %145, [1, 0] : vector<8x16xf32> -> vector<16x8xf32>
      %147 = vector.extract_strided_slice %138 {offsets = [0, 0], sizes = [1, 32], strides = [1, 1]} : vector<8x32xf32> to vector<1x32xf32>
      %148 = vector.broadcast %147 : vector<1x32xf32> to vector<16x32xf32>
      %149 = arith.mulf %148, %110 : vector<16x32xf32>
      %150 = math.exp %149 : vector<16x32xf32>
      %151 = vector.extract_strided_slice %138 {offsets = [1, 0], sizes = [1, 32], strides = [1, 1]} : vector<8x32xf32> to vector<1x32xf32>
      %152 = vector.broadcast %151 : vector<1x32xf32> to vector<16x32xf32>
      %153 = arith.mulf %152, %110 : vector<16x32xf32>
      %154 = math.exp %153 : vector<16x32xf32>
      %155 = vector.extract_strided_slice %138 {offsets = [2, 0], sizes = [1, 32], strides = [1, 1]} : vector<8x32xf32> to vector<1x32xf32>
      %156 = vector.broadcast %155 : vector<1x32xf32> to vector<16x32xf32>
      %157 = arith.mulf %156, %110 : vector<16x32xf32>
      %158 = math.exp %157 : vector<16x32xf32>
      %159 = vector.extract_strided_slice %138 {offsets = [3, 0], sizes = [1, 32], strides = [1, 1]} : vector<8x32xf32> to vector<1x32xf32>
      %160 = vector.broadcast %159 : vector<1x32xf32> to vector<16x32xf32>
      %161 = arith.mulf %160, %110 : vector<16x32xf32>
      %162 = math.exp %161 : vector<16x32xf32>
      %163 = vector.extract_strided_slice %138 {offsets = [4, 0], sizes = [1, 32], strides = [1, 1]} : vector<8x32xf32> to vector<1x32xf32>
      %164 = vector.broadcast %163 : vector<1x32xf32> to vector<16x32xf32>
      %165 = arith.mulf %164, %110 : vector<16x32xf32>
      %166 = math.exp %165 : vector<16x32xf32>
      %167 = vector.extract_strided_slice %138 {offsets = [5, 0], sizes = [1, 32], strides = [1, 1]} : vector<8x32xf32> to vector<1x32xf32>
      %168 = vector.broadcast %167 : vector<1x32xf32> to vector<16x32xf32>
      %169 = arith.mulf %168, %110 : vector<16x32xf32>
      %170 = math.exp %169 : vector<16x32xf32>
      %171 = vector.extract_strided_slice %138 {offsets = [6, 0], sizes = [1, 32], strides = [1, 1]} : vector<8x32xf32> to vector<1x32xf32>
      %172 = vector.broadcast %171 : vector<1x32xf32> to vector<16x32xf32>
      %173 = arith.mulf %172, %110 : vector<16x32xf32>
      %174 = math.exp %173 : vector<16x32xf32>
      %175 = vector.extract_strided_slice %138 {offsets = [7, 0], sizes = [1, 32], strides = [1, 1]} : vector<8x32xf32> to vector<1x32xf32>
      %176 = vector.broadcast %175 : vector<1x32xf32> to vector<16x32xf32>
      %177 = arith.mulf %176, %110 : vector<16x32xf32>
      %178 = math.exp %177 : vector<16x32xf32>
      %179 = vector.extract_strided_slice %143 {offsets = [0, 0], sizes = [16, 1], strides = [1, 1]} : vector<16x8xf32> to vector<16x1xf32>
      %180 = vector.extract_strided_slice %138 {offsets = [0, 0], sizes = [1, 32], strides = [1, 1]} : vector<8x32xf32> to vector<1x32xf32>
      %181 = vector.extract_strided_slice %140 {offsets = [0, 0], sizes = [1, 32], strides = [1, 1]} : vector<8x32xf32> to vector<1x32xf32>
      %182 = arith.mulf %180, %181 : vector<1x32xf32>
      %183 = vector.broadcast %179 : vector<16x1xf32> to vector<16x32xf32>
      %184 = vector.broadcast %182 : vector<1x32xf32> to vector<16x32xf32>
      %185 = arith.mulf %183, %184 : vector<16x32xf32>
      %186 = vector.extract_strided_slice %143 {offsets = [0, 1], sizes = [16, 1], strides = [1, 1]} : vector<16x8xf32> to vector<16x1xf32>
      %187 = vector.extract_strided_slice %138 {offsets = [1, 0], sizes = [1, 32], strides = [1, 1]} : vector<8x32xf32> to vector<1x32xf32>
      %188 = vector.extract_strided_slice %140 {offsets = [1, 0], sizes = [1, 32], strides = [1, 1]} : vector<8x32xf32> to vector<1x32xf32>
      %189 = arith.mulf %187, %188 : vector<1x32xf32>
      %190 = vector.broadcast %186 : vector<16x1xf32> to vector<16x32xf32>
      %191 = vector.broadcast %189 : vector<1x32xf32> to vector<16x32xf32>
      %192 = arith.mulf %190, %191 : vector<16x32xf32>
      %193 = vector.extract_strided_slice %143 {offsets = [0, 2], sizes = [16, 1], strides = [1, 1]} : vector<16x8xf32> to vector<16x1xf32>
      %194 = vector.extract_strided_slice %138 {offsets = [2, 0], sizes = [1, 32], strides = [1, 1]} : vector<8x32xf32> to vector<1x32xf32>
      %195 = vector.extract_strided_slice %140 {offsets = [2, 0], sizes = [1, 32], strides = [1, 1]} : vector<8x32xf32> to vector<1x32xf32>
      %196 = arith.mulf %194, %195 : vector<1x32xf32>
      %197 = vector.broadcast %193 : vector<16x1xf32> to vector<16x32xf32>
      %198 = vector.broadcast %196 : vector<1x32xf32> to vector<16x32xf32>
      %199 = arith.mulf %197, %198 : vector<16x32xf32>
      %200 = vector.extract_strided_slice %143 {offsets = [0, 3], sizes = [16, 1], strides = [1, 1]} : vector<16x8xf32> to vector<16x1xf32>
      %201 = vector.extract_strided_slice %138 {offsets = [3, 0], sizes = [1, 32], strides = [1, 1]} : vector<8x32xf32> to vector<1x32xf32>
      %202 = vector.extract_strided_slice %140 {offsets = [3, 0], sizes = [1, 32], strides = [1, 1]} : vector<8x32xf32> to vector<1x32xf32>
      %203 = arith.mulf %201, %202 : vector<1x32xf32>
      %204 = vector.broadcast %200 : vector<16x1xf32> to vector<16x32xf32>
      %205 = vector.broadcast %203 : vector<1x32xf32> to vector<16x32xf32>
      %206 = arith.mulf %204, %205 : vector<16x32xf32>
      %207 = vector.extract_strided_slice %143 {offsets = [0, 4], sizes = [16, 1], strides = [1, 1]} : vector<16x8xf32> to vector<16x1xf32>
      %208 = vector.extract_strided_slice %138 {offsets = [4, 0], sizes = [1, 32], strides = [1, 1]} : vector<8x32xf32> to vector<1x32xf32>
      %209 = vector.extract_strided_slice %140 {offsets = [4, 0], sizes = [1, 32], strides = [1, 1]} : vector<8x32xf32> to vector<1x32xf32>
      %210 = arith.mulf %208, %209 : vector<1x32xf32>
      %211 = vector.broadcast %207 : vector<16x1xf32> to vector<16x32xf32>
      %212 = vector.broadcast %210 : vector<1x32xf32> to vector<16x32xf32>
      %213 = arith.mulf %211, %212 : vector<16x32xf32>
      %214 = vector.extract_strided_slice %143 {offsets = [0, 5], sizes = [16, 1], strides = [1, 1]} : vector<16x8xf32> to vector<16x1xf32>
      %215 = vector.extract_strided_slice %138 {offsets = [5, 0], sizes = [1, 32], strides = [1, 1]} : vector<8x32xf32> to vector<1x32xf32>
      %216 = vector.extract_strided_slice %140 {offsets = [5, 0], sizes = [1, 32], strides = [1, 1]} : vector<8x32xf32> to vector<1x32xf32>
      %217 = arith.mulf %215, %216 : vector<1x32xf32>
      %218 = vector.broadcast %214 : vector<16x1xf32> to vector<16x32xf32>
      %219 = vector.broadcast %217 : vector<1x32xf32> to vector<16x32xf32>
      %220 = arith.mulf %218, %219 : vector<16x32xf32>
      %221 = vector.extract_strided_slice %143 {offsets = [0, 6], sizes = [16, 1], strides = [1, 1]} : vector<16x8xf32> to vector<16x1xf32>
      %222 = vector.extract_strided_slice %138 {offsets = [6, 0], sizes = [1, 32], strides = [1, 1]} : vector<8x32xf32> to vector<1x32xf32>
      %223 = vector.extract_strided_slice %140 {offsets = [6, 0], sizes = [1, 32], strides = [1, 1]} : vector<8x32xf32> to vector<1x32xf32>
      %224 = arith.mulf %222, %223 : vector<1x32xf32>
      %225 = vector.broadcast %221 : vector<16x1xf32> to vector<16x32xf32>
      %226 = vector.broadcast %224 : vector<1x32xf32> to vector<16x32xf32>
      %227 = arith.mulf %225, %226 : vector<16x32xf32>
      %228 = vector.extract_strided_slice %143 {offsets = [0, 7], sizes = [16, 1], strides = [1, 1]} : vector<16x8xf32> to vector<16x1xf32>
      %229 = vector.extract_strided_slice %138 {offsets = [7, 0], sizes = [1, 32], strides = [1, 1]} : vector<8x32xf32> to vector<1x32xf32>
      %230 = vector.extract_strided_slice %140 {offsets = [7, 0], sizes = [1, 32], strides = [1, 1]} : vector<8x32xf32> to vector<1x32xf32>
      %231 = arith.mulf %229, %230 : vector<1x32xf32>
      %232 = vector.broadcast %228 : vector<16x1xf32> to vector<16x32xf32>
      %233 = vector.broadcast %231 : vector<1x32xf32> to vector<16x32xf32>
      %234 = arith.mulf %232, %233 : vector<16x32xf32>
      %235 = arith.mulf %150, %arg25 : vector<16x32xf32>
      %236 = arith.addf %235, %185 : vector<16x32xf32>
      %237 = vector.extract_strided_slice %146 {offsets = [0, 0], sizes = [16, 1], strides = [1, 1]} : vector<16x8xf32> to vector<16x1xf32>
      %238 = vector.broadcast %237 : vector<16x1xf32> to vector<16x32xf32>
      %239 = arith.mulf %236, %238 : vector<16x32xf32>
      %cst_73 = arith.constant dense<0.000000e+00> : vector<32xf32>
      %240 = vector.multi_reduction <add>, %239, %cst_73 [0] : vector<16x32xf32> to vector<32xf32>
      %241 = vector.shape_cast %240 : vector<32xf32> to vector<1x32xf32>
      %242 = arith.mulf %154, %236 : vector<16x32xf32>
      %243 = arith.addf %242, %192 : vector<16x32xf32>
      %244 = vector.extract_strided_slice %146 {offsets = [0, 1], sizes = [16, 1], strides = [1, 1]} : vector<16x8xf32> to vector<16x1xf32>
      %245 = vector.broadcast %244 : vector<16x1xf32> to vector<16x32xf32>
      %246 = arith.mulf %243, %245 : vector<16x32xf32>
      %cst_74 = arith.constant dense<0.000000e+00> : vector<32xf32>
      %247 = vector.multi_reduction <add>, %246, %cst_74 [0] : vector<16x32xf32> to vector<32xf32>
      %248 = vector.shape_cast %247 : vector<32xf32> to vector<1x32xf32>
      %249 = arith.mulf %158, %243 : vector<16x32xf32>
      %250 = arith.addf %249, %199 : vector<16x32xf32>
      %251 = vector.extract_strided_slice %146 {offsets = [0, 2], sizes = [16, 1], strides = [1, 1]} : vector<16x8xf32> to vector<16x1xf32>
      %252 = vector.broadcast %251 : vector<16x1xf32> to vector<16x32xf32>
      %253 = arith.mulf %250, %252 : vector<16x32xf32>
      %cst_75 = arith.constant dense<0.000000e+00> : vector<32xf32>
      %254 = vector.multi_reduction <add>, %253, %cst_75 [0] : vector<16x32xf32> to vector<32xf32>
      %255 = vector.shape_cast %254 : vector<32xf32> to vector<1x32xf32>
      %256 = arith.mulf %162, %250 : vector<16x32xf32>
      %257 = arith.addf %256, %206 : vector<16x32xf32>
      %258 = vector.extract_strided_slice %146 {offsets = [0, 3], sizes = [16, 1], strides = [1, 1]} : vector<16x8xf32> to vector<16x1xf32>
      %259 = vector.broadcast %258 : vector<16x1xf32> to vector<16x32xf32>
      %260 = arith.mulf %257, %259 : vector<16x32xf32>
      %cst_76 = arith.constant dense<0.000000e+00> : vector<32xf32>
      %261 = vector.multi_reduction <add>, %260, %cst_76 [0] : vector<16x32xf32> to vector<32xf32>
      %262 = vector.shape_cast %261 : vector<32xf32> to vector<1x32xf32>
      %263 = arith.mulf %166, %257 : vector<16x32xf32>
      %264 = arith.addf %263, %213 : vector<16x32xf32>
      %265 = vector.extract_strided_slice %146 {offsets = [0, 4], sizes = [16, 1], strides = [1, 1]} : vector<16x8xf32> to vector<16x1xf32>
      %266 = vector.broadcast %265 : vector<16x1xf32> to vector<16x32xf32>
      %267 = arith.mulf %264, %266 : vector<16x32xf32>
      %cst_77 = arith.constant dense<0.000000e+00> : vector<32xf32>
      %268 = vector.multi_reduction <add>, %267, %cst_77 [0] : vector<16x32xf32> to vector<32xf32>
      %269 = vector.shape_cast %268 : vector<32xf32> to vector<1x32xf32>
      %270 = arith.mulf %170, %264 : vector<16x32xf32>
      %271 = arith.addf %270, %220 : vector<16x32xf32>
      %272 = vector.extract_strided_slice %146 {offsets = [0, 5], sizes = [16, 1], strides = [1, 1]} : vector<16x8xf32> to vector<16x1xf32>
      %273 = vector.broadcast %272 : vector<16x1xf32> to vector<16x32xf32>
      %274 = arith.mulf %271, %273 : vector<16x32xf32>
      %cst_78 = arith.constant dense<0.000000e+00> : vector<32xf32>
      %275 = vector.multi_reduction <add>, %274, %cst_78 [0] : vector<16x32xf32> to vector<32xf32>
      %276 = vector.shape_cast %275 : vector<32xf32> to vector<1x32xf32>
      %277 = arith.mulf %174, %271 : vector<16x32xf32>
      %278 = arith.addf %277, %227 : vector<16x32xf32>
      %279 = vector.extract_strided_slice %146 {offsets = [0, 6], sizes = [16, 1], strides = [1, 1]} : vector<16x8xf32> to vector<16x1xf32>
      %280 = vector.broadcast %279 : vector<16x1xf32> to vector<16x32xf32>
      %281 = arith.mulf %278, %280 : vector<16x32xf32>
      %cst_79 = arith.constant dense<0.000000e+00> : vector<32xf32>
      %282 = vector.multi_reduction <add>, %281, %cst_79 [0] : vector<16x32xf32> to vector<32xf32>
      %283 = vector.shape_cast %282 : vector<32xf32> to vector<1x32xf32>
      %284 = arith.mulf %178, %278 : vector<16x32xf32>
      %285 = arith.addf %284, %234 : vector<16x32xf32>
      %286 = vector.extract_strided_slice %146 {offsets = [0, 7], sizes = [16, 1], strides = [1, 1]} : vector<16x8xf32> to vector<16x1xf32>
      %287 = vector.broadcast %286 : vector<16x1xf32> to vector<16x32xf32>
      %288 = arith.mulf %285, %287 : vector<16x32xf32>
      %cst_80 = arith.constant dense<0.000000e+00> : vector<32xf32>
      %289 = vector.multi_reduction <add>, %288, %cst_80 [0] : vector<16x32xf32> to vector<32xf32>
      %290 = vector.shape_cast %289 : vector<32xf32> to vector<1x32xf32>
      %291 = tpu.concatenate %241, %248, %255, %262, %269, %276, %283, %290 in 0 : vector<1x32xf32>, vector<1x32xf32>, vector<1x32xf32>, vector<1x32xf32>, vector<1x32xf32>, vector<1x32xf32>, vector<1x32xf32>, vector<1x32xf32> -> vector<8x32xf32>
      %292 = arith.index_cast %136 : i32 to index
      %c0_81 = arith.constant 0 : index
      %293 = vector.load %arg21[%292, %c0_81] : memref<16x32xf32, #tpu.memory_space<vmem>>, vector<8x32xf32>
      tpu.vector_store %arg21[%292, %c0_81], %291 {strides = array<i32>} : memref<16x32xf32, #tpu.memory_space<vmem>>, vector<8x32xf32>,
      scf.yield %285 : vector<16x32xf32>
    }
    %c2_i32_51 = arith.constant 2 : i32
    %c0_52 = arith.constant 0 : index
    %c0_53 = arith.constant 0 : index
    %114 = vector.load %arg16[%c0_52, %c0_53] : memref<16x32xf32, #tpu.memory_space<vmem>>, vector<16x32xf32>
    tpu.vector_store %arg16[%c0_52, %c0_53], %113 {strides = array<i32>} : memref<16x32xf32, #tpu.memory_space<vmem>>, vector<16x32xf32>,
    %c0_54 = arith.constant 0 : index
    %c0_55 = arith.constant 0 : index
    %115 = vector.load %arg19[%c0_54, %c0_55] : memref<16x32xf32, #tpu.memory_space<vmem>>, vector<16x32xf32>
    %c0_56 = arith.constant 0 : index
    %c0_57 = arith.constant 0 : index
    %116 = vector.load %arg20[%c0_56, %c0_57] : memref<16x32xf32, #tpu.memory_space<vmem>>, vector<16x32xf32>
    %c0_58 = arith.constant 0 : index
    %c0_59 = arith.constant 0 : index
    %117 = vector.load %arg21[%c0_58, %c0_59] : memref<16x32xf32, #tpu.memory_space<vmem>>, vector<16x32xf32>
    %c0_60 = arith.constant 0 : index
    %c0_61 = arith.constant 0 : index
    %118 = vector.load %arg13[%c0_60, %c0_61] : memref<1x32xf32, #tpu.memory_space<vmem>>, vector<1x32xf32>
    %119 = vector.broadcast %118 : vector<1x32xf32> to vector<16x32xf32>
    %120 = arith.mulf %119, %115 : vector<16x32xf32>
    %121 = arith.addf %117, %120 : vector<16x32xf32>
    %122 = arith.negf %116 : vector<16x32xf32>
    %123 = math.exp %122 : vector<16x32xf32>
    %cst_62 = arith.constant 1.000000e+00 : f32
    %124 = vector.broadcast %cst_62 : f32 to vector<16x32xf32>
    %125 = arith.addf %124, %123 : vector<16x32xf32>
    %126 = arith.divf %124, %125 : vector<16x32xf32>
    %127 = arith.mulf %116, %126 : vector<16x32xf32>
    %128 = arith.mulf %121, %127 : vector<16x32xf32>
    %129 = arith.truncf %128 : vector<16x32xf32> to vector<16x32xbf16>
    %c0_63 = arith.constant 0 : index
    %c0_64 = arith.constant 0 : index
    %130 = vector.load %arg14[%c0_63, %c0_64] : memref<32x16xbf16, #tpu.memory_space<vmem>>, vector<32x16xbf16>
    %cst_65 = arith.constant dense<0.000000e+00> : vector<16x16xf32>
    %131 = tpu.matmul %129, %130, %cst_65 {dimension_numbers = #tpu.dot_dimension_numbers<[1], [0], [0], [1], [0, 0, 1, 1], [], []>} : vector<16x32xbf16>, vector<32x16xbf16>, vector<16x16xf32> -> vector<16x16xf32>
    %c0_66 = arith.constant 0 : index
    %c0_67 = arith.constant 0 : index
    %c0_68 = arith.constant 0 : index
    %132 = vector.load %arg15[%c0_66, %c0_67, %c0_68] : memref<1x16x16xf32, #tpu.memory_space<vmem>>, vector<1x16x16xf32>
    %133 = vector.shape_cast %132 : vector<1x16x16xf32> to vector<16x16xf32>
    %134 = vector.shape_cast %131 : vector<16x16xf32> to vector<1x16x16xf32>
    tpu.vector_store %arg15[%c0_66, %c0_67, %c0_68], %134 {strides = array<i32>} : memref<1x16x16xf32, #tpu.memory_space<vmem>>, vector<1x16x16xf32>,
    return
  }
  func.func @transform_0(%arg0: i32, %arg1: i32) -> (i32, i32, i32) {
    %c0_i32 = arith.constant 0 : i32
    %c0_i32_0 = arith.constant 0 : i32
    return %arg0, %arg1, %c0_i32 : i32, i32, i32
  }
  func.func @transform_1(%arg0: i32, %arg1: i32) -> (i32, i32) {
    %c0_i32 = arith.constant 0 : i32
    %c0_i32_0 = arith.constant 0 : i32
    %c0_i32_1 = arith.constant 0 : i32
    return %c0_i32, %c0_i32_0 : i32, i32
  }
  func.func @transform_2(%arg0: i32, %arg1: i32) -> (i32, i32) {
    %c0_i32 = arith.constant 0 : i32
    %c0_i32_0 = arith.constant 0 : i32
    %c0_i32_1 = arith.constant 0 : i32
    return %c0_i32, %c0_i32_0 : i32, i32
  }
  func.func @transform_3(%arg0: i32, %arg1: i32) -> (i32, i32) {
    %c0_i32 = arith.constant 0 : i32
    %c0_i32_0 = arith.constant 0 : i32
    %c0_i32_1 = arith.constant 0 : i32
    return %c0_i32, %c0_i32_0 : i32, i32
  }
  func.func @transform_4(%arg0: i32, %arg1: i32) -> (i32, i32) {
    %c0_i32 = arith.constant 0 : i32
    %c0_i32_0 = arith.constant 0 : i32
    %c0_i32_1 = arith.constant 0 : i32
    return %c0_i32, %c0_i32_0 : i32, i32
  }
  func.func @transform_5(%arg0: i32, %arg1: i32) -> (i32, i32) {
    %c0_i32 = arith.constant 0 : i32
    %c0_i32_0 = arith.constant 0 : i32
    %c0_i32_1 = arith.constant 0 : i32
    return %c0_i32, %c0_i32_0 : i32, i32
  }
  func.func @transform_6(%arg0: i32, %arg1: i32) -> (i32, i32) {
    %c0_i32 = arith.constant 0 : i32
    %c0_i32_0 = arith.constant 0 : i32
    %c0_i32_1 = arith.constant 0 : i32
    return %c0_i32, %c0_i32_0 : i32, i32
  }
  func.func @transform_7(%arg0: i32, %arg1: i32) -> (i32, i32) {
    %c0_i32 = arith.constant 0 : i32
    %c0_i32_0 = arith.constant 0 : i32
    %c0_i32_1 = arith.constant 0 : i32
    return %c0_i32, %c0_i32_0 : i32, i32
  }
  func.func @transform_8(%arg0: i32, %arg1: i32) -> (i32, i32) {
    %c0_i32 = arith.constant 0 : i32
    %c0_i32_0 = arith.constant 0 : i32
    %c0_i32_1 = arith.constant 0 : i32
    return %c0_i32, %c0_i32_0 : i32, i32
  }
  func.func @transform_9(%arg0: i32, %arg1: i32) -> (i32, i32) {
    %c0_i32 = arith.constant 0 : i32
    %c0_i32_0 = arith.constant 0 : i32
    %c0_i32_1 = arith.constant 0 : i32
    return %c0_i32, %c0_i32_0 : i32, i32
  }
  func.func @transform_10(%arg0: i32, %arg1: i32) -> (i32, i32) {
    %c0_i32 = arith.constant 0 : i32
    %c0_i32_0 = arith.constant 0 : i32
    %c0_i32_1 = arith.constant 0 : i32
    return %c0_i32, %c0_i32_0 : i32, i32
  }
  func.func @transform_11(%arg0: i32, %arg1: i32) -> (i32, i32) {
    %c0_i32 = arith.constant 0 : i32
    %c0_i32_0 = arith.constant 0 : i32
    %c0_i32_1 = arith.constant 0 : i32
    return %c0_i32, %c0_i32_0 : i32, i32
  }
  func.func @transform_12(%arg0: i32, %arg1: i32) -> (i32, i32) {
    %c0_i32 = arith.constant 0 : i32
    %c0_i32_0 = arith.constant 0 : i32
    %c0_i32_1 = arith.constant 0 : i32
    return %c0_i32, %c0_i32_0 : i32, i32
  }
  func.func @transform_13(%arg0: i32, %arg1: i32) -> (i32, i32, i32) {
    %c0_i32 = arith.constant 0 : i32
    %c0_i32_0 = arith.constant 0 : i32
    return %arg0, %arg1, %c0_i32 : i32, i32, i32
  }
}

</mosaic_0001>

<bundles_post_ra>
// kernel: tpu_custom_call.1
= control target key start
LH: loop header
LB: loop body
LE: loop exit
PB: predicated region body
PF: predicated region fallthrough
CT: control target
= control target key end

     0   :  { %s2014_s25 = smov 0   ;;  %s2016_s26 = smov 0   ;;  %s2405_s0 = inlined_call_operand.vmem [shape: f32[2,32,16], index: 0, kind: input, shape index: {}]   ;;  %s2406_s1 = inlined_call_operand.vmem [shape: f32[1,16], index: 1, kind: input, shape index: {}]   ;;  %s2407_s2 = inlined_call_operand.vmem [shape: f32[1,16], index: 2, kind: input, shape index: {}]   ;;  %s2408_s3 = inlined_call_operand.vmem [shape: bf16[16,32], index: 3, kind: input, shape index: {}]   ;;  %s2409_s4 = inlined_call_operand.vmem [shape: bf16[16,32], index: 4, kind: input, shape index: {}]   ;;  %s2410_s5 = inlined_call_operand.vmem [shape: f32[4,32], index: 5, kind: input, shape index: {}]   ;;  %s2411_s6 = inlined_call_operand.vmem [shape: f32[1,32], index: 6, kind: input, shape index: {}]   ;;  %s2412_s7 = inlined_call_operand.vmem [shape: bf16[32,33], index: 7, kind: input, shape index: {}]   ;;  %s2413_s8 = inlined_call_operand.vmem [shape: bf16[1,32], index: 8, kind: input, shape index: {}]   ;;  %s2414_s9 = inlined_call_operand.vmem [shape: f32[1,32], index: 9, kind: input, shape index: {}]   ;;  %s2415_s10 = inlined_call_operand.vmem [shape: f32[16,32], index: 10, kind: input, shape index: {}]   ;;  %s2416_s11 = inlined_call_operand.vmem [shape: f32[1,32], index: 11, kind: input, shape index: {}]   ;;  %s2417_s12 = inlined_call_operand.vmem [shape: bf16[32,16], index: 12, kind: input, shape index: {}]   ;;  %s2418_s13 = inlined_call_operand.vmem [shape: f32[2,32,16], index: 13, kind: output, shape index: {}]  }
   0x1   :  { %s2018_s27 = smov 0   ;;  %s2020_s28 = smov 0  }
   0x2   :  { %s2022_s29 = smov 0  }
   0x3 LB: > { %s32_s30 = sadd.s32 1, %s1908_s27  ;;  %s35_s14 = sadd.s32 1, %s1912_s28  ;;  %s1916_s29 = sphi %s2022_s29, %s23_s29   ;;  %s1912_s28 = sphi %s2020_s28, %s2424_s28   ;;  %s1908_s27 = sphi %s2018_s27, %s2423_s27   ;;  %s1904_s26 = sphi %s2016_s26, %s2422_s26   ;;  %s1900_s25 = sphi %s2014_s25, %s2421_s25  }
   0x4   : > { %p33_p0 = scmp.ge.s32.totalorder %s32_s30, 2  ;;  %p1614_p1 = scmp.ge.s32.totalorder %s1916_s29, 1 }
   0x5   : > { %p408_p2 = scmp.lt.s32.totalorder %s1916_s29, 5 }
   0x6   : > { %s2426_s30 = smov (%p33_p0, %s32_s30), 0  ;;  %s2428_s14 = smov (!%p33_p0, %s35_s14), %s1912_s28 }
   0x7   : > { %p409_p3 = pnand %p1614_p1, %p408_p2  ;;  %p37_p4 = scmp.ge.s32.totalorder %s2428_s14, 2 }
   0x8   : > { %s1615_s15 = sshll.u32 (!%p409_p3), %s1900_s25, 1  ;;  %p461_p5 = scmp.lt.s32.totalorder (!%p409_p3), %s1904_s26, 1 }
   0x9   : > { %s2430_s14 = smov (%p37_p4, %s2428_s14), 0  ;;  %412 = sbr.rel (%p409_p3) target bundleno = 1695 (0x69f), region = 72 }
   0xa   : > { %p463_p6 = scmp.lt.s32.totalorder (!%p409_p3), %s1615_s15, 3  ;;  %p1621_p7 = scmp.ne.s32.totalorder (!%p409_p3), %s1900_s25, 0 }
  0x10   : > { %s2432_s26 = smov (!%p461_p5, %s1904_s26), 1  ;;  %s2434_s15 = smov (!%p463_p6, %s1615_s15), 3 }
  0x11   : > { %s1616_s16 = sshll.u32 %s2432_s26, 2  ;;  %484 = sbr.rel (%p1621_p7) target bundleno = 24 (0x18), region = 76  ;;  %vm485_vm0 = vcmask (!%p1621_p7), 261120   ;;  %v1930_v0 = vmov (!%p1621_p7), 0.0  }
  0x12   : > { %s466_s17 = sadd.s32 %s1616_s16, %s2434_s15  ;;  %486 = vst.msk [vmem:[#allocation2] sm:$0xff] (!%p1621_p7), %vm485_vm0, %v1930_v0  ;;  %487 = vst.msk [vmem:[#allocation2 + $0x8] sm:$0xff] (!%p1621_p7), %vm485_vm0, %v1930_v0 }
  0x13   : > { %s1617_s18 = sshll.u32 %s466_s17, 3  ;;  %488 = vst.msk [vmem:[#allocation3] sm:$0xff] (!%p1621_p7), %vm485_vm0, %v1930_v0 }
  0x14   : > { %s468_s21 = scalar_lea.vmem %s2405_s0, %s1617_s18  ;;  %s2050_s24 = scalar_lea.vmem %s2418_s13, %s1617_s18 }
  0x18 PF: > { %v489_v1 = vld [vmem:[%s468_s21] sm:$0xff]  ;;  %vm491_vm1 = vcmask 130048   ;;  %v490_v2 = vld [vmem:[%s468_s21 + $0x8] sm:$0xff]  ;;  %v1931_v17 = vmov 0.0   ;;  %vm1932_vm2 = vmmov 0   ;;  %vm846_vm3 = vcmask 1040384  }
  0x19   : > { %v492_v3 = vsel %vm491_vm1, %v489_v1, 0.0  ;;  %v495_v4 = vsel %vm491_vm1, %v490_v2, 0.0  ;;  %v1770_v15 = vld [vmem:[%s2408_s3] sm:$0xff]   ;;  %1657 = vmatprep.subr.bf16.mxu0 %v1931_v17  ;;  %1663 = vmatprep.subr.bf16.mxu1 %v1931_v17  ;;  %v1773_v36 = vld [vmem:[%s2412_s7 + $0x8] sm:$0xff]   ;;  %v1933_v38 = vmov 0   ;;  %v645_v41 = vlaneseq  ;;  %s1934_s20 = smov 111  }
  0x1a   : > { %493 = vadd.xlane.f32.xlu0 %v492_v3  ;;  %v1771_v16 = vld [vmem:[%s2409_s4] sm:$0xff]   ;;  %1658 = vmatpush3.bf16.msra.mxu0 %v1770_v15  ;;  %v848_v39 = vsel %vm846_vm3, 65535, %v1933_v38  ;;  %v643_v47 = vld [vmem:[#allocation3] sm:$0xff]  ;;  %vm639_vm4 = vcmask 261120   ;;  %vm659_vm5 = vcmask 1046528   ;;  %vm675_vm6 = vcmask 1045504  }
  0x1b   : > { %1664 = vmatpush3.bf16.msra.mxu1 %v1771_v16  ;;  %1659 = vmatprep.mubr.msk.bf16.mxu0 %vm1932_vm2, %v1931_v17  ;;  %v1622_v26 = vld [vmem:[%s2406_s1] ss:$0 sm:$0xff]  ;;  %v2093_v42 = vshrl.u32 %v645_v41, 7  ;;  %vm718_vm7 = vcmask 1042432   ;;  %s1935_s21 = smov 127   ;;  %vm842_vm8 = vcmask 7168  }
  0x1c   : > { %1665 = vmatprep.mubr.msk.bf16.mxu1 %vm1932_vm2, %v1931_v17  ;;  %1669 = vmatprep.subr.bf16.mxu0 %v1931_v17  ;;  %v1623_v30 = vld [vmem:[%s2407_s2] ss:$0 sm:$0xff]  ;;  %s2152_s17 = smov 0  }
  0x1d   : > { %1677 = vmatprep.subr.bf16.mxu1 %v1931_v17  ;;  %v1772_v35 = vld [vmem:[%s2412_s7] sm:$0xff]   ;;  %v2096_v43 = vsub.s32 1, %v2093_v42  ;;  %v2102_v45 = vsub.s32 2, %v2093_v42  ;;  %v2107_v49 = vsub.s32 0, %v2093_v42  ;;  %v2110_v50 = vsub.s32 3, %v2093_v42 }
  0x1e   : > { %496 = vadd.xlane.f32.xlu0 %v495_v4  ;;  %v834_v37 = vld [vmem:[%s2413_s8] sm:$0x1] }
  0x1f   : > { %v850_v40 = vand.u32 %v848_v39, %v834_v37  ;;  %v642_v44 = vld [vmem:[%s2410_s5] sm:$0xf] }
  0x20   : > { %v654_v46 = vrot.slane %v642_v44, %v2096_v43  ;;  %v670_v48 = vrot.slane %v642_v44, %v2102_v45  ;;  %v648_v53 = vrot.slane %v642_v44, %v2107_v49  ;;  %v686_v54 = vrot.slane %v642_v44, %v2110_v50 }
  0x22   : > { %v655_v51 = vmul.f32 %v654_v46, %v643_v47  ;;  %v671_v52 = vmul.f32 %v670_v48, %v643_v47  ;;  %v649_v62 = vmul.f32 %v648_v53, %v643_v47 }
  0x24   : > { %v660_v58 = vrot.slane %v655_v51, 1  ;;  %v676_v63 = vrot.slane %v671_v52, 2 }
  0xa7   : > { %v494_v5 = vpop.xlane.xlu0 %493 }
  0xa8   : > { %v499_v6 = vmul.f32 0.0625, %v494_v5 }
  0xaa   : > { %v501_v7 = vsub.f32 %v489_v1, %v499_v6 }
  0xab   : > { %v497_v8 = vpop.xlane.xlu0 %496 }
  0xac   : > { %v500_v9 = vmul.f32 0.0625, %v497_v8  ;;  %v503_v10 = vmul.f32 %v501_v7, %v501_v7 }
  0xae   : > { %v502_v11 = vsub.f32 %v490_v2, %v500_v9  ;;  %v505_v12 = vsel %vm491_vm1, %v503_v10, 0.0 }
  0xaf   : > { %506 = vadd.xlane.f32.xlu1 %v505_v12 }
  0xb0   : > { %v504_v13 = vmul.f32 %v502_v11, %v502_v11 }
  0xb2   : > { %v508_v14 = vsel %vm491_vm1, %v504_v13, 0.0 }
  0xb3   : > { %509 = vadd.xlane.f32.xlu1 %v508_v14 }
 0x13c   : > { %v507_v18 = vpop.xlane.xlu1 %506 }
 0x13d   : > { %v511_v19 = vmul.f32 0.0625, %v507_v18 }
 0x13f   : > { %v513_v20 = vadd.f32 1e-05, %v511_v19 }
 0x140   : > { %v510_v21 = vpop.xlane.xlu1 %509 }
 0x141   : > { %1774 = vrsqrt.f32 %v513_v20  ;;  %v512_v22 = vmul.f32 0.0625, %v510_v21 }
 0x143   : > { %v514_v23 = vadd.f32 1e-05, %v512_v22 }
 0x145   : > { %1776 = vrsqrt.f32 %v514_v23 }
 0x14b   : > { %v1775_v24 = vpop.eup %1774 }
 0x14c   : > { %v517_v25 = vmul.f32 %v1775_v24, %v501_v7 }
 0x14e   : > { %v526_v29 = vmul.f32 %v1622_v26, %v517_v25 }
 0x14f   : > { %v1777_v27 = vpop.eup %1776 }
 0x150   : > { %v518_v28 = vmul.f32 %v1777_v27, %v502_v11  ;;  %v535_v32 = vadd.f32 %v1623_v30, %v526_v29 }
 0x152   : > { %v527_v31 = vmul.f32 %v1622_v26, %v518_v28 }
 0x154   : > { %v536_v33 = vadd.f32 %v1623_v30, %v527_v31 }
 0x156   : > { %v537_v34 = vpack.c.bf16 %v536_v33, %v535_v32  ;;  %v1628_v33 = vld [vmem:[%s2411_s6] ss:$0 sm:$0xff] }
 0x158   : > { %1660 = vmatmul.mubr.msk.bf16.vlgmr.msra.gmra.mrb[0].mxu0 %vm491_vm1, %v537_v34  ;;  %1666 = vmatmul.mubr.msk.bf16.vlgmr.msra.gmra.mrb[0].mxu1 %vm491_vm1, %v537_v34 }
 0x159   : > { %1673 = vmatprep.mubr.msk.bf16.mxu0 %vm1932_vm2, %v1931_v17  ;;  %1679 = vmatprep.mubr.msk.bf16.mxu1 %vm1932_vm2, %v1931_v17 }
 0x15a   : > { %1670 = vmatpush3.bf16.msra.mxu0 %v1772_v35  ;;  %1678 = vmatpush3.bf16.msra.mxu1 %v850_v40 }
 0x15b   : > { %1671 = vmatprep.subr.bf16.mxu0 %v1931_v17 }
 0x15e   : > { %1672 = vmatpush3.bf16.msra.mxu0 %v1773_v36 }
 0x22b   : > { %v583_v55 = vpop.f32.mrb[0].mxu0  ;;  %v632_v56 = vpop.f32.mrb[0].mxu1 }
 0x22c   : > { %v656_v57 = vmul.f32 %v654_v46, %v583_v55  ;;  %v672_v59 = vmul.f32 %v670_v48, %v583_v55  ;;  %640 = vst.msk [vmem:[#allocation6] sm:$0xff] %vm639_vm4, %v632_v56  ;;  %v1661_v60 = vpop.f32.mrb[1].mxu0  ;;  %v1667_v61 = vpop.f32.mrb[1].mxu1  ;;  %v650_v2 = vmul.f32 %v648_v53, %v583_v55  ;;  %v687_v5 = vmul.f32 %v686_v54, %v583_v55 }
 0x22d   : > { %v586_v0 = vpop.f32.mrb[2].mxu0  ;;  %v635_v1 = vpop.f32.mrb[2].mxu1 }
 0x22e   : > { %v661_v3 = vrot.slane %v656_v57, 1  ;;  %v677_v4 = vrot.slane %v672_v59, 2  ;;  %644 = vst.msk [vmem:[#allocation3] sm:$0xff] %vm639_vm4, %v586_v0  ;;  %641 = vst.msk [vmem:[#allocation6 + $0x8] sm:$0xff] %vm639_vm4, %v635_v1  ;;  %v1662_v6 = vpop.f32.mrb[3].mxu0  ;;  %v1668_v7 = vpop.f32.mrb[3].mxu1  ;;  %v694_v8 = vmul.f32 %v654_v46, %v586_v0  ;;  %v702_v9 = vmul.f32 %v670_v48, %v586_v0 }
 0x22f   : > { %v693_v12 = vmul.f32 %v648_v53, %v586_v0  ;;  %v710_v16 = vmul.f32 %v686_v54, %v586_v0  ;;  %v689_v20 = vrot.slane %v687_v5, 3  ;;  %v925_v5 = vld [vmem:[#allocation2] sm:$0xff]   ;;  %v926_v6 = vld [vmem:[#allocation2 + $0x8] sm:$0xff]  }
 0x230   : > { %v662_v10 = vsel %vm659_vm5, %v660_v58, %v661_v3  ;;  %v666_v11 = vadd.f32 %v661_v3, %v650_v2  ;;  %v696_v14 = vrot.slane %v694_v8, 1  ;;  %v704_v15 = vrot.slane %v702_v9, 2  ;;  %v1634_v7 = vld [vmem:[%s2414_s9] ss:$0 sm:$0xff] }
 0x231   : > { %v665_v13 = vadd.f32 %v662_v10, %v649_v62  ;;  %v678_v18 = vsel %vm675_vm6, %v676_v63, %v677_v4  ;;  %v712_v29 = vrot.slane %v710_v16, 3 }
 0x232   : > { %v682_v19 = vadd.f32 %v677_v4, %v666_v11  ;;  %v697_v22 = vsel %vm659_vm5, %v661_v3, %v696_v14  ;;  %v701_v23 = vadd.f32 %v696_v14, %v693_v12  ;;  %v705_v24 = vsel %vm675_vm6, %v677_v4, %v704_v15  ;;  %v2136_v3 = vld [vmem:[%s2415_s10] sm:$0xff]  ;;  %v2141_v4 = vld [vmem:[%s2415_s10 + $0x8] sm:$0xff] }
 0x233   : > { %v681_v21 = vadd.f32 %v678_v18, %v665_v13  ;;  %v700_v26 = vadd.f32 %v697_v22, %v650_v2 }
 0x234   : > { %v692_v25 = vadd.f32 %v689_v20, %v682_v19  ;;  %v709_v28 = vadd.f32 %v704_v15, %v701_v23 }
 0x235   : > { %v691_v27 = vadd.f32 %v689_v20, %v681_v21  ;;  %v708_v31 = vadd.f32 %v705_v24, %v700_v26 }
 0x236   : > { %v720_v30 = vrot.slane %v692_v25, 5  ;;  %v715_v34 = vadd.f32 %v712_v29, %v709_v28 }
 0x237   : > { %v719_v32 = vrot.slane %v691_v27, 5  ;;  %v714_v35 = vadd.f32 %v712_v29, %v708_v31 }
 0x238   : > { %v726_v37 = vrot.slane %v715_v34, 5 }
 0x239   : > { %v721_v36 = vsel %vm718_vm7, %v719_v32, %v720_v30  ;;  %v725_v39 = vrot.slane %v714_v35, 5 }
 0x23a   : > { %v736_v38 = vadd.f32 %v1628_v33, %v721_v36 }
 0x23b   : > { %v727_v41 = vsel %vm718_vm7, %v725_v39, %v726_v37 }
 0x23c   : > { %v1629_v40 = vmul.f32 -1.442695, %v736_v38  ;;  %v737_v44 = vadd.f32 %v1628_v33, %v727_v41 }
 0x23e   : > { %1778 = vpow2.f32 %v1629_v40  ;;  %v1630_v46 = vmul.f32 -1.442695, %v737_v44 }
 0x240   : > { %1780 = vpow2.f32 %v1630_v46 }
 0x248   : > { %v1779_v47 = vpop.eup %1778 }
 0x249   : > { %v744_v48 = vadd.f32 1.0, %v1779_v47 }
 0x24a   : > { %v1781_v51 = vpop.eup %1780 }
 0x24b   : > { %1782 = vrcp.f32 %v744_v48  ;;  %v745_v52 = vadd.f32 1.0, %v1781_v51 }
 0x24d   : > { %1784 = vrcp.f32 %v745_v52 }
 0x255   : > { %v1783_v53 = vpop.eup %1782 }
 0x256   : > { %v750_v54 = vmul.f32 %v1783_v53, %v736_v38 }
 0x257   : > { %v1785_v55 = vpop.eup %1784 }
 0x258   : > { %752 = vst.msk [vmem:[#allocation5] sm:$0xff] %vm639_vm4, %v750_v54  ;;  %v751_v56 = vmul.f32 %v1785_v55, %v737_v44 }
 0x25a   : > { %753 = vst.msk [vmem:[#allocation5 + $0x8] sm:$0xff] %vm639_vm4, %v751_v56  ;;  %v754_v57 = vpack.c.bf16 %v751_v56, %v750_v54 }
 0x25c   : > { %1674 = vmatmul.mubr.msk.bf16.vlgmr.msra.gmra.mrb[4].mxu0 %vm639_vm4, %v754_v57 }
 0x32f   : > { %v808_v58 = vpop.f32.mrb[4].mxu0 }
 0x330   : > { %825 = vrot.lane.b32.xlu1 %v808_v58, %s1934_s20  ;;  %817 = vrot.lane.b32.xlu0 %v808_v58, %s1935_s21  ;;  %v1675_v59 = vpop.f32.mrb[5].mxu0 }
 0x331   : > { %v811_v60 = vpop.f32.mrb[6].mxu0 }
 0x332   : > { %v833_v61 = vpack.c.bf16 %v811_v60, %v808_v58  ;;  %v1676_v62 = vpop.f32.mrb[7].mxu0 }
 0x334   : > { %819 = vrot.lane.b32.xlu1 %v811_v60, %s1935_s21  ;;  %1680 = vmatmul.mubr.msk.bf16.vlgmr.msra.gmra.mrb[4].mxu1 %vm842_vm8, %v833_v61 }
 0x338   : > { %827 = vrot.lane.b32.xlu1 %v811_v60, %s1934_s20 }
 0x3a2   : > { %v826_v63 = vpop.permute.xlu1 %825  ;;  %v818_v0 = vpop.permute.xlu0 %817 }
 0x3a3   : > { %831 = vst.msk [vmem:[#allocation9] sm:$0xff] %vm491_vm1, %v826_v63  ;;  %823 = vst.msk [vmem:[#allocation8] sm:$0xff] %vm491_vm1, %v818_v0 }
 0x3a6   : > { %v820_v1 = vpop.permute.xlu1 %819 }
 0x3a7   : > { %824 = vst.msk [vmem:[#allocation8 + $0x8] sm:$0xff] %vm491_vm1, %v820_v1 }
 0x3aa   : > { %v828_v2 = vpop.permute.xlu1 %827 }
 0x3ab   : > { %832 = vst.msk [vmem:[#allocation9 + $0x8] sm:$0xff] %vm491_vm1, %v828_v2 }
 0x407   : > { %v886_v8 = vpop.f32.mrb[4].mxu1 }
 0x408   : > { %v887_v9 = vadd.f32 %v1634_v7, %v886_v8  ;;  %v1681_v10 = vpop.f32.mrb[5].mxu1 }
 0x409   : > { %v889_v11 = vpop.f32.mrb[6].mxu1 }
 0x40a   : > { %v895_v12 = vmin.f32 %v887_v9, 20.0  ;;  %v890_v13 = vadd.f32 %v1634_v7, %v889_v11  ;;  %v1682_v14 = vpop.f32.mrb[7].mxu1  ;;  %vm893_vm10 = vcmp.gt.f32.partialorder %v887_v9, 20.0 }
 0x40c   : > { %v897_v15 = vmul.f32 1.442695, %v895_v12  ;;  %v896_v16 = vmin.f32 %v890_v13, 20.0  ;;  %vm894_vm12 = vcmp.gt.f32.partialorder %v890_v13, 20.0 }
 0x40e   : > { %1786 = vpow2.f32 %v897_v15  ;;  %v899_v18 = vmul.f32 1.442695, %v896_v16 }
 0x410   : > { %1788 = vpow2.f32 %v899_v18 }
 0x418   : > { %v1787_v19 = vpop.eup %1786 }
 0x419   : > { %v901_v20 = vadd.f32 1.0, %v1787_v19  ;;  %v904_v23 = vmul.f32 -0.5, %v1787_v19  ;;  %v907_v26 = vand.u32 2147483647, %v1787_v19 }
 0x41a   : > { %v1789_v21 = vpop.eup %1788 }
 0x41b   : > { %1790 = vlog2.f32 %v901_v20  ;;  %v910_v22 = vadd.f32 1.0, %v1789_v21  ;;  %v913_v24 = vmul.f32 -0.5, %v1789_v21  ;;  %v905_v25 = vadd.f32 1.0, %v904_v23 }
 0x41c   : > { %v916_v29 = vand.u32 2147483647, %v1789_v21  ;;  %vm908_vm9 = vcmp.lt.f32.partialorder %v907_v26, 0.0004427343 }
 0x41d   : > { %1792 = vlog2.f32 %v910_v22  ;;  %v914_v27 = vadd.f32 1.0, %v913_v24  ;;  %v906_v31 = vmul.f32 %v1787_v19, %v905_v25 }
 0x41e   : > { %vm917_vm11 = vcmp.lt.f32.partialorder %v916_v29, 0.0004427343 }
 0x41f   : > { %v915_v35 = vmul.f32 %v1789_v21, %v914_v27 }
 0x425   : > { %v1791_v28 = vpop.eup %1790 }
 0x426   : > { %v903_v30 = vmul.f32 0.6931472, %v1791_v28 }
 0x427   : > { %v1793_v32 = vpop.eup %1792 }
 0x428   : > { %v909_v33 = vsel %vm908_vm9, %v906_v31, %v903_v30  ;;  %v912_v34 = vmul.f32 0.6931472, %v1793_v32 }
 0x429   : > { %v919_v36 = vsel %vm893_vm10, %v887_v9, %v909_v33 }
 0x42a   : > { %921 = vst.msk [vmem:[#allocation4] sm:$0xff] %vm639_vm4, %v919_v36  ;;  %v918_v37 = vsel %vm917_vm11, %v915_v35, %v912_v34 }
 0x42b   : > { %v920_v38 = vsel %vm894_vm12, %v890_v13, %v918_v37 }
 0x42c   : > { %922 = vst.msk [vmem:[#allocation4 + $0x8] sm:$0xff] %vm639_vm4, %v920_v38 }
 0x42d LB: >> { %v1936_v39 = vmov 0   ;;  %s2164_s18 = sshll.u32 %s1928_s17, 3  ;;  %v1937_v44 = vmov 2   ;;  %v1938_v48 = vmov 1   ;;  %v1939_v52 = vmov 4   ;;  %s932_s17 = sadd.s32 1, %s1928_s17   ;;  %s1928_s17 = sphi %s2152_s17, %s932_s17   ;;  %v1924_v5 = vphi %v925_v5, %v2420_v5   ;;  %v1920_v6 = vphi %v926_v6, %v2419_v6  }
 0x42e   : >> { %1794 = vset.pattern.permute.xlu1 %v1936_v39  ;;  %s940_s19 = scalar_lea.vmem [#allocation8], %s2164_s18  ;;  %s974_s20 = scalar_lea.vmem [#allocation9], %s2164_s18  ;;  %v1940_v53 = vmov 3   ;;  %v1941_v55 = vmov 5   ;;  %v1942_v56 = vmov 6   ;;  %v1943_v57 = vmov 7  }
 0x42f   : >> { %v941_v40 = vld [vmem:[%s940_s19] sm:$0xff]  ;;  %s936_s21 = scalar_lea.vmem [#allocation4], %s2164_s18  ;;  %s938_s22 = scalar_lea.vmem [#allocation5], %s2164_s18  ;;  %v1050_v9 = vsub.s32 4, %v2093_v42  ;;  %v1060_v15 = vsub.s32 5, %v2093_v42  ;;  %v1070_v24 = vsub.s32 6, %v2093_v42 }
 0x430   : >> { %942 = vxpose.xlu0.b32.start.end [1/1] (short) (narrow) %v941_v40, 16  ;;  %v975_v41 = vld [vmem:[%s974_s20] sm:$0xff]  ;;  %vm1390_vm13 = vcmask 1041408   ;;  %vm1393_vm14 = vcmask 1043456   ;;  %vm1395_vm15 = vcmask 1044480   ;;  %s1399_s23 = scalar_lea.vmem [#allocation7], %s2164_s18 }
 0x431   : >> { %v939_v7 = vld [vmem:[%s938_s22] sm:$0xff]  ;;  %p929_p8 = scmp.ge.s32.totalorder %s932_s17, 2  }
 0x432   : > { %1683 = vmatprep.subr.bf16.mxu0 (%p929_p8), %v1931_v17  ;;  %1687 = vmatprep.mubr.msk.bf16.mxu0 (%p929_p8), %vm1932_vm2, %v1931_v17 }
 0x433   : >> { %v2184_v58 = vld [vmem:[%s936_s21] sm:$0xff] }
 0x434   : >> { %v2189_v59 = vrot.slane %v2184_v58, %v2107_v49  ;;  %v2196_v61 = vrot.slane %v2184_v58, %v2096_v43  ;;  %v2203_v0 = vrot.slane %v2184_v58, %v2102_v45  ;;  %v2211_v8 = vrot.slane %v2184_v58, %v2110_v50 }
 0x435   : >> { %976 = vxpose.xlu0.b32.start.end [1/1] (short) (narrow) %v975_v41, 16  ;;  %v2216_v10 = vmul.f32 %v939_v7, %v2184_v58  ;;  %v2221_v13 = vrot.slane %v2184_v58, %v1050_v9  ;;  %v2232_v22 = vrot.slane %v2184_v58, %v1060_v15  ;;  %v2246_v31 = vrot.slane %v2184_v58, %v1070_v24 }
 0x436   : >> { %v1012_v60 = vmul.f32 %v2189_v59, %v2136_v3  ;;  %v1022_v63 = vmul.f32 %v2196_v61, %v2136_v3  ;;  %v1032_v2 = vmul.f32 %v2203_v0, %v2136_v3  ;;  %v1042_v12 = vmul.f32 %v2211_v8, %v2136_v3 }
 0x437   : >> { %v2226_v16 = vrot.slane %v2216_v10, %v2107_v49  ;;  %v1052_v20 = vmul.f32 %v2221_v13, %v2136_v3  ;;  %v2238_v26 = vrot.slane %v2216_v10, %v2096_v43  ;;  %v1062_v28 = vmul.f32 %v2232_v22, %v2136_v3 }
 0x438   : >> { %v1014_v62 = vmul.f32 1.442695, %v1012_v60  ;;  %v1024_v1 = vmul.f32 1.442695, %v1022_v63  ;;  %v1034_v11 = vmul.f32 1.442695, %v1032_v2  ;;  %v2251_v34 = vrot.slane %v2216_v10, %v2102_v45 }
 0x439   : >> { %v1044_v18 = vmul.f32 1.442695, %v1042_v12  ;;  %v1064_v36 = vmul.f32 1.442695, %v1062_v28  ;;  %v1072_v37 = vmul.f32 %v2246_v31, %v2136_v3  ;;  %v2275_v63 = vrot.slane %v2216_v10, %v1060_v15 }
 0x43a   : >> { %1824 = vpow2.f32 %v1014_v62  ;;  %v2282_v12 = vrot.slane %v2216_v10, %v1070_v24  ;;  %v1023_v24 = vmul.f32 %v2196_v61, %v2141_v4  ;;  %v1043_v61 = vmul.f32 %v2211_v8, %v2141_v4 }
 0x43b   : >> { %1826 = vpow2.f32 %v1024_v1 }
 0x43c   : >> { %1828 = vpow2.f32 %v1034_v11 }
 0x43d   : >> { %1830 = vpow2.f32 %v1044_v18 }
 0x444   : >> { %v1825_v14 = vpop.eup %1824 }
 0x445   : >> { %v1203_v19 = vmul.f32 %v1924_v5, %v1825_v14  ;;  %v1827_v25 = vpop.eup %1826  ;;  %v1054_v5 = vmul.f32 1.442695, %v1052_v20 }
 0x446   : >> { %v1829_v33 = vpop.eup %1828 }
 0x447   : >> { %1832 = vpow2.f32 %v1054_v5  ;;  %v1831_v41 = vpop.eup %1830 }
 0x448   : >> { %1834 = vpow2.f32 %v1064_v36 }
 0x45e   : >> { %1803 = vset.pattern.permute.xlu0 %v1937_v44 }
 0x4b0   : >> { %v958_v46 = vpop.trf.xlu0 }
 0x4b1   : >> { %1091 = vperm.xlu1 %1794, %v958_v46  }
 0x4b4   : >> { %v959_v47 = vpop.trf.xlu0 }
 0x4b5   : >> { %1795 = vset.pattern.permute.xlu1 %v1938_v48 }
 0x4b6   : >> { %1106 = vperm.xlu1 %1795, %v958_v46  }
 0x4b8   : >> { %v2168_v51 = vpop.trf.xlu0 }
 0x4b9   : >> { %1256 = vperm.xlu0 %1803, %v2168_v51  }
 0x4ba   : >> { %1796 = vset.pattern.permute.xlu1 %v1937_v44 }
 0x4bb   : >> { %1120 = vperm.xlu1 %1796, %v958_v46  }
 0x4bc   : >> { %v2172_v54 = vpop.trf.xlu0 }
 0x4bd   : >> { %1806 = vset.pattern.permute.xlu0 %v1939_v52 }
 0x4be   : >> { %1302 = vperm.xlu0 %1806, %v2168_v51  }
 0x4bf   : >> { %1797 = vset.pattern.permute.xlu1 %v1940_v53 }
 0x4c0   : >> { %1134 = vperm.xlu1 %1797, %v958_v46  }
 0x4c2   : >> { %1808 = vset.pattern.permute.xlu0 %v1938_v48 }
 0x4c3   : >> { %1110 = vperm.xlu0 %1808, %v959_v47  }
 0x4c4   : >> { %1798 = vset.pattern.permute.xlu1 %v1939_v52 }
 0x4c5   : >> { %1148 = vperm.xlu1 %1798, %v958_v46  }
 0x4c7   : >> { %1814 = vset.pattern.permute.xlu0 %v1936_v39 }
 0x4c8   : >> { %1214 = vperm.xlu0 %1814, %v2172_v54  }
 0x4c9   : >> { %1799 = vset.pattern.permute.xlu1 %v1941_v55 }
 0x4ca   : >> { %1162 = vperm.xlu1 %1799, %v958_v46  }
 0x4cc   : >> { %1820 = vset.pattern.permute.xlu0 %v1941_v55 }
 0x4cd   : >> { %1329 = vperm.xlu0 %1820, %v2172_v54  }
 0x4ce   : >> { %1800 = vset.pattern.permute.xlu1 %v1942_v56 }
 0x4cf   : >> { %1176 = vperm.xlu1 %1800, %v958_v46  }
 0x4d1   : >> { %1821 = vset.pattern.permute.xlu0 %v1943_v57 }
 0x4d2   : >> { %1194 = vperm.xlu0 %1821, %v959_v47  }
 0x4d3   : >> { %1801 = vset.pattern.permute.xlu1 %v1936_v39 }
 0x4d4   : >> { %1209 = vperm.xlu1 %1801, %v2168_v51  }
 0x4d6   : >> { %1371 = vperm.xlu0 %1821, %v2168_v51  }
 0x4d8   : >> { %1802 = vset.pattern.permute.xlu1 %v1938_v48 }
 0x4d9   : >> { %1233 = vperm.xlu1 %1802, %v2168_v51  }
 0x4dd   : >> { %1804 = vset.pattern.permute.xlu1 %v1943_v57 }
 0x4de   : >> { %1190 = vperm.xlu1 %1804, %v958_v46  }
 0x4e2   : >> { %1805 = vset.pattern.permute.xlu1 %v1940_v53 }
 0x4e3   : >> { %1279 = vperm.xlu1 %1805, %v2168_v51  }
 0x4e7   : >> { %1807 = vset.pattern.permute.xlu1 %v1936_v39 }
 0x4e8   : >> { %1096 = vperm.xlu1 %1807, %v959_v47  }
 0x4ec   : >> { %1809 = vset.pattern.permute.xlu1 %v1937_v44 }
 0x4ed   : >> { %1124 = vperm.xlu1 %1809, %v959_v47  }
 0x4f1   : >> { %1810 = vset.pattern.permute.xlu1 %v1940_v53 }
 0x4f2   : >> { %1138 = vperm.xlu1 %1810, %v959_v47  }
 0x4f6   : >> { %1811 = vset.pattern.permute.xlu1 %v1939_v52 }
 0x4f7   : >> { %1152 = vperm.xlu1 %1811, %v959_v47  }
 0x4fb   : >> { %1812 = vset.pattern.permute.xlu1 %v1941_v55 }
 0x4fc   : >> { %1166 = vperm.xlu1 %1812, %v959_v47  }
 0x500   : >> { %1813 = vset.pattern.permute.xlu1 %v1942_v56 }
 0x501   : >> { %1180 = vperm.xlu1 %1813, %v959_v47   ;;  %v1074_v47 = vmul.f32 1.442695, %v1072_v37 }
 0x503   : >> { %1836 = vpow2.f32 %v1074_v47 }
 0x505   : >> { %1815 = vset.pattern.permute.xlu1 %v1938_v48 }
 0x506   : >> { %1237 = vperm.xlu1 %1815, %v2172_v54  }
 0x50a   : >> { %1816 = vset.pattern.permute.xlu1 %v1937_v44  ;;  %v2261_v44 = vrot.slane %v2216_v10, %v2110_v50 }
 0x50b   : >> { %1260 = vperm.xlu1 %1816, %v2172_v54  }
 0x50f   : >> { %1817 = vset.pattern.permute.xlu1 %v1940_v53  ;;  %v1833_v53 = vpop.eup %1832 }
 0x510   : >> { %1283 = vperm.xlu1 %1817, %v2172_v54   ;;  %v1835_v62 = vpop.eup %1834 }
 0x511   : >> { %v1837_v11 = vpop.eup %1836 }
 0x514   : >> { %1818 = vset.pattern.permute.xlu1 %v1939_v52 }
 0x515   : >> { %1306 = vperm.xlu1 %1818, %v2172_v54  }
 0x519   : >> { %1819 = vset.pattern.permute.xlu1 %v1941_v55 }
 0x51a   : >> { %1325 = vperm.xlu1 %1819, %v2168_v51  }
 0x51e   : >> { %1822 = vset.pattern.permute.xlu1 %v1942_v56 }
 0x51f   : >> { %1348 = vperm.xlu1 %1822, %v2168_v51  }
 0x523   : >> { %1352 = vperm.xlu1 %1822, %v2172_v54  }
 0x527   : >> { %1823 = vset.pattern.permute.xlu1 %v1943_v57 }
 0x528   : >> { %1375 = vperm.xlu1 %1823, %v2172_v54   ;;  %v2268_v54 = vrot.slane %v2216_v10, %v1050_v9 }
 0x530   : >> { %v1092_v21 = vpop.permute.xlu1 %1091 }
 0x531   : >> { %v1103_v23 = vmul.f32 %v2226_v16, %v1092_v21 }
 0x533   : >> { %v2240_v27 = vadd.f32 %v1203_v19, %v1103_v23  ;;  %v1013_v23 = vmul.f32 %v2189_v59, %v2141_v4 }
 0x535   : >> { %v1107_v29 = vpop.permute.xlu1 %1106  ;;  %v1228_v30 = vmul.f32 %v1827_v25, %v2240_v27  ;;  %v1016_v25 = vmul.f32 1.442695, %v1013_v23 }
 0x536   : >> { %v1117_v32 = vmul.f32 %v2238_v26, %v1107_v29  ;;  %v1026_v29 = vmul.f32 1.442695, %v1023_v24 }
 0x537   : >> { %1838 = vpow2.f32 %v1016_v25 }
 0x538   : >> { %v2253_v35 = vadd.f32 %v1228_v30, %v1117_v32  ;;  %v1257_v32 = vpop.permute.xlu0 %1256  ;;  %1840 = vpow2.f32 %v1026_v29 }
 0x53a   : >> { %v1121_v38 = vpop.permute.xlu1 %1120  ;;  %v1251_v39 = vmul.f32 %v1829_v33, %v2253_v35  ;;  %v1033_v33 = vmul.f32 %v2203_v0, %v2141_v4 }
 0x53b   : >> { %v1131_v40 = vmul.f32 %v2251_v34, %v1121_v38 }
 0x53c   : >> { %v1036_v38 = vmul.f32 1.442695, %v1033_v33 }
 0x53d   : >> { %v2263_v46 = vadd.f32 %v1251_v39, %v1131_v40  ;;  %v2302_v40 = vpop.permute.xlu0 %1302 }
 0x53e   : >> { %1842 = vpow2.f32 %v1036_v38 }
 0x53f   : >> { %v1135_v48 = vpop.permute.xlu1 %1134  ;;  %v1274_v51 = vmul.f32 %v1831_v41, %v2263_v46 }
 0x540   : >> { %v1145_v52 = vmul.f32 %v2261_v44, %v1135_v48 }
 0x541   : >> { %v1839_v36 = vpop.eup %1838 }
 0x542   : >> { %v2270_v55 = vadd.f32 %v1274_v51, %v1145_v52  ;;  %v1204_v39 = vmul.f32 %v1920_v6, %v1839_v36  ;;  %v1841_v48 = vpop.eup %1840  ;;  %v1111_v51 = vpop.permute.xlu0 %1110  ;;  %v1046_v52 = vmul.f32 1.442695, %v1043_v61  ;;  %v1080_v36 = vsub.s32 7, %v2093_v42  ;;  %v1406_v42 = vld [vmem:[#allocation6 + $0x8] sm:$0xff] (%p929_p8) }
 0x543   : > { %v1639_v45 = vmul.f32 (%p929_p8), -1.442695, %v1406_v42 }
 0x544   : >> { %v1149_v56 = vpop.permute.xlu1 %1148  ;;  %v1297_v57 = vmul.f32 %v1833_v53, %v2270_v55  ;;  %1844 = vpow2.f32 %v1046_v52  ;;  %v1263_v52 = vmul.f32 %v1257_v32, %v2263_v46 }
 0x545   : >> { %v1159_v60 = vmul.f32 %v2268_v54, %v1149_v56  ;;  %v1118_v56 = vmul.f32 %v2238_v26, %v1111_v51  ;;  %v1063_v26 = vmul.f32 %v2232_v22, %v2141_v4 }
 0x547   : >> { %v2277_v1 = vadd.f32 %v1297_v57, %v1159_v60  ;;  %v1215_v60 = vpop.permute.xlu0 %1214  ;;  %v1066_v24 = vmul.f32 1.442695, %v1063_v26 }
 0x548   : >> { %v1843_v57 = vpop.eup %1842 }
 0x549   : >> { %v1163_v2 = vpop.permute.xlu1 %1162  ;;  %v1320_v7 = vmul.f32 %v1835_v62, %v2277_v1 }
 0x54a   : >> { %v1173_v9 = vmul.f32 %v2275_v63, %v1163_v2 }
 0x54c   : >> { %v2284_v14 = vadd.f32 %v1320_v7, %v1173_v9 }
 0x54e   : >> { %v1177_v18 = vpop.permute.xlu1 %1176  ;;  %v1343_v19 = vmul.f32 %v1837_v11, %v2284_v14  ;;  %v1845_v23 = vpop.eup %1844 }
 0x54f   : >> { %v1187_v20 = vmul.f32 %v2282_v12, %v1177_v18 }
 0x551   : >> { %v2288_v15 = vadd.f32 %v1343_v19, %v1187_v20 }
 0x553   : >> { %v1210_v21 = vpop.permute.xlu1 %1209 }
 0x554   : >> { %v1217_v8 = vmul.f32 %v1210_v21, %v2240_v27 }
 0x558   : >> { %v1234_v5 = vpop.permute.xlu1 %1233 }
 0x559   : >> { %v1240_v22 = vmul.f32 %v1234_v5, %v2253_v35 }
 0x55d   : >> { %v2294_v28 = vpop.permute.xlu1 %1190 }
 0x562   : >> { %v2296_v30 = vpop.permute.xlu1 %1279 }
 0x563   : >> { %v1286_v46 = vmul.f32 %v2296_v30, %v2270_v55  ;;  %v1309_v30 = vmul.f32 %v2302_v40, %v2277_v1 }
 0x567   : >> { %v1097_v37 = vpop.permute.xlu1 %1096 }
 0x568   : >> { %v1104_v59 = vmul.f32 %v2226_v16, %v1097_v37  ;;  %v1053_v16 = vmul.f32 %v2221_v13, %v2141_v4  ;;  %v1219_v13 = vsel %vm639_vm4, %v1217_v8, 0.0 }
 0x56a   : >> { %v1206_v41 = vadd.f32 %v1204_v39, %v1104_v59  ;;  %v1056_v7 = vmul.f32 1.442695, %v1053_v16 }
 0x56c   : >> { %v1125_v47 = vpop.permute.xlu1 %1124  ;;  %v1229_v53 = vmul.f32 %v1841_v48, %v1206_v41  ;;  %v1218_v62 = vmul.f32 %v1215_v60, %v1206_v41  ;;  %1846 = vpow2.f32 %v1056_v7  ;;  %v1265_v60 = vsel %vm639_vm4, %v1263_v52, 0.0 }
 0x56d   : >> { %v1132_v18 = vmul.f32 %v2251_v34, %v1125_v47  ;;  %1848 = vpow2.f32 %v1066_v24  ;;  %v1073_v34 = vmul.f32 %v2246_v31, %v2141_v4  ;;  %v1081_v47 = vrot.slane %v2184_v58, %v1080_v36 }
 0x56e   : >> { %v1231_v6 = vadd.f32 %v1229_v53, %v1118_v56  ;;  %v1220_v11 = vsel %vm639_vm4, %v1218_v62, 0.0  ;;  %v1288_v24 = vsel %vm639_vm4, %v1286_v46, 0.0 }
 0x56f   : >> { %v1221_v25 = vadd.f32 %v1220_v11, %v1219_v13  ;;  %v1076_v41 = vmul.f32 1.442695, %v1073_v34  ;;  %v1083_v56 = vmul.f32 %v1081_v47, %v2141_v4 }
 0x570   : >> { %v1252_v9 = vmul.f32 %v1843_v57, %v1231_v6 }
 0x571   : >> { %v1139_v0 = vpop.permute.xlu1 %1138  ;;  %v1222_v27 = vrot.slane %v1221_v25, 4  ;;  %1850 = vpow2.f32 %v1076_v41  ;;  %v1086_v8 = vmul.f32 1.442695, %v1083_v56  ;;  %v1330_v41 = vpop.permute.xlu0 %1329 }
 0x572   : >> { %v1254_v20 = vadd.f32 %v1252_v9, %v1132_v18  ;;  %v1146_v21 = vmul.f32 %v2261_v44, %v1139_v0  ;;  %v1242_v44 = vsel %vm639_vm4, %v1240_v22, 0.0  ;;  %v1082_v0 = vmul.f32 %v1081_v47, %v2136_v3 }
 0x573   : >> { %v1223_v59 = vadd.f32 %v1222_v27, %v1221_v25 }
 0x574   : >> { %v1275_v29 = vmul.f32 %v1845_v23, %v1254_v20  ;;  %v1084_v7 = vmul.f32 1.442695, %v1082_v0 }
 0x575   : >> { %v1224_v35 = vrot.slane %v1223_v59, 2 }
 0x576   : >> { %v1153_v2 = vpop.permute.xlu1 %1152  ;;  %v1277_v37 = vadd.f32 %v1275_v29, %v1146_v21  ;;  %v1847_v38 = vpop.eup %1846  ;;  %1852 = vpow2.f32 %v1084_v7 }
 0x577   : >> { %v1160_v48 = vmul.f32 %v2268_v54, %v1153_v2  ;;  %v1849_v57 = vpop.eup %1848  ;;  %v1225_v54 = vadd.f32 %v1224_v35, %v1223_v59  ;;  %1854 = vpow2.f32 %v1086_v8 }
 0x578   : >> { %v1298_v51 = vmul.f32 %v1847_v38, %v1277_v37 }
 0x579   : >> { %v1226_v23 = vrot.slane %v1225_v54, 1 }
 0x57a   : >> { %v1300_v58 = vadd.f32 %v1298_v51, %v1160_v48  ;;  %v1311_v48 = vsel %vm639_vm4, %v1309_v30, 0.0 }
 0x57b   : >> { %v1167_v19 = vpop.permute.xlu1 %1166 }
 0x57c   : >> { %v1174_v18 = vmul.f32 %v2275_v63, %v1167_v19  ;;  %v1321_v26 = vmul.f32 %v1849_v57, %v1300_v58  ;;  %v1227_v19 = vadd.f32 %v1226_v23, %v1225_v54 }
 0x57e   : >> { %v1323_v34 = vadd.f32 %v1321_v26, %v1174_v18 }
 0x580   : >> { %v2315_v33 = vpop.permute.xlu1 %1180  ;;  %v1333_v40 = vmul.f32 %v1330_v41, %v1323_v34 }
 0x585   : >> { %v1238_v39 = vpop.permute.xlu1 %1237 }
 0x586   : >> { %v1241_v61 = vmul.f32 %v1238_v39, %v1231_v6  ;;  %v1851_v39 = vpop.eup %1850 }
 0x588   : >> { %v1243_v31 = vsel %vm639_vm4, %v1241_v61, 0.0 }
 0x589   : >> { %v1244_v5 = vadd.f32 %v1243_v31, %v1242_v44 }
 0x58a   : >> { %v1261_v53 = vpop.permute.xlu1 %1260 }
 0x58b   : >> { %v1245_v16 = vrot.slane %v1244_v5, 4  ;;  %v1264_v6 = vmul.f32 %v1261_v53, %v1254_v20  ;;  %v1188_v53 = vmul.f32 %v2282_v12, %v2315_v33 }
 0x58d   : >> { %v1246_v62 = vadd.f32 %v1245_v16, %v1244_v5  ;;  %v1266_v2 = vsel %vm639_vm4, %v1264_v6, 0.0  ;;  %v1344_v5 = vmul.f32 %v1851_v39, %v1323_v34  ;;  %v1200_v6 = vrot.slane %v2216_v10, %v1080_v36 }
 0x58e   : >> { %v1267_v32 = vadd.f32 %v1266_v2, %v1265_v60  ;;  %v1853_v2 = vpop.eup %1852 }
 0x58f   : >> { %v1247_v9 = vrot.slane %v1246_v62, 2  ;;  %v1284_v11 = vpop.permute.xlu1 %1283  ;;  %v1855_v7 = vpop.eup %1854  ;;  %v1201_v12 = vmul.f32 %v1200_v6, %v2294_v28  ;;  %v1366_v10 = vmul.f32 %v1853_v2, %v2288_v15  ;;  %v1405_v2 = vld [vmem:[#allocation6] sm:$0xff] (%p929_p8) }
 0x590   : >> { %v1268_v13 = vrot.slane %v1267_v32, 4  ;;  %v1287_v20 = vmul.f32 %v1284_v11, %v1277_v37  ;;  %v1638_v43 = vmul.f32 (%p929_p8), -1.442695, %v1405_v2 }
 0x591   : >> { %v1248_v25 = vadd.f32 %v1247_v9, %v1246_v62  ;;  %v1335_v62 = vsel %vm639_vm4, %v1333_v40, 0.0  ;;  %v1195_v9 = vpop.permute.xlu0 %1194  ;;  %v1368_v23 = vadd.f32 %v1366_v10, %v1201_v12  }
 0x592   : >> { %v1269_v29 = vadd.f32 %v1268_v13, %v1267_v32  ;;  %v1289_v27 = vsel %vm639_vm4, %v1287_v20, 0.0  ;;  %1858 = vpow2.f32 (%p929_p8), %v1638_v43 }
 0x593   : >> { %v1249_v21 = vrot.slane %v1248_v25, 1  ;;  %v1290_v55 = vadd.f32 %v1289_v27, %v1288_v24  ;;  %1401 = vst.msk [vmem:[#allocation2] sm:$0xff] (%p929_p8), %vm639_vm4, %v1368_v23  ;;  %1860 = vpow2.f32 (%p929_p8), %v1639_v45 }
 0x594   : >> { %v1270_v22 = vrot.slane %v1269_v29, 2  ;;  %v1307_v63 = vpop.permute.xlu1 %1306 }
 0x595   : >> { %v1250_v38 = vadd.f32 %v1249_v21, %v1248_v25  ;;  %v1291_v37 = vrot.slane %v1290_v55, 4  ;;  %v1310_v59 = vmul.f32 %v1307_v63, %v1300_v58  ;;  %v1202_v21 = vmul.f32 %v1200_v6, %v1195_v9  ;;  %v1372_v30 = vpop.permute.xlu0 %1371 }
 0x596   : >> { %v1271_v61 = vadd.f32 %v1270_v22, %v1269_v29 }
 0x597   : >> { %v1389_v47 = vsel %vm846_vm3, %v1227_v19, %v1250_v38  ;;  %v1292_v44 = vadd.f32 %v1291_v37, %v1290_v55  ;;  %v1312_v51 = vsel %vm639_vm4, %v1310_v59, 0.0  ;;  %v1378_v59 = vmul.f32 %v1372_v30, %v1368_v23 }
 0x598   : >> { %v1272_v31 = vrot.slane %v1271_v61, 1  ;;  %v1313_v1 = vadd.f32 %v1312_v51, %v1311_v48 }
 0x599   : >> { %v1293_v52 = vrot.slane %v1292_v44, 2  ;;  %v1326_v35 = vpop.permute.xlu1 %1325  ;;  %v1380_v48 = vsel %vm639_vm4, %v1378_v59, 0.0 }
 0x59a   : >> { %v1273_v0 = vadd.f32 %v1272_v31, %v1271_v61  ;;  %v1314_v56 = vrot.slane %v1313_v1, 4  ;;  %v1332_v16 = vmul.f32 %v1326_v35, %v2284_v14  ;;  %v1346_v14 = vadd.f32 %v1344_v5, %v1188_v53 }
 0x59b   : >> { %v1294_v58 = vadd.f32 %v1293_v52, %v1292_v44 }
 0x59c   : >> { %v1391_v57 = vsel %vm1390_vm13, %v1389_v47, %v1273_v0  ;;  %v1315_v60 = vadd.f32 %v1314_v56, %v1313_v1  ;;  %v1334_v54 = vsel %vm639_vm4, %v1332_v16, 0.0  ;;  %v1367_v29 = vmul.f32 %v1855_v7, %v1346_v14  ;;  %v1859_v49 = vpop.eup (%p929_p8), %1858  ;;  %v1404_v7 = vld [vmem:[#allocation5 + $0x8] sm:$0xff] (%p929_p8) }
 0x59d   : >> { %v1295_v46 = vrot.slane %v1294_v58, 1  ;;  %v1336_v32 = vadd.f32 %v1335_v62, %v1334_v54  ;;  %v1856_v54 = vld [vmem:[%s2417_s12] sm:$0xff] (%p929_p8)   ;;  %v1857_v62 = vld [vmem:[%s2417_s12 + $0x8] sm:$0xff] (%p929_p8)   ;;  %v1861_v50 = vpop.eup (%p929_p8), %1860  ;;  %v1426_v3 = vadd.f32 (%p929_p8), 1.0, %v1859_v49 }
 0x59e   : >> { %v1316_v33 = vrot.slane %v1315_v60, 2  ;;  %v1349_v8 = vpop.permute.xlu1 %1348  ;;  %v1369_v37 = vadd.f32 %v1367_v29, %v1202_v21   ;;  %1684 = vmatpush3.bf16.msra.mxu0 (%p929_p8), %v1856_v54  ;;  %v1427_v4 = vadd.f32 (%p929_p8), 1.0, %v1861_v50 }
 0x59f   : >> { %v1296_v11 = vadd.f32 %v1295_v46, %v1294_v58  ;;  %v1337_v18 = vrot.slane %v1336_v32, 4  ;;  %v1355_v20 = vmul.f32 %v1349_v8, %v2288_v15  ;;  %1685 = vmatprep.subr.bf16.mxu0 (%p929_p8), %v1931_v17  ;;  %1862 = vrcp.f32 (%p929_p8), %v1426_v3  ;;  %v1403_v46 = vld [vmem:[#allocation5] sm:$0xff] (%p929_p8) }
 0x5a0   : >> { %v1317_v36 = vadd.f32 %v1316_v33, %v1315_v60  ;;  %1402 = vst.msk [vmem:[#allocation2 + $0x8] sm:$0xff] (%p929_p8), %vm639_vm4, %v1369_v37  ;;  %1864 = vrcp.f32 (%p929_p8), %v1427_v4 }
 0x5a1   : >> { %v1392_v26 = vsel %vm718_vm7, %v1391_v57, %v1296_v11  ;;  %v1338_v13 = vadd.f32 %v1337_v18, %v1336_v32  ;;  %v1357_v22 = vsel %vm639_vm4, %v1355_v20, 0.0  ;;  %v1637_v32 = vld [vmem:[%s2416_s11] ss:$0 sm:$0xff] (%p929_p8) }
 0x5a2   : >> { %v1318_v25 = vrot.slane %v1317_v36, 1  ;;  %v1353_v24 = vpop.permute.xlu1 %1352  ;;  %1686 = vmatpush3.bf16.msra.mxu0 (%p929_p8), %v1857_v62  ;;  %v1416_v17 = vmul.f32 (%p929_p8), %v1637_v32, %v1403_v46  ;;  %v1417_v33 = vmul.f32 (%p929_p8), %v1637_v32, %v1404_v7 }
 0x5a3   : >> { %v1339_v28 = vrot.slane %v1338_v13, 2  ;;  %v1356_v27 = vmul.f32 %v1353_v24, %v1346_v14 }
 0x5a4   : >> { %v1319_v55 = vadd.f32 %v1318_v25, %v1317_v36 }
 0x5a5   : >> { %v1340_v34 = vadd.f32 %v1339_v28, %v1338_v13  ;;  %v1358_v63 = vsel %vm639_vm4, %v1356_v27, 0.0 }
 0x5a6   : >> { %v1394_v19 = vsel %vm1393_vm14, %v1392_v26, %v1319_v55  ;;  %v1359_v38 = vadd.f32 %v1358_v63, %v1357_v22 }
 0x5a7   : >> { %v1341_v15 = vrot.slane %v1340_v34, 1  ;;  %v1376_v39 = vpop.permute.xlu1 %1375 }
 0x5a8   : >> { %v1360_v61 = vrot.slane %v1359_v38, 4  ;;  %v1379_v41 = vmul.f32 %v1376_v39, %v1369_v37 }
 0x5a9   : >> { %v1342_v47 = vadd.f32 %v1341_v15, %v1340_v34  ;;  %v1863_v9 = vpop.eup (%p929_p8), %1862 }
 0x5aa   : >> { %v1361_v44 = vadd.f32 %v1360_v61, %v1359_v38  ;;  %v1381_v51 = vsel %vm639_vm4, %v1379_v41, 0.0  ;;  %v1865_v18 = vpop.eup (%p929_p8), %1864  ;;  %v1432_v10 = vmul.f32 (%p929_p8), %v1863_v9, %v1405_v2 }
 0x5ab   : >> { %v1396_v31 = vsel %vm1395_vm15, %v1394_v19, %v1342_v47  ;;  %v1382_v1 = vadd.f32 %v1381_v51, %v1380_v48  ;;  %v1433_v36 = vmul.f32 (%p929_p8), %v1865_v18, %v1406_v42 }
 0x5ac   : >> { %v1362_v40 = vrot.slane %v1361_v44, 2 }
 0x5ad   : >> { %v1383_v52 = vrot.slane %v1382_v1, 4 }
 0x5ae   : >> { %v1363_v35 = vadd.f32 %v1362_v40, %v1361_v44 }
 0x5af   : >> { %v1384_v5 = vadd.f32 %v1383_v52, %v1382_v1 }
 0x5b0   : >> { %v1364_v53 = vrot.slane %v1363_v35, 1 }
 0x5b1   : >> { %v1385_v0 = vrot.slane %v1384_v5, 2 }
 0x5b2   : >> { %v1365_v56 = vadd.f32 %v1364_v53, %v1363_v35 }
 0x5b3   : >> { %v1386_v16 = vadd.f32 %v1385_v0, %v1384_v5  ;;  %v2420_v5 = vmov %v1368_v23 }
 0x5b4   : >> { %v1397_v6 = vsel %vm675_vm6, %v1396_v31, %v1365_v56  ;;  %931 = sbr.rel (!%p929_p8) target bundleno = 1069 (0x42d), region = 118 }
 0x5b5   : >> { %v1387_v58 = vrot.slane %v1386_v16, 1 }
 0x5b7   : >> { %v1388_v57 = vadd.f32 %v1387_v58, %v1386_v16 }
 0x5b9   : >> { %v1398_v60 = vsel %vm659_vm5, %v1397_v6, %v1388_v57  ;;  %v2419_v6 = vmov %v1369_v37 }
 0x5ba   : >> { %1400 = vst.msk [vmem:[%s1399_s23] sm:$0xff] %vm639_vm4, %v1398_v60 }
 0x5c1   : > { %v1407_v12 = vld [vmem:[#allocation7] sm:$0xff]  ;;  %v1408_v8 = vld [vmem:[#allocation7 + $0x8] sm:$0xff] }
 0x5c2   : > { %v1418_v14 = vadd.f32 %v1416_v17, %v1407_v12  ;;  %v1419_v11 = vadd.f32 %v1417_v33, %v1408_v8 }
 0x5c4   : > { %v1434_v26 = vmul.f32 %v1432_v10, %v1418_v14  ;;  %v1435_v13 = vmul.f32 %v1433_v36, %v1419_v11 }
 0x5c6   : > { %v1436_v20 = vpack.c.bf16 %v1435_v13, %v1434_v26 }
 0x5c8   : > { %1688 = vmatmul.mubr.msk.bf16.vlgmr.msra.gmra.mrb[8].mxu0 %vm639_vm4, %v1436_v20 }
 0x69b   : > { %v1490_v23 = vpop.f32.mrb[8].mxu0 }
 0x69c   : > { %1497 = vst.msk [vmem:[%s2050_s24] sm:$0xff] %vm491_vm1, %v1490_v23  ;;  %v1689_v25 = vpop.f32.mrb[9].mxu0 }
 0x69d   : > { %v1493_v24 = vpop.f32.mrb[10].mxu0 }
 0x69e   : > { %1498 = vst.msk [vmem:[%s2050_s24 + $0x8] sm:$0xff] %vm491_vm1, %v1493_v24  ;;  %v1690_v29 = vpop.f32.mrb[11].mxu0 }
 0x69f PF: > { %s23_s29 = sadd.s32 1, %s1916_s29   ;;  %s2421_s25 = smov %s1908_s27 }
 0x6a0   : > { %p20_p9 = scmp.ge.s32.totalorder %s23_s29, 6   ;;  %s2422_s26 = smov %s1912_s28 }
 0x6a1   : > { %s2423_s27 = smov %s2426_s30  ;;  %s2424_s28 = smov %s2430_s14 }
 0x6a2   :  { %22 = sbr.rel (!%p20_p9) target bundleno = 3 (0x3), region = 129 }

// kernel: tpu_custom_call.1
= control target key start
LH: loop header
LB: loop body
LE: loop exit
PB: predicated region body
PF: predicated region fallthrough
CT: control target
= control target key end

     0   :  { %s2014_s25 = smov 0   ;;  %s2016_s26 = smov 0   ;;  %s2405_s0 = inlined_call_operand.vmem [shape: f32[2,32,16], index: 0, kind: input, shape index: {}]   ;;  %s2406_s1 = inlined_call_operand.vmem [shape: f32[1,16], index: 1, kind: input, shape index: {}]   ;;  %s2407_s2 = inlined_call_operand.vmem [shape: f32[1,16], index: 2, kind: input, shape index: {}]   ;;  %s2408_s3 = inlined_call_operand.vmem [shape: bf16[16,32], index: 3, kind: input, shape index: {}]   ;;  %s2409_s4 = inlined_call_operand.vmem [shape: bf16[16,32], index: 4, kind: input, shape index: {}]   ;;  %s2410_s5 = inlined_call_operand.vmem [shape: f32[4,32], index: 5, kind: input, shape index: {}]   ;;  %s2411_s6 = inlined_call_operand.vmem [shape: f32[1,32], index: 6, kind: input, shape index: {}]   ;;  %s2412_s7 = inlined_call_operand.vmem [shape: bf16[32,33], index: 7, kind: input, shape index: {}]   ;;  %s2413_s8 = inlined_call_operand.vmem [shape: bf16[1,32], index: 8, kind: input, shape index: {}]   ;;  %s2414_s9 = inlined_call_operand.vmem [shape: f32[1,32], index: 9, kind: input, shape index: {}]   ;;  %s2415_s10 = inlined_call_operand.vmem [shape: f32[16,32], index: 10, kind: input, shape index: {}]   ;;  %s2416_s11 = inlined_call_operand.vmem [shape: f32[1,32], index: 11, kind: input, shape index: {}]   ;;  %s2417_s12 = inlined_call_operand.vmem [shape: bf16[32,16], index: 12, kind: input, shape index: {}]   ;;  %s2418_s13 = inlined_call_operand.vmem [shape: f32[2,32,16], index: 13, kind: output, shape index: {}]  }
   0x1   :  { %s2018_s27 = smov 0   ;;  %s2020_s28 = smov 0  }
   0x2   :  { %s2022_s29 = smov 0  }
   0x3 LB: > { %s32_s30 = sadd.s32 1, %s1908_s27  ;;  %s35_s14 = sadd.s32 1, %s1912_s28  ;;  %s1916_s29 = sphi %s2022_s29, %s23_s29   ;;  %s1912_s28 = sphi %s2020_s28, %s2424_s28   ;;  %s1908_s27 = sphi %s2018_s27, %s2423_s27   ;;  %s1904_s26 = sphi %s2016_s26, %s2422_s26   ;;  %s1900_s25 = sphi %s2014_s25, %s2421_s25  }
   0x4   : > { %p33_p0 = scmp.ge.s32.totalorder %s32_s30, 2  ;;  %p1614_p1 = scmp.ge.s32.totalorder %s1916_s29, 1 }
   0x5   : > { %p408_p2 = scmp.lt.s32.totalorder %s1916_s29, 5 }
   0x6   : > { %s2426_s30 = smov (%p33_p0, %s32_s30), 0  ;;  %s2428_s14 = smov (!%p33_p0, %s35_s14), %s1912_s28 }
   0x7   : > { %p409_p3 = pnand %p1614_p1, %p408_p2  ;;  %p37_p4 = scmp.ge.s32.totalorder %s2428_s14, 2 }
   0x8   : > { %s1615_s15 = sshll.u32 (!%p409_p3), %s1900_s25, 1  ;;  %p461_p5 = scmp.lt.s32.totalorder (!%p409_p3), %s1904_s26, 1 }
   0x9   : > { %s2430_s14 = smov (%p37_p4, %s2428_s14), 0  ;;  %412 = sbr.rel (%p409_p3) target bundleno = 1695 (0x69f), region = 72 }
   0xa   : > { %p463_p6 = scmp.lt.s32.totalorder (!%p409_p3), %s1615_s15, 3  ;;  %p1621_p7 = scmp.ne.s32.totalorder (!%p409_p3), %s1900_s25, 0 }
  0x10   : > { %s2432_s26 = smov (!%p461_p5, %s1904_s26), 1  ;;  %s2434_s15 = smov (!%p463_p6, %s1615_s15), 3 }
  0x11   : > { %s1616_s16 = sshll.u32 %s2432_s26, 2  ;;  %484 = sbr.rel (%p1621_p7) target bundleno = 24 (0x18), region = 76  ;;  %vm485_vm0 = vcmask (!%p1621_p7), 261120   ;;  %v1930_v0 = vmov (!%p1621_p7), 0.0  }
  0x12   : > { %s466_s17 = sadd.s32 %s1616_s16, %s2434_s15  ;;  %486 = vst.msk [vmem:[#allocation2] sm:$0xff] (!%p1621_p7), %vm485_vm0, %v1930_v0  ;;  %487 = vst.msk [vmem:[#allocation2 + $0x8] sm:$0xff] (!%p1621_p7), %vm485_vm0, %v1930_v0 }
  0x13   : > { %s1617_s18 = sshll.u32 %s466_s17, 3  ;;  %488 = vst.msk [vmem:[#allocation3] sm:$0xff] (!%p1621_p7), %vm485_vm0, %v1930_v0 }
  0x14   : > { %s468_s21 = scalar_lea.vmem %s2405_s0, %s1617_s18  ;;  %s2050_s24 = scalar_lea.vmem %s2418_s13, %s1617_s18 }
  0x18 PF: > { %v489_v1 = vld [vmem:[%s468_s21] sm:$0xff]  ;;  %vm491_vm1 = vcmask 130048   ;;  %v490_v2 = vld [vmem:[%s468_s21 + $0x8] sm:$0xff]  ;;  %v1931_v17 = vmov 0.0   ;;  %vm1932_vm2 = vmmov 0   ;;  %vm846_vm3 = vcmask 1040384  }
  0x19   : > { %v492_v3 = vsel %vm491_vm1, %v489_v1, 0.0  ;;  %v495_v4 = vsel %vm491_vm1, %v490_v2, 0.0  ;;  %v1770_v15 = vld [vmem:[%s2408_s3] sm:$0xff]   ;;  %1657 = vmatprep.subr.bf16.mxu0 %v1931_v17  ;;  %1663 = vmatprep.subr.bf16.mxu1 %v1931_v17  ;;  %v1773_v36 = vld [vmem:[%s2412_s7 + $0x8] sm:$0xff]   ;;  %v1933_v38 = vmov 0   ;;  %v645_v41 = vlaneseq  ;;  %s1934_s20 = smov 111  }
  0x1a   : > { %493 = vadd.xlane.f32.xlu0 %v492_v3  ;;  %v1771_v16 = vld [vmem:[%s2409_s4] sm:$0xff]   ;;  %1658 = vmatpush3.bf16.msra.mxu0 %v1770_v15  ;;  %v848_v39 = vsel %vm846_vm3, 65535, %v1933_v38  ;;  %v643_v47 = vld [vmem:[#allocation3] sm:$0xff]  ;;  %vm639_vm4 = vcmask 261120   ;;  %vm659_vm5 = vcmask 1046528   ;;  %vm675_vm6 = vcmask 1045504  }
  0x1b   : > { %1664 = vmatpush3.bf16.msra.mxu1 %v1771_v16  ;;  %1659 = vmatprep.mubr.msk.bf16.mxu0 %vm1932_vm2, %v1931_v17  ;;  %v1622_v26 = vld [vmem:[%s2406_s1] ss:$0 sm:$0xff]  ;;  %v2093_v42 = vshrl.u32 %v645_v41, 7  ;;  %vm718_vm7 = vcmask 1042432   ;;  %s1935_s21 = smov 127   ;;  %vm842_vm8 = vcmask 7168  }
  0x1c   : > { %1665 = vmatprep.mubr.msk.bf16.mxu1 %vm1932_vm2, %v1931_v17  ;;  %1669 = vmatprep.subr.bf16.mxu0 %v1931_v17  ;;  %v1623_v30 = vld [vmem:[%s2407_s2] ss:$0 sm:$0xff]  ;;  %s2152_s17 = smov 0  }
  0x1d   : > { %1677 = vmatprep.subr.bf16.mxu1 %v1931_v17  ;;  %v1772_v35 = vld [vmem:[%s2412_s7] sm:$0xff]   ;;  %v2096_v43 = vsub.s32 1, %v2093_v42  ;;  %v2102_v45 = vsub.s32 2, %v2093_v42  ;;  %v2107_v49 = vsub.s32 0, %v2093_v42  ;;  %v2110_v50 = vsub.s32 3, %v2093_v42 }
  0x1e   : > { %496 = vadd.xlane.f32.xlu0 %v495_v4  ;;  %v834_v37 = vld [vmem:[%s2413_s8] sm:$0x1] }
  0x1f   : > { %v850_v40 = vand.u32 %v848_v39, %v834_v37  ;;  %v642_v44 = vld [vmem:[%s2410_s5] sm:$0xf] }
  0x20   : > { %v654_v46 = vrot.slane %v642_v44, %v2096_v43  ;;  %v670_v48 = vrot.slane %v642_v44, %v2102_v45  ;;  %v648_v53 = vrot.slane %v642_v44, %v2107_v49  ;;  %v686_v54 = vrot.slane %v642_v44, %v2110_v50 }
  0x22   : > { %v655_v51 = vmul.f32 %v654_v46, %v643_v47  ;;  %v671_v52 = vmul.f32 %v670_v48, %v643_v47  ;;  %v649_v62 = vmul.f32 %v648_v53, %v643_v47 }
  0x24   : > { %v660_v58 = vrot.slane %v655_v51, 1  ;;  %v676_v63 = vrot.slane %v671_v52, 2 }
  0xa7   : > { %v494_v5 = vpop.xlane.xlu0 %493 }
  0xa8   : > { %v499_v6 = vmul.f32 0.0625, %v494_v5 }
  0xaa   : > { %v501_v7 = vsub.f32 %v489_v1, %v499_v6 }
  0xab   : > { %v497_v8 = vpop.xlane.xlu0 %496 }
  0xac   : > { %v500_v9 = vmul.f32 0.0625, %v497_v8  ;;  %v503_v10 = vmul.f32 %v501_v7, %v501_v7 }
  0xae   : > { %v502_v11 = vsub.f32 %v490_v2, %v500_v9  ;;  %v505_v12 = vsel %vm491_vm1, %v503_v10, 0.0 }
  0xaf   : > { %506 = vadd.xlane.f32.xlu1 %v505_v12 }
  0xb0   : > { %v504_v13 = vmul.f32 %v502_v11, %v502_v11 }
  0xb2   : > { %v508_v14 = vsel %vm491_vm1, %v504_v13, 0.0 }
  0xb3   : > { %509 = vadd.xlane.f32.xlu1 %v508_v14 }
 0x13c   : > { %v507_v18 = vpop.xlane.xlu1 %506 }
 0x13d   : > { %v511_v19 = vmul.f32 0.0625, %v507_v18 }
 0x13f   : > { %v513_v20 = vadd.f32 1e-05, %v511_v19 }
 0x140   : > { %v510_v21 = vpop.xlane.xlu1 %509 }
 0x141   : > { %1774 = vrsqrt.f32 %v513_v20  ;;  %v512_v22 = vmul.f32 0.0625, %v510_v21 }
 0x143   : > { %v514_v23 = vadd.f32 1e-05, %v512_v22 }
 0x145   : > { %1776 = vrsqrt.f32 %v514_v23 }
 0x14b   : > { %v1775_v24 = vpop.eup %1774 }
 0x14c   : > { %v517_v25 = vmul.f32 %v1775_v24, %v501_v7 }
 0x14e   : > { %v526_v29 = vmul.f32 %v1622_v26, %v517_v25 }
 0x14f   : > { %v1777_v27 = vpop.eup %1776 }
 0x150   : > { %v518_v28 = vmul.f32 %v1777_v27, %v502_v11  ;;  %v535_v32 = vadd.f32 %v1623_v30, %v526_v29 }
 0x152   : > { %v527_v31 = vmul.f32 %v1622_v26, %v518_v28 }
 0x154   : > { %v536_v33 = vadd.f32 %v1623_v30, %v527_v31 }
 0x156   : > { %v537_v34 = vpack.c.bf16 %v536_v33, %v535_v32  ;;  %v1628_v33 = vld [vmem:[%s2411_s6] ss:$0 sm:$0xff] }
 0x158   : > { %1660 = vmatmul.mubr.msk.bf16.vlgmr.msra.gmra.mrb[0].mxu0 %vm491_vm1, %v537_v34  ;;  %1666 = vmatmul.mubr.msk.bf16.vlgmr.msra.gmra.mrb[0].mxu1 %vm491_vm1, %v537_v34 }
 0x159   : > { %1673 = vmatprep.mubr.msk.bf16.mxu0 %vm1932_vm2, %v1931_v17  ;;  %1679 = vmatprep.mubr.msk.bf16.mxu1 %vm1932_vm2, %v1931_v17 }
 0x15a   : > { %1670 = vmatpush3.bf16.msra.mxu0 %v1772_v35  ;;  %1678 = vmatpush3.bf16.msra.mxu1 %v850_v40 }
 0x15b   : > { %1671 = vmatprep.subr.bf16.mxu0 %v1931_v17 }
 0x15e   : > { %1672 = vmatpush3.bf16.msra.mxu0 %v1773_v36 }
 0x22b   : > { %v583_v55 = vpop.f32.mrb[0].mxu0  ;;  %v632_v56 = vpop.f32.mrb[0].mxu1 }
 0x22c   : > { %v656_v57 = vmul.f32 %v654_v46, %v583_v55  ;;  %v672_v59 = vmul.f32 %v670_v48, %v583_v55  ;;  %640 = vst.msk [vmem:[#allocation6] sm:$0xff] %vm639_vm4, %v632_v56  ;;  %v1661_v60 = vpop.f32.mrb[1].mxu0  ;;  %v1667_v61 = vpop.f32.mrb[1].mxu1  ;;  %v650_v2 = vmul.f32 %v648_v53, %v583_v55  ;;  %v687_v5 = vmul.f32 %v686_v54, %v583_v55 }
 0x22d   : > { %v586_v0 = vpop.f32.mrb[2].mxu0  ;;  %v635_v1 = vpop.f32.mrb[2].mxu1 }
 0x22e   : > { %v661_v3 = vrot.slane %v656_v57, 1  ;;  %v677_v4 = vrot.slane %v672_v59, 2  ;;  %644 = vst.msk [vmem:[#allocation3] sm:$0xff] %vm639_vm4, %v586_v0  ;;  %641 = vst.msk [vmem:[#allocation6 + $0x8] sm:$0xff] %vm639_vm4, %v635_v1  ;;  %v1662_v6 = vpop.f32.mrb[3].mxu0  ;;  %v1668_v7 = vpop.f32.mrb[3].mxu1  ;;  %v694_v8 = vmul.f32 %v654_v46, %v586_v0  ;;  %v702_v9 = vmul.f32 %v670_v48, %v586_v0 }
 0x22f   : > { %v693_v12 = vmul.f32 %v648_v53, %v586_v0  ;;  %v710_v16 = vmul.f32 %v686_v54, %v586_v0  ;;  %v689_v20 = vrot.slane %v687_v5, 3  ;;  %v925_v5 = vld [vmem:[#allocation2] sm:$0xff]   ;;  %v926_v6 = vld [vmem:[#allocation2 + $0x8] sm:$0xff]  }
 0x230   : > { %v662_v10 = vsel %vm659_vm5, %v660_v58, %v661_v3  ;;  %v666_v11 = vadd.f32 %v661_v3, %v650_v2  ;;  %v696_v14 = vrot.slane %v694_v8, 1  ;;  %v704_v15 = vrot.slane %v702_v9, 2  ;;  %v1634_v7 = vld [vmem:[%s2414_s9] ss:$0 sm:$0xff] }
 0x231   : > { %v665_v13 = vadd.f32 %v662_v10, %v649_v62  ;;  %v678_v18 = vsel %vm675_vm6, %v676_v63, %v677_v4  ;;  %v712_v29 = vrot.slane %v710_v16, 3 }
 0x232   : > { %v682_v19 = vadd.f32 %v677_v4, %v666_v11  ;;  %v697_v22 = vsel %vm659_vm5, %v661_v3, %v696_v14  ;;  %v701_v23 = vadd.f32 %v696_v14, %v693_v12  ;;  %v705_v24 = vsel %vm675_vm6, %v677_v4, %v704_v15  ;;  %v2136_v3 = vld [vmem:[%s2415_s10] sm:$0xff]  ;;  %v2141_v4 = vld [vmem:[%s2415_s10 + $0x8] sm:$0xff] }
 0x233   : > { %v681_v21 = vadd.f32 %v678_v18, %v665_v13  ;;  %v700_v26 = vadd.f32 %v697_v22, %v650_v2 }
 0x234   : > { %v692_v25 = vadd.f32 %v689_v20, %v682_v19  ;;  %v709_v28 = vadd.f32 %v704_v15, %v701_v23 }
 0x235   : > { %v691_v27 = vadd.f32 %v689_v20, %v681_v21  ;;  %v708_v31 = vadd.f32 %v705_v24, %v700_v26 }
 0x236   : > { %v720_v30 = vrot.slane %v692_v25, 5  ;;  %v715_v34 = vadd.f32 %v712_v29, %v709_v28 }
 0x237   : > { %v719_v32 = vrot.slane %v691_v27, 5  ;;  %v714_v35 = vadd.f32 %v712_v29, %v708_v31 }
 0x238   : > { %v726_v37 = vrot.slane %v715_v34, 5 }
 0x239   : > { %v721_v36 = vsel %vm718_vm7, %v719_v32, %v720_v30  ;;  %v725_v39 = vrot.slane %v714_v35, 5 }
 0x23a   : > { %v736_v38 = vadd.f32 %v1628_v33, %v721_v36 }
 0x23b   : > { %v727_v41 = vsel %vm718_vm7, %v725_v39, %v726_v37 }
 0x23c   : > { %v1629_v40 = vmul.f32 -1.442695, %v736_v38  ;;  %v737_v44 = vadd.f32 %v1628_v33, %v727_v41 }
 0x23e   : > { %1778 = vpow2.f32 %v1629_v40  ;;  %v1630_v46 = vmul.f32 -1.442695, %v737_v44 }
 0x240   : > { %1780 = vpow2.f32 %v1630_v46 }
 0x248   : > { %v1779_v47 = vpop.eup %1778 }
 0x249   : > { %v744_v48 = vadd.f32 1.0, %v1779_v47 }
 0x24a   : > { %v1781_v51 = vpop.eup %1780 }
 0x24b   : > { %1782 = vrcp.f32 %v744_v48  ;;  %v745_v52 = vadd.f32 1.0, %v1781_v51 }
 0x24d   : > { %1784 = vrcp.f32 %v745_v52 }
 0x255   : > { %v1783_v53 = vpop.eup %1782 }
 0x256   : > { %v750_v54 = vmul.f32 %v1783_v53, %v736_v38 }
 0x257   : > { %v1785_v55 = vpop.eup %1784 }
 0x258   : > { %752 = vst.msk [vmem:[#allocation5] sm:$0xff] %vm639_vm4, %v750_v54  ;;  %v751_v56 = vmul.f32 %v1785_v55, %v737_v44 }
 0x25a   : > { %753 = vst.msk [vmem:[#allocation5 + $0x8] sm:$0xff] %vm639_vm4, %v751_v56  ;;  %v754_v57 = vpack.c.bf16 %v751_v56, %v750_v54 }
 0x25c   : > { %1674 = vmatmul.mubr.msk.bf16.vlgmr.msra.gmra.mrb[4].mxu0 %vm639_vm4, %v754_v57 }
 0x32f   : > { %v808_v58 = vpop.f32.mrb[4].mxu0 }
 0x330   : > { %825 = vrot.lane.b32.xlu1 %v808_v58, %s1934_s20  ;;  %817 = vrot.lane.b32.xlu0 %v808_v58, %s1935_s21  ;;  %v1675_v59 = vpop.f32.mrb[5].mxu0 }
 0x331   : > { %v811_v60 = vpop.f32.mrb[6].mxu0 }
 0x332   : > { %v833_v61 = vpack.c.bf16 %v811_v60, %v808_v58  ;;  %v1676_v62 = vpop.f32.mrb[7].mxu0 }
 0x334   : > { %819 = vrot.lane.b32.xlu1 %v811_v60, %s1935_s21  ;;  %1680 = vmatmul.mubr.msk.bf16.vlgmr.msra.gmra.mrb[4].mxu1 %vm842_vm8, %v833_v61 }
 0x338   : > { %827 = vrot.lane.b32.xlu1 %v811_v60, %s1934_s20 }
 0x3a2   : > { %v826_v63 = vpop.permute.xlu1 %825  ;;  %v818_v0 = vpop.permute.xlu0 %817 }
 0x3a3   : > { %831 = vst.msk [vmem:[#allocation9] sm:$0xff] %vm491_vm1, %v826_v63  ;;  %823 = vst.msk [vmem:[#allocation8] sm:$0xff] %vm491_vm1, %v818_v0 }
 0x3a6   : > { %v820_v1 = vpop.permute.xlu1 %819 }
 0x3a7   : > { %824 = vst.msk [vmem:[#allocation8 + $0x8] sm:$0xff] %vm491_vm1, %v820_v1 }
 0x3aa   : > { %v828_v2 = vpop.permute.xlu1 %827 }
 0x3ab   : > { %832 = vst.msk [vmem:[#allocation9 + $0x8] sm:$0xff] %vm491_vm1, %v828_v2 }
 0x407   : > { %v886_v8 = vpop.f32.mrb[4].mxu1 }
 0x408   : > { %v887_v9 = vadd.f32 %v1634_v7, %v886_v8  ;;  %v1681_v10 = vpop.f32.mrb[5].mxu1 }
 0x409   : > { %v889_v11 = vpop.f32.mrb[6].mxu1 }
 0x40a   : > { %v895_v12 = vmin.f32 %v887_v9, 20.0  ;;  %v890_v13 = vadd.f32 %v1634_v7, %v889_v11  ;;  %v1682_v14 = vpop.f32.mrb[7].mxu1  ;;  %vm893_vm10 = vcmp.gt.f32.partialorder %v887_v9, 20.0 }
 0x40c   : > { %v897_v15 = vmul.f32 1.442695, %v895_v12  ;;  %v896_v16 = vmin.f32 %v890_v13, 20.0  ;;  %vm894_vm12 = vcmp.gt.f32.partialorder %v890_v13, 20.0 }
 0x40e   : > { %1786 = vpow2.f32 %v897_v15  ;;  %v899_v18 = vmul.f32 1.442695, %v896_v16 }
 0x410   : > { %1788 = vpow2.f32 %v899_v18 }
 0x418   : > { %v1787_v19 = vpop.eup %1786 }
 0x419   : > { %v901_v20 = vadd.f32 1.0, %v1787_v19  ;;  %v904_v23 = vmul.f32 -0.5, %v1787_v19  ;;  %v907_v26 = vand.u32 2147483647, %v1787_v19 }
 0x41a   : > { %v1789_v21 = vpop.eup %1788 }
 0x41b   : > { %1790 = vlog2.f32 %v901_v20  ;;  %v910_v22 = vadd.f32 1.0, %v1789_v21  ;;  %v913_v24 = vmul.f32 -0.5, %v1789_v21  ;;  %v905_v25 = vadd.f32 1.0, %v904_v23 }
 0x41c   : > { %v916_v29 = vand.u32 2147483647, %v1789_v21  ;;  %vm908_vm9 = vcmp.lt.f32.partialorder %v907_v26, 0.0004427343 }
 0x41d   : > { %1792 = vlog2.f32 %v910_v22  ;;  %v914_v27 = vadd.f32 1.0, %v913_v24  ;;  %v906_v31 = vmul.f32 %v1787_v19, %v905_v25 }
 0x41e   : > { %vm917_vm11 = vcmp.lt.f32.partialorder %v916_v29, 0.0004427343 }
 0x41f   : > { %v915_v35 = vmul.f32 %v1789_v21, %v914_v27 }
 0x425   : > { %v1791_v28 = vpop.eup %1790 }
 0x426   : > { %v903_v30 = vmul.f32 0.6931472, %v1791_v28 }
 0x427   : > { %v1793_v32 = vpop.eup %1792 }
 0x428   : > { %v909_v33 = vsel %vm908_vm9, %v906_v31, %v903_v30  ;;  %v912_v34 = vmul.f32 0.6931472, %v1793_v32 }
 0x429   : > { %v919_v36 = vsel %vm893_vm10, %v887_v9, %v909_v33 }
 0x42a   : > { %921 = vst.msk [vmem:[#allocation4] sm:$0xff] %vm639_vm4, %v919_v36  ;;  %v918_v37 = vsel %vm917_vm11, %v915_v35, %v912_v34 }
 0x42b   : > { %v920_v38 = vsel %vm894_vm12, %v890_v13, %v918_v37 }
 0x42c   : > { %922 = vst.msk [vmem:[#allocation4 + $0x8] sm:$0xff] %vm639_vm4, %v920_v38 }
 0x42d LB: >> { %v1936_v39 = vmov 0   ;;  %s2164_s18 = sshll.u32 %s1928_s17, 3  ;;  %v1937_v44 = vmov 2   ;;  %v1938_v48 = vmov 1   ;;  %v1939_v52 = vmov 4   ;;  %s932_s17 = sadd.s32 1, %s1928_s17   ;;  %s1928_s17 = sphi %s2152_s17, %s932_s17   ;;  %v1924_v5 = vphi %v925_v5, %v2420_v5   ;;  %v1920_v6 = vphi %v926_v6, %v2419_v6  }
 0x42e   : >> { %1794 = vset.pattern.permute.xlu1 %v1936_v39  ;;  %s940_s19 = scalar_lea.vmem [#allocation8], %s2164_s18  ;;  %s974_s20 = scalar_lea.vmem [#allocation9], %s2164_s18  ;;  %v1940_v53 = vmov 3   ;;  %v1941_v55 = vmov 5   ;;  %v1942_v56 = vmov 6   ;;  %v1943_v57 = vmov 7  }
 0x42f   : >> { %v941_v40 = vld [vmem:[%s940_s19] sm:$0xff]  ;;  %s936_s21 = scalar_lea.vmem [#allocation4], %s2164_s18  ;;  %s938_s22 = scalar_lea.vmem [#allocation5], %s2164_s18  ;;  %v1050_v9 = vsub.s32 4, %v2093_v42  ;;  %v1060_v15 = vsub.s32 5, %v2093_v42  ;;  %v1070_v24 = vsub.s32 6, %v2093_v42 }
 0x430   : >> { %942 = vxpose.xlu0.b32.start.end [1/1] (short) (narrow) %v941_v40, 16  ;;  %v975_v41 = vld [vmem:[%s974_s20] sm:$0xff]  ;;  %vm1390_vm13 = vcmask 1041408   ;;  %vm1393_vm14 = vcmask 1043456   ;;  %vm1395_vm15 = vcmask 1044480   ;;  %s1399_s23 = scalar_lea.vmem [#allocation7], %s2164_s18 }
 0x431   : >> { %v939_v7 = vld [vmem:[%s938_s22] sm:$0xff]  ;;  %p929_p8 = scmp.ge.s32.totalorder %s932_s17, 2  }
 0x432   : > { %1683 = vmatprep.subr.bf16.mxu0 (%p929_p8), %v1931_v17  ;;  %1687 = vmatprep.mubr.msk.bf16.mxu0 (%p929_p8), %vm1932_vm2, %v1931_v17 }
 0x433   : >> { %v2184_v58 = vld [vmem:[%s936_s21] sm:$0xff] }
 0x434   : >> { %v2189_v59 = vrot.slane %v2184_v58, %v2107_v49  ;;  %v2196_v61 = vrot.slane %v2184_v58, %v2096_v43  ;;  %v2203_v0 = vrot.slane %v2184_v58, %v2102_v45  ;;  %v2211_v8 = vrot.slane %v2184_v58, %v2110_v50 }
 0x435   : >> { %976 = vxpose.xlu0.b32.start.end [1/1] (short) (narrow) %v975_v41, 16  ;;  %v2216_v10 = vmul.f32 %v939_v7, %v2184_v58  ;;  %v2221_v13 = vrot.slane %v2184_v58, %v1050_v9  ;;  %v2232_v22 = vrot.slane %v2184_v58, %v1060_v15  ;;  %v2246_v31 = vrot.slane %v2184_v58, %v1070_v24 }
 0x436   : >> { %v1012_v60 = vmul.f32 %v2189_v59, %v2136_v3  ;;  %v1022_v63 = vmul.f32 %v2196_v61, %v2136_v3  ;;  %v1032_v2 = vmul.f32 %v2203_v0, %v2136_v3  ;;  %v1042_v12 = vmul.f32 %v2211_v8, %v2136_v3 }
 0x437   : >> { %v2226_v16 = vrot.slane %v2216_v10, %v2107_v49  ;;  %v1052_v20 = vmul.f32 %v2221_v13, %v2136_v3  ;;  %v2238_v26 = vrot.slane %v2216_v10, %v2096_v43  ;;  %v1062_v28 = vmul.f32 %v2232_v22, %v2136_v3 }
 0x438   : >> { %v1014_v62 = vmul.f32 1.442695, %v1012_v60  ;;  %v1024_v1 = vmul.f32 1.442695, %v1022_v63  ;;  %v1034_v11 = vmul.f32 1.442695, %v1032_v2  ;;  %v2251_v34 = vrot.slane %v2216_v10, %v2102_v45 }
 0x439   : >> { %v1044_v18 = vmul.f32 1.442695, %v1042_v12  ;;  %v1064_v36 = vmul.f32 1.442695, %v1062_v28  ;;  %v1072_v37 = vmul.f32 %v2246_v31, %v2136_v3  ;;  %v2275_v63 = vrot.slane %v2216_v10, %v1060_v15 }
 0x43a   : >> { %1824 = vpow2.f32 %v1014_v62  ;;  %v2282_v12 = vrot.slane %v2216_v10, %v1070_v24  ;;  %v1023_v24 = vmul.f32 %v2196_v61, %v2141_v4  ;;  %v1043_v61 = vmul.f32 %v2211_v8, %v2141_v4 }
 0x43b   : >> { %1826 = vpow2.f32 %v1024_v1 }
 0x43c   : >> { %1828 = vpow2.f32 %v1034_v11 }
 0x43d   : >> { %1830 = vpow2.f32 %v1044_v18 }
 0x444   : >> { %v1825_v14 = vpop.eup %1824 }
 0x445   : >> { %v1203_v19 = vmul.f32 %v1924_v5, %v1825_v14  ;;  %v1827_v25 = vpop.eup %1826  ;;  %v1054_v5 = vmul.f32 1.442695, %v1052_v20 }
 0x446   : >> { %v1829_v33 = vpop.eup %1828 }
 0x447   : >> { %1832 = vpow2.f32 %v1054_v5  ;;  %v1831_v41 = vpop.eup %1830 }
 0x448   : >> { %1834 = vpow2.f32 %v1064_v36 }
 0x45e   : >> { %1803 = vset.pattern.permute.xlu0 %v1937_v44 }
 0x4b0   : >> { %v958_v46 = vpop.trf.xlu0 }
 0x4b1   : >> { %1091 = vperm.xlu1 %1794, %v958_v46  }
 0x4b4   : >> { %v959_v47 = vpop.trf.xlu0 }
 0x4b5   : >> { %1795 = vset.pattern.permute.xlu1 %v1938_v48 }
 0x4b6   : >> { %1106 = vperm.xlu1 %1795, %v958_v46  }
 0x4b8   : >> { %v2168_v51 = vpop.trf.xlu0 }
 0x4b9   : >> { %1256 = vperm.xlu0 %1803, %v2168_v51  }
 0x4ba   : >> { %1796 = vset.pattern.permute.xlu1 %v1937_v44 }
 0x4bb   : >> { %1120 = vperm.xlu1 %1796, %v958_v46  }
 0x4bc   : >> { %v2172_v54 = vpop.trf.xlu0 }
 0x4bd   : >> { %1806 = vset.pattern.permute.xlu0 %v1939_v52 }
 0x4be   : >> { %1302 = vperm.xlu0 %1806, %v2168_v51  }
 0x4bf   : >> { %1797 = vset.pattern.permute.xlu1 %v1940_v53 }
 0x4c0   : >> { %1134 = vperm.xlu1 %1797, %v958_v46  }
 0x4c2   : >> { %1808 = vset.pattern.permute.xlu0 %v1938_v48 }
 0x4c3   : >> { %1110 = vperm.xlu0 %1808, %v959_v47  }
 0x4c4   : >> { %1798 = vset.pattern.permute.xlu1 %v1939_v52 }
 0x4c5   : >> { %1148 = vperm.xlu1 %1798, %v958_v46  }
 0x4c7   : >> { %1814 = vset.pattern.permute.xlu0 %v1936_v39 }
 0x4c8   : >> { %1214 = vperm.xlu0 %1814, %v2172_v54  }
 0x4c9   : >> { %1799 = vset.pattern.permute.xlu1 %v1941_v55 }
 0x4ca   : >> { %1162 = vperm.xlu1 %1799, %v958_v46  }
 0x4cc   : >> { %1820 = vset.pattern.permute.xlu0 %v1941_v55 }
 0x4cd   : >> { %1329 = vperm.xlu0 %1820, %v2172_v54  }
 0x4ce   : >> { %1800 = vset.pattern.permute.xlu1 %v1942_v56 }
 0x4cf   : >> { %1176 = vperm.xlu1 %1800, %v958_v46  }
 0x4d1   : >> { %1821 = vset.pattern.permute.xlu0 %v1943_v57 }
 0x4d2   : >> { %1194 = vperm.xlu0 %1821, %v959_v47  }
 0x4d3   : >> { %1801 = vset.pattern.permute.xlu1 %v1936_v39 }
 0x4d4   : >> { %1209 = vperm.xlu1 %1801, %v2168_v51  }
 0x4d6   : >> { %1371 = vperm.xlu0 %1821, %v2168_v51  }
 0x4d8   : >> { %1802 = vset.pattern.permute.xlu1 %v1938_v48 }
 0x4d9   : >> { %1233 = vperm.xlu1 %1802, %v2168_v51  }
 0x4dd   : >> { %1804 = vset.pattern.permute.xlu1 %v1943_v57 }
 0x4de   : >> { %1190 = vperm.xlu1 %1804, %v958_v46  }
 0x4e2   : >> { %1805 = vset.pattern.permute.xlu1 %v1940_v53 }
 0x4e3   : >> { %1279 = vperm.xlu1 %1805, %v2168_v51  }
 0x4e7   : >> { %1807 = vset.pattern.permute.xlu1 %v1936_v39 }
 0x4e8   : >> { %1096 = vperm.xlu1 %1807, %v959_v47  }
 0x4ec   : >> { %1809 = vset.pattern.permute.xlu1 %v1937_v44 }
 0x4ed   : >> { %1124 = vperm.xlu1 %1809, %v959_v47  }
 0x4f1   : >> { %1810 = vset.pattern.permute.xlu1 %v1940_v53 }
 0x4f2   : >> { %1138 = vperm.xlu1 %1810, %v959_v47  }
 0x4f6   : >> { %1811 = vset.pattern.permute.xlu1 %v1939_v52 }
 0x4f7   : >> { %1152 = vperm.xlu1 %1811, %v959_v47  }
 0x4fb   : >> { %1812 = vset.pattern.permute.xlu1 %v1941_v55 }
 0x4fc   : >> { %1166 = vperm.xlu1 %1812, %v959_v47  }
 0x500   : >> { %1813 = vset.pattern.permute.xlu1 %v1942_v56 }
 0x501   : >> { %1180 = vperm.xlu1 %1813, %v959_v47   ;;  %v1074_v47 = vmul.f32 1.442695, %v1072_v37 }
 0x503   : >> { %1836 = vpow2.f32 %v1074_v47 }
 0x505   : >> { %1815 = vset.pattern.permute.xlu1 %v1938_v48 }
 0x506   : >> { %1237 = vperm.xlu1 %1815, %v2172_v54  }
 0x50a   : >> { %1816 = vset.pattern.permute.xlu1 %v1937_v44  ;;  %v2261_v44 = vrot.slane %v2216_v10, %v2110_v50 }
 0x50b   : >> { %1260 = vperm.xlu1 %1816, %v2172_v54  }
 0x50f   : >> { %1817 = vset.pattern.permute.xlu1 %v1940_v53  ;;  %v1833_v53 = vpop.eup %1832 }
 0x510   : >> { %1283 = vperm.xlu1 %1817, %v2172_v54   ;;  %v1835_v62 = vpop.eup %1834 }
 0x511   : >> { %v1837_v11 = vpop.eup %1836 }
 0x514   : >> { %1818 = vset.pattern.permute.xlu1 %v1939_v52 }
 0x515   : >> { %1306 = vperm.xlu1 %1818, %v2172_v54  }
 0x519   : >> { %1819 = vset.pattern.permute.xlu1 %v1941_v55 }
 0x51a   : >> { %1325 = vperm.xlu1 %1819, %v2168_v51  }
 0x51e   : >> { %1822 = vset.pattern.permute.xlu1 %v1942_v56 }
 0x51f   : >> { %1348 = vperm.xlu1 %1822, %v2168_v51  }
 0x523   : >> { %1352 = vperm.xlu1 %1822, %v2172_v54  }
 0x527   : >> { %1823 = vset.pattern.permute.xlu1 %v1943_v57 }
 0x528   : >> { %1375 = vperm.xlu1 %1823, %v2172_v54   ;;  %v2268_v54 = vrot.slane %v2216_v10, %v1050_v9 }
 0x530   : >> { %v1092_v21 = vpop.permute.xlu1 %1091 }
 0x531   : >> { %v1103_v23 = vmul.f32 %v2226_v16, %v1092_v21 }
 0x533   : >> { %v2240_v27 = vadd.f32 %v1203_v19, %v1103_v23  ;;  %v1013_v23 = vmul.f32 %v2189_v59, %v2141_v4 }
 0x535   : >> { %v1107_v29 = vpop.permute.xlu1 %1106  ;;  %v1228_v30 = vmul.f32 %v1827_v25, %v2240_v27  ;;  %v1016_v25 = vmul.f32 1.442695, %v1013_v23 }
 0x536   : >> { %v1117_v32 = vmul.f32 %v2238_v26, %v1107_v29  ;;  %v1026_v29 = vmul.f32 1.442695, %v1023_v24 }
 0x537   : >> { %1838 = vpow2.f32 %v1016_v25 }
 0x538   : >> { %v2253_v35 = vadd.f32 %v1228_v30, %v1117_v32  ;;  %v1257_v32 = vpop.permute.xlu0 %1256  ;;  %1840 = vpow2.f32 %v1026_v29 }
 0x53a   : >> { %v1121_v38 = vpop.permute.xlu1 %1120  ;;  %v1251_v39 = vmul.f32 %v1829_v33, %v2253_v35  ;;  %v1033_v33 = vmul.f32 %v2203_v0, %v2141_v4 }
 0x53b   : >> { %v1131_v40 = vmul.f32 %v2251_v34, %v1121_v38 }
 0x53c   : >> { %v1036_v38 = vmul.f32 1.442695, %v1033_v33 }
 0x53d   : >> { %v2263_v46 = vadd.f32 %v1251_v39, %v1131_v40  ;;  %v2302_v40 = vpop.permute.xlu0 %1302 }
 0x53e   : >> { %1842 = vpow2.f32 %v1036_v38 }
 0x53f   : >> { %v1135_v48 = vpop.permute.xlu1 %1134  ;;  %v1274_v51 = vmul.f32 %v1831_v41, %v2263_v46 }
 0x540   : >> { %v1145_v52 = vmul.f32 %v2261_v44, %v1135_v48 }
 0x541   : >> { %v1839_v36 = vpop.eup %1838 }
 0x542   : >> { %v2270_v55 = vadd.f32 %v1274_v51, %v1145_v52  ;;  %v1204_v39 = vmul.f32 %v1920_v6, %v1839_v36  ;;  %v1841_v48 = vpop.eup %1840  ;;  %v1111_v51 = vpop.permute.xlu0 %1110  ;;  %v1046_v52 = vmul.f32 1.442695, %v1043_v61  ;;  %v1080_v36 = vsub.s32 7, %v2093_v42  ;;  %v1406_v42 = vld [vmem:[#allocation6 + $0x8] sm:$0xff] (%p929_p8) }
 0x543   : > { %v1639_v45 = vmul.f32 (%p929_p8), -1.442695, %v1406_v42 }
 0x544   : >> { %v1149_v56 = vpop.permute.xlu1 %1148  ;;  %v1297_v57 = vmul.f32 %v1833_v53, %v2270_v55  ;;  %1844 = vpow2.f32 %v1046_v52  ;;  %v1263_v52 = vmul.f32 %v1257_v32, %v2263_v46 }
 0x545   : >> { %v1159_v60 = vmul.f32 %v2268_v54, %v1149_v56  ;;  %v1118_v56 = vmul.f32 %v2238_v26, %v1111_v51  ;;  %v1063_v26 = vmul.f32 %v2232_v22, %v2141_v4 }
 0x547   : >> { %v2277_v1 = vadd.f32 %v1297_v57, %v1159_v60  ;;  %v1215_v60 = vpop.permute.xlu0 %1214  ;;  %v1066_v24 = vmul.f32 1.442695, %v1063_v26 }
 0x548   : >> { %v1843_v57 = vpop.eup %1842 }
 0x549   : >> { %v1163_v2 = vpop.permute.xlu1 %1162  ;;  %v1320_v7 = vmul.f32 %v1835_v62, %v2277_v1 }
 0x54a   : >> { %v1173_v9 = vmul.f32 %v2275_v63, %v1163_v2 }
 0x54c   : >> { %v2284_v14 = vadd.f32 %v1320_v7, %v1173_v9 }
 0x54e   : >> { %v1177_v18 = vpop.permute.xlu1 %1176  ;;  %v1343_v19 = vmul.f32 %v1837_v11, %v2284_v14  ;;  %v1845_v23 = vpop.eup %1844 }
 0x54f   : >> { %v1187_v20 = vmul.f32 %v2282_v12, %v1177_v18 }
 0x551   : >> { %v2288_v15 = vadd.f32 %v1343_v19, %v1187_v20 }
 0x553   : >> { %v1210_v21 = vpop.permute.xlu1 %1209 }
 0x554   : >> { %v1217_v8 = vmul.f32 %v1210_v21, %v2240_v27 }
 0x558   : >> { %v1234_v5 = vpop.permute.xlu1 %1233 }
 0x559   : >> { %v1240_v22 = vmul.f32 %v1234_v5, %v2253_v35 }
 0x55d   : >> { %v2294_v28 = vpop.permute.xlu1 %1190 }
 0x562   : >> { %v2296_v30 = vpop.permute.xlu1 %1279 }
 0x563   : >> { %v1286_v46 = vmul.f32 %v2296_v30, %v2270_v55  ;;  %v1309_v30 = vmul.f32 %v2302_v40, %v2277_v1 }
 0x567   : >> { %v1097_v37 = vpop.permute.xlu1 %1096 }
 0x568   : >> { %v1104_v59 = vmul.f32 %v2226_v16, %v1097_v37  ;;  %v1053_v16 = vmul.f32 %v2221_v13, %v2141_v4  ;;  %v1219_v13 = vsel %vm639_vm4, %v1217_v8, 0.0 }
 0x56a   : >> { %v1206_v41 = vadd.f32 %v1204_v39, %v1104_v59  ;;  %v1056_v7 = vmul.f32 1.442695, %v1053_v16 }
 0x56c   : >> { %v1125_v47 = vpop.permute.xlu1 %1124  ;;  %v1229_v53 = vmul.f32 %v1841_v48, %v1206_v41  ;;  %v1218_v62 = vmul.f32 %v1215_v60, %v1206_v41  ;;  %1846 = vpow2.f32 %v1056_v7  ;;  %v1265_v60 = vsel %vm639_vm4, %v1263_v52, 0.0 }
 0x56d   : >> { %v1132_v18 = vmul.f32 %v2251_v34, %v1125_v47  ;;  %1848 = vpow2.f32 %v1066_v24  ;;  %v1073_v34 = vmul.f32 %v2246_v31, %v2141_v4  ;;  %v1081_v47 = vrot.slane %v2184_v58, %v1080_v36 }
 0x56e   : >> { %v1231_v6 = vadd.f32 %v1229_v53, %v1118_v56  ;;  %v1220_v11 = vsel %vm639_vm4, %v1218_v62, 0.0  ;;  %v1288_v24 = vsel %vm639_vm4, %v1286_v46, 0.0 }
 0x56f   : >> { %v1221_v25 = vadd.f32 %v1220_v11, %v1219_v13  ;;  %v1076_v41 = vmul.f32 1.442695, %v1073_v34  ;;  %v1083_v56 = vmul.f32 %v1081_v47, %v2141_v4 }
 0x570   : >> { %v1252_v9 = vmul.f32 %v1843_v57, %v1231_v6 }
 0x571   : >> { %v1139_v0 = vpop.permute.xlu1 %1138  ;;  %v1222_v27 = vrot.slane %v1221_v25, 4  ;;  %1850 = vpow2.f32 %v1076_v41  ;;  %v1086_v8 = vmul.f32 1.442695, %v1083_v56  ;;  %v1330_v41 = vpop.permute.xlu0 %1329 }
 0x572   : >> { %v1254_v20 = vadd.f32 %v1252_v9, %v1132_v18  ;;  %v1146_v21 = vmul.f32 %v2261_v44, %v1139_v0  ;;  %v1242_v44 = vsel %vm639_vm4, %v1240_v22, 0.0  ;;  %v1082_v0 = vmul.f32 %v1081_v47, %v2136_v3 }
 0x573   : >> { %v1223_v59 = vadd.f32 %v1222_v27, %v1221_v25 }
 0x574   : >> { %v1275_v29 = vmul.f32 %v1845_v23, %v1254_v20  ;;  %v1084_v7 = vmul.f32 1.442695, %v1082_v0 }
 0x575   : >> { %v1224_v35 = vrot.slane %v1223_v59, 2 }
 0x576   : >> { %v1153_v2 = vpop.permute.xlu1 %1152  ;;  %v1277_v37 = vadd.f32 %v1275_v29, %v1146_v21  ;;  %v1847_v38 = vpop.eup %1846  ;;  %1852 = vpow2.f32 %v1084_v7 }
 0x577   : >> { %v1160_v48 = vmul.f32 %v2268_v54, %v1153_v2  ;;  %v1849_v57 = vpop.eup %1848  ;;  %v1225_v54 = vadd.f32 %v1224_v35, %v1223_v59  ;;  %1854 = vpow2.f32 %v1086_v8 }
 0x578   : >> { %v1298_v51 = vmul.f32 %v1847_v38, %v1277_v37 }
 0x579   : >> { %v1226_v23 = vrot.slane %v1225_v54, 1 }
 0x57a   : >> { %v1300_v58 = vadd.f32 %v1298_v51, %v1160_v48  ;;  %v1311_v48 = vsel %vm639_vm4, %v1309_v30, 0.0 }
 0x57b   : >> { %v1167_v19 = vpop.permute.xlu1 %1166 }
 0x57c   : >> { %v1174_v18 = vmul.f32 %v2275_v63, %v1167_v19  ;;  %v1321_v26 = vmul.f32 %v1849_v57, %v1300_v58  ;;  %v1227_v19 = vadd.f32 %v1226_v23, %v1225_v54 }
 0x57e   : >> { %v1323_v34 = vadd.f32 %v1321_v26, %v1174_v18 }
 0x580   : >> { %v2315_v33 = vpop.permute.xlu1 %1180  ;;  %v1333_v40 = vmul.f32 %v1330_v41, %v1323_v34 }
 0x585   : >> { %v1238_v39 = vpop.permute.xlu1 %1237 }
 0x586   : >> { %v1241_v61 = vmul.f32 %v1238_v39, %v1231_v6  ;;  %v1851_v39 = vpop.eup %1850 }
 0x588   : >> { %v1243_v31 = vsel %vm639_vm4, %v1241_v61, 0.0 }
 0x589   : >> { %v1244_v5 = vadd.f32 %v1243_v31, %v1242_v44 }
 0x58a   : >> { %v1261_v53 = vpop.permute.xlu1 %1260 }
 0x58b   : >> { %v1245_v16 = vrot.slane %v1244_v5, 4  ;;  %v1264_v6 = vmul.f32 %v1261_v53, %v1254_v20  ;;  %v1188_v53 = vmul.f32 %v2282_v12, %v2315_v33 }
 0x58d   : >> { %v1246_v62 = vadd.f32 %v1245_v16, %v1244_v5  ;;  %v1266_v2 = vsel %vm639_vm4, %v1264_v6, 0.0  ;;  %v1344_v5 = vmul.f32 %v1851_v39, %v1323_v34  ;;  %v1200_v6 = vrot.slane %v2216_v10, %v1080_v36 }
 0x58e   : >> { %v1267_v32 = vadd.f32 %v1266_v2, %v1265_v60  ;;  %v1853_v2 = vpop.eup %1852 }
 0x58f   : >> { %v1247_v9 = vrot.slane %v1246_v62, 2  ;;  %v1284_v11 = vpop.permute.xlu1 %1283  ;;  %v1855_v7 = vpop.eup %1854  ;;  %v1201_v12 = vmul.f32 %v1200_v6, %v2294_v28  ;;  %v1366_v10 = vmul.f32 %v1853_v2, %v2288_v15  ;;  %v1405_v2 = vld [vmem:[#allocation6] sm:$0xff] (%p929_p8) }
 0x590   : >> { %v1268_v13 = vrot.slane %v1267_v32, 4  ;;  %v1287_v20 = vmul.f32 %v1284_v11, %v1277_v37  ;;  %v1638_v43 = vmul.f32 (%p929_p8), -1.442695, %v1405_v2 }
 0x591   : >> { %v1248_v25 = vadd.f32 %v1247_v9, %v1246_v62  ;;  %v1335_v62 = vsel %vm639_vm4, %v1333_v40, 0.0  ;;  %v1195_v9 = vpop.permute.xlu0 %1194  ;;  %v1368_v23 = vadd.f32 %v1366_v10, %v1201_v12  }
 0x592   : >> { %v1269_v29 = vadd.f32 %v1268_v13, %v1267_v32  ;;  %v1289_v27 = vsel %vm639_vm4, %v1287_v20, 0.0  ;;  %1858 = vpow2.f32 (%p929_p8), %v1638_v43 }
 0x593   : >> { %v1249_v21 = vrot.slane %v1248_v25, 1  ;;  %v1290_v55 = vadd.f32 %v1289_v27, %v1288_v24  ;;  %1401 = vst.msk [vmem:[#allocation2] sm:$0xff] (%p929_p8), %vm639_vm4, %v1368_v23  ;;  %1860 = vpow2.f32 (%p929_p8), %v1639_v45 }
 0x594   : >> { %v1270_v22 = vrot.slane %v1269_v29, 2  ;;  %v1307_v63 = vpop.permute.xlu1 %1306 }
 0x595   : >> { %v1250_v38 = vadd.f32 %v1249_v21, %v1248_v25  ;;  %v1291_v37 = vrot.slane %v1290_v55, 4  ;;  %v1310_v59 = vmul.f32 %v1307_v63, %v1300_v58  ;;  %v1202_v21 = vmul.f32 %v1200_v6, %v1195_v9  ;;  %v1372_v30 = vpop.permute.xlu0 %1371 }
 0x596   : >> { %v1271_v61 = vadd.f32 %v1270_v22, %v1269_v29 }
 0x597   : >> { %v1389_v47 = vsel %vm846_vm3, %v1227_v19, %v1250_v38  ;;  %v1292_v44 = vadd.f32 %v1291_v37, %v1290_v55  ;;  %v1312_v51 = vsel %vm639_vm4, %v1310_v59, 0.0  ;;  %v1378_v59 = vmul.f32 %v1372_v30, %v1368_v23 }
 0x598   : >> { %v1272_v31 = vrot.slane %v1271_v61, 1  ;;  %v1313_v1 = vadd.f32 %v1312_v51, %v1311_v48 }
 0x599   : >> { %v1293_v52 = vrot.slane %v1292_v44, 2  ;;  %v1326_v35 = vpop.permute.xlu1 %1325  ;;  %v1380_v48 = vsel %vm639_vm4, %v1378_v59, 0.0 }
 0x59a   : >> { %v1273_v0 = vadd.f32 %v1272_v31, %v1271_v61  ;;  %v1314_v56 = vrot.slane %v1313_v1, 4  ;;  %v1332_v16 = vmul.f32 %v1326_v35, %v2284_v14  ;;  %v1346_v14 = vadd.f32 %v1344_v5, %v1188_v53 }
 0x59b   : >> { %v1294_v58 = vadd.f32 %v1293_v52, %v1292_v44 }
 0x59c   : >> { %v1391_v57 = vsel %vm1390_vm13, %v1389_v47, %v1273_v0  ;;  %v1315_v60 = vadd.f32 %v1314_v56, %v1313_v1  ;;  %v1334_v54 = vsel %vm639_vm4, %v1332_v16, 0.0  ;;  %v1367_v29 = vmul.f32 %v1855_v7, %v1346_v14  ;;  %v1859_v49 = vpop.eup (%p929_p8), %1858  ;;  %v1404_v7 = vld [vmem:[#allocation5 + $0x8] sm:$0xff] (%p929_p8) }
 0x59d   : >> { %v1295_v46 = vrot.slane %v1294_v58, 1  ;;  %v1336_v32 = vadd.f32 %v1335_v62, %v1334_v54  ;;  %v1856_v54 = vld [vmem:[%s2417_s12] sm:$0xff] (%p929_p8)   ;;  %v1857_v62 = vld [vmem:[%s2417_s12 + $0x8] sm:$0xff] (%p929_p8)   ;;  %v1861_v50 = vpop.eup (%p929_p8), %1860  ;;  %v1426_v3 = vadd.f32 (%p929_p8), 1.0, %v1859_v49 }
 0x59e   : >> { %v1316_v33 = vrot.slane %v1315_v60, 2  ;;  %v1349_v8 = vpop.permute.xlu1 %1348  ;;  %v1369_v37 = vadd.f32 %v1367_v29, %v1202_v21   ;;  %1684 = vmatpush3.bf16.msra.mxu0 (%p929_p8), %v1856_v54  ;;  %v1427_v4 = vadd.f32 (%p929_p8), 1.0, %v1861_v50 }
 0x59f   : >> { %v1296_v11 = vadd.f32 %v1295_v46, %v1294_v58  ;;  %v1337_v18 = vrot.slane %v1336_v32, 4  ;;  %v1355_v20 = vmul.f32 %v1349_v8, %v2288_v15  ;;  %1685 = vmatprep.subr.bf16.mxu0 (%p929_p8), %v1931_v17  ;;  %1862 = vrcp.f32 (%p929_p8), %v1426_v3  ;;  %v1403_v46 = vld [vmem:[#allocation5] sm:$0xff] (%p929_p8) }
 0x5a0   : >> { %v1317_v36 = vadd.f32 %v1316_v33, %v1315_v60  ;;  %1402 = vst.msk [vmem:[#allocation2 + $0x8] sm:$0xff] (%p929_p8), %vm639_vm4, %v1369_v37  ;;  %1864 = vrcp.f32 (%p929_p8), %v1427_v4 }
 0x5a1   : >> { %v1392_v26 = vsel %vm718_vm7, %v1391_v57, %v1296_v11  ;;  %v1338_v13 = vadd.f32 %v1337_v18, %v1336_v32  ;;  %v1357_v22 = vsel %vm639_vm4, %v1355_v20, 0.0  ;;  %v1637_v32 = vld [vmem:[%s2416_s11] ss:$0 sm:$0xff] (%p929_p8) }
 0x5a2   : >> { %v1318_v25 = vrot.slane %v1317_v36, 1  ;;  %v1353_v24 = vpop.permute.xlu1 %1352  ;;  %1686 = vmatpush3.bf16.msra.mxu0 (%p929_p8), %v1857_v62  ;;  %v1416_v17 = vmul.f32 (%p929_p8), %v1637_v32, %v1403_v46  ;;  %v1417_v33 = vmul.f32 (%p929_p8), %v1637_v32, %v1404_v7 }
 0x5a3   : >> { %v1339_v28 = vrot.slane %v1338_v13, 2  ;;  %v1356_v27 = vmul.f32 %v1353_v24, %v1346_v14 }
 0x5a4   : >> { %v1319_v55 = vadd.f32 %v1318_v25, %v1317_v36 }
 0x5a5   : >> { %v1340_v34 = vadd.f32 %v1339_v28, %v1338_v13  ;;  %v1358_v63 = vsel %vm639_vm4, %v1356_v27, 0.0 }
 0x5a6   : >> { %v1394_v19 = vsel %vm1393_vm14, %v1392_v26, %v1319_v55  ;;  %v1359_v38 = vadd.f32 %v1358_v63, %v1357_v22 }
 0x5a7   : >> { %v1341_v15 = vrot.slane %v1340_v34, 1  ;;  %v1376_v39 = vpop.permute.xlu1 %1375 }
 0x5a8   : >> { %v1360_v61 = vrot.slane %v1359_v38, 4  ;;  %v1379_v41 = vmul.f32 %v1376_v39, %v1369_v37 }
 0x5a9   : >> { %v1342_v47 = vadd.f32 %v1341_v15, %v1340_v34  ;;  %v1863_v9 = vpop.eup (%p929_p8), %1862 }
 0x5aa   : >> { %v1361_v44 = vadd.f32 %v1360_v61, %v1359_v38  ;;  %v1381_v51 = vsel %vm639_vm4, %v1379_v41, 0.0  ;;  %v1865_v18 = vpop.eup (%p929_p8), %1864  ;;  %v1432_v10 = vmul.f32 (%p929_p8), %v1863_v9, %v1405_v2 }
 0x5ab   : >> { %v1396_v31 = vsel %vm1395_vm15, %v1394_v19, %v1342_v47  ;;  %v1382_v1 = vadd.f32 %v1381_v51, %v1380_v48  ;;  %v1433_v36 = vmul.f32 (%p929_p8), %v1865_v18, %v1406_v42 }
 0x5ac   : >> { %v1362_v40 = vrot.slane %v1361_v44, 2 }
 0x5ad   : >> { %v1383_v52 = vrot.slane %v1382_v1, 4 }
 0x5ae   : >> { %v1363_v35 = vadd.f32 %v1362_v40, %v1361_v44 }
 0x5af   : >> { %v1384_v5 = vadd.f32 %v1383_v52, %v1382_v1 }
 0x5b0   : >> { %v1364_v53 = vrot.slane %v1363_v35, 1 }
 0x5b1   : >> { %v1385_v0 = vrot.slane %v1384_v5, 2 }
 0x5b2   : >> { %v1365_v56 = vadd.f32 %v1364_v53, %v1363_v35 }
 0x5b3   : >> { %v1386_v16 = vadd.f32 %v1385_v0, %v1384_v5  ;;  %v2420_v5 = vmov %v1368_v23 }
 0x5b4   : >> { %v1397_v6 = vsel %vm675_vm6, %v1396_v31, %v1365_v56  ;;  %931 = sbr.rel (!%p929_p8) target bundleno = 1069 (0x42d), region = 118 }
 0x5b5   : >> { %v1387_v58 = vrot.slane %v1386_v16, 1 }
 0x5b7   : >> { %v1388_v57 = vadd.f32 %v1387_v58, %v1386_v16 }
 0x5b9   : >> { %v1398_v60 = vsel %vm659_vm5, %v1397_v6, %v1388_v57  ;;  %v2419_v6 = vmov %v1369_v37 }
 0x5ba   : >> { %1400 = vst.msk [vmem:[%s1399_s23] sm:$0xff] %vm639_vm4, %v1398_v60 }
 0x5c1   : > { %v1407_v12 = vld [vmem:[#allocation7] sm:$0xff]  ;;  %v1408_v8 = vld [vmem:[#allocation7 + $0x8] sm:$0xff] }
 0x5c2   : > { %v1418_v14 = vadd.f32 %v1416_v17, %v1407_v12  ;;  %v1419_v11 = vadd.f32 %v1417_v33, %v1408_v8 }
 0x5c4   : > { %v1434_v26 = vmul.f32 %v1432_v10, %v1418_v14  ;;  %v1435_v13 = vmul.f32 %v1433_v36, %v1419_v11 }
 0x5c6   : > { %v1436_v20 = vpack.c.bf16 %v1435_v13, %v1434_v26 }
 0x5c8   : > { %1688 = vmatmul.mubr.msk.bf16.vlgmr.msra.gmra.mrb[8].mxu0 %vm639_vm4, %v1436_v20 }
 0x69b   : > { %v1490_v23 = vpop.f32.mrb[8].mxu0 }
 0x69c   : > { %1497 = vst.msk [vmem:[%s2050_s24] sm:$0xff] %vm491_vm1, %v1490_v23  ;;  %v1689_v25 = vpop.f32.mrb[9].mxu0 }
 0x69d   : > { %v1493_v24 = vpop.f32.mrb[10].mxu0 }
 0x69e   : > { %1498 = vst.msk [vmem:[%s2050_s24 + $0x8] sm:$0xff] %vm491_vm1, %v1493_v24  ;;  %v1690_v29 = vpop.f32.mrb[11].mxu0 }
 0x69f PF: > { %s23_s29 = sadd.s32 1, %s1916_s29   ;;  %s2421_s25 = smov %s1908_s27 }
 0x6a0   : > { %p20_p9 = scmp.ge.s32.totalorder %s23_s29, 6   ;;  %s2422_s26 = smov %s1912_s28 }
 0x6a1   : > { %s2423_s27 = smov %s2426_s30  ;;  %s2424_s28 = smov %s2430_s14 }
 0x6a2   :  { %22 = sbr.rel (!%p20_p9) target bundleno = 3 (0x3), region = 129 }

</bundles_post_ra>
